<compile_context>
chip_gen: v7x
topology: tpu7x:2x2x1
jax: 0.10.0
libtpu: 0.0.40
codegen_flags: <defaults>
</compile_context>

<pallas_src>
import functools

import numpy as np
import jax
import jax.numpy as jnp
from jax import lax
from jax.experimental import pallas as pl
from jax.experimental.pallas import tpu as pltpu


# ----------------------------------------------------------------------------
# Pallas kernel: one UpsampleBlock, one (batch, row-tile) grid cell.
# ----------------------------------------------------------------------------
def upsample_block_kernel(alphas_ref, xu_ref, xc_ref, xd_ref,
                          w1_ref, w3_ref, wl_ref, wr_ref, o_ref,
                          *, H, W, TR, HALO):
    """All math on (channels, padded_lanes) tiles, spatial dim lane-dense.

    xu/xc/xd hold HALO rows above, TR centre rows and HALO rows below of the
    input image (row-major flattened).  The 3x3 conv (zero pad) and the 2x
    bilinear (edge clamp) stencils are pltpu.roll over the padded lane extent
    plus global-coordinate boundary masks, so clamped/garbage halo rows at the
    image border are never consumed.
    """
    r = pl.program_id(1)
    row0 = r * TR                           # first image row of this tile
    c2 = wl_ref.shape[0]
    PW = (TR + 2 * HALO) * W                # padded lane extent
    cdt = xc_ref.dtype                      # compute dtype (f32 or bf16)
    f32 = jnp.float32

    a_neg0 = alphas_ref[0]                  # PReLU slopes (scalars, SMEM)
    a_neg1 = alphas_ref[1]

    # Padded working activation: image rows [row0-HALO, row0+TR+HALO).
    x = jnp.concatenate([xu_ref[0], xc_ref[0], xd_ref[0]], axis=1)   # (C, PW)

    # Global image coordinates of every padded lane + boundary masks.  Computed
    # ONCE and reused by all 8 conv taps and 6 bilinear taps.
    lane = lax.broadcasted_iota(jnp.int32, (1, PW), 1)
    if (W & (W - 1)) == 0:                  # power-of-two W: shift/and
        shift = W.bit_length() - 1
        ly = lane >> shift
        gx = lane & (W - 1)
    else:
        ly = lane // W
        gx = lane % W
    gy = ly + (row0 - HALO)
    up_ok = gy >= 1                         # source row gy-1 inside the image
    dn_ok = gy <= H - 2                     # source row gy+1 inside the image
    lt_ok = gx >= 1
    rt_ok = gx <= W - 2
    ok = {(-1, -1): up_ok & lt_ok, (-1, 0): up_ok, (-1, 1): up_ok & rt_ok,
          (0, -1): lt_ok, (0, 0): None, (0, 1): rt_ok,
          (1, -1): dn_ok & lt_ok, (1, 0): dn_ok, (1, 1): dn_ok & rt_ok}

    def shifted(a, dy, dx, clamp):
        """out[., y*W+x] = a[., (y+dy)*W+(x+dx)]; out-of-image sources -> 0
        (conv zero-pad) or the centre value itself (bilinear edge clamp; valid
        because |dy|,|dx| <= 1)."""
        d = dy * W + dx
        src = pltpu.roll(a, (-d) % PW, axis=1) if d % PW else a
        v = ok[(dy, dx)]
        if v is None:
            return src
        return jnp.where(v, src, a if clamp else 0.0)

    # ---- left branch: 1x1 conv + PReLU --------------------------------------
    a = jnp.dot(w1_ref[...], x, preferred_element_type=f32)
    a = jnp.where(a >= 0, a, a_neg0 * a).astype(cdt)

    # ---- 3x3 conv (zero pad) + PReLU: nine (C,C)@(C,PW) matmuls accumulated
    # in f32 directly from rolled vreg values (no (9C, PW) staging scratch).
    b = None
    k = 0
    for dy in (-1, 0, 1):
        for dx in (-1, 0, 1):
            t = jnp.dot(w3_ref[k], shifted(a, dy, dx, clamp=False),
                        preferred_element_type=f32)
            b = t if b is None else b + t
            k += 1
    b = jnp.where(b >= 0, b, a_neg1 * b).astype(cdt)

    # ---- fold the two C -> C/2 output 1x1 convs BEFORE the shared (linear)
    # bilinear upsample (exact; upsample then runs once on C/2 channels).
    m = (jnp.dot(wl_ref[...], b, preferred_element_type=f32) +
         jnp.dot(wr_ref[...], x, preferred_element_type=f32))         # (c2, PW)

    # ---- separable 2x bilinear (align_corners=False) as 4 quarter planes ----
    ce = 0.75 * m + 0.25 * shifted(m, 0, -1, clamp=True)   # even output cols
    co = 0.75 * m + 0.25 * shifted(m, 0, +1, clamp=True)   # odd  output cols
    ce3, co3 = 0.75 * ce, 0.75 * co                         # hoisted, reused
    quarters = (ce3 + 0.25 * shifted(ce, -1, 0, clamp=True),   # (2y  , 2x  )
                co3 + 0.25 * shifted(co, -1, 0, clamp=True),   # (2y  , 2x+1)
                ce3 + 0.25 * shifted(ce, +1, 0, clamp=True),   # (2y+1, 2x  )
                co3 + 0.25 * shifted(co, +1, 0, clamp=True))   # (2y+1, 2x+1)

    lo, hi = HALO * W, (HALO + TR) * W      # centre lanes (128-aligned offset)
    for q, val in enumerate(quarters):
        o_ref[0, q * c2:(q + 1) * c2, :] = val[:, lo:hi].astype(o_ref.dtype)


# ----------------------------------------------------------------------------
# Tile planning / VMEM budgeting helpers.
# ----------------------------------------------------------------------------
def _vmem_cap_bytes():
    try:
        return int(pltpu.get_tpu_info().vmem_capacity_bytes)
    except Exception:
        return 64 * 1024 * 1024             # conservative default (v7x per-TC)


def _block_vmem_estimate(c, tr, halo, w, itemsize):
    """Rough per-grid-step VMEM bytes: double-buffered blocks + live values."""
    pw = (tr + 2 * halo) * w
    c2 = c // 2
    io_blocks = (c * (tr + 2 * halo) * w + 2 * c * tr * w) * itemsize
    weights = (10 * c * c + 2 * c2 * c) * itemsize
    live = 2 * c * pw * itemsize + (c + 4 * c2) * pw * 4
    return 2 * io_blocks + 2 * weights + live


def _plan_row_tiles(h, w, c, itemsize, vmem_cap, tile_rows=None):
    """Pick (tile_rows, halo_rows).

    halo is the smallest row count >= 2 whose lane extent is a multiple of 128
    (keeps every block and the centre lane slice 128-aligned); tile_rows is the
    largest multiple of halo dividing H that stays in the ~2-8k lane sweet spot
    and within half the physical VMEM.  Falls back to a single full-height tile
    for awkward sizes.
    """
    halo = None
    for cand in range(2, h + 1):
        if (cand * w) % 128 == 0:
            halo = cand
            break
    if halo is None or h % halo != 0:
        return h, h
    if tile_rows is not None and tile_rows % halo == 0 and h % tile_rows == 0:
        return tile_rows, halo
    cands = [t for t in range(halo, h + 1, halo) if h % t == 0]
    budget = vmem_cap // 2
    best = cands[0]
    for t in cands:
        if (t * w <= 8192
                and _block_vmem_estimate(c, t, halo, w, itemsize) <= budget):
            best = t
    return best, halo


# ----------------------------------------------------------------------------
# Wrappers.
# ----------------------------------------------------------------------------
def upsample_block(x_flat, params, h, w, *, compute_dtype=jnp.float32,
                   tile_rows=None):
    """x_flat: (N, C, H*W) -> (N, C//2, (2H)*(2W)) (one UpsampleBlock)."""
    alphas, w1, w3, wl, wr = params
    n, c, hw = x_flat.shape
    assert hw == h * w and c % 2 == 0
    c2 = c // 2

    x_flat = x_flat.astype(compute_dtype)
    w1 = w1.astype(compute_dtype)
    w3 = w3.astype(compute_dtype)
    wl = wl.astype(compute_dtype)
    wr = wr.astype(compute_dtype)
    alphas = alphas.astype(jnp.float32)

    itemsize = jnp.dtype(compute_dtype).itemsize
    cap = _vmem_cap_bytes()
    tr, halo = _plan_row_tiles(h, w, c, itemsize, cap, tile_rows)
    rb = tr // halo                          # centre rows per halo chunk
    n_row_tiles = h // tr
    n_halo_chunks = h // halo
    est = _block_vmem_estimate(c, tr, halo, w, itemsize)
    vmem_limit = int(min(cap * 9 // 10, max(32 * 1024 * 1024, 2 * est)))

    kernel = functools.partial(upsample_block_kernel,
                               H=h, W=w, TR=tr, HALO=halo)

    def up_map(i, r):                        # HALO rows just above the tile
        return (i, 0, jnp.maximum(r * rb - 1, 0))

    def dn_map(i, r):                        # HALO rows just below the tile
        return (i, 0, jnp.minimum((r + 1) * rb, n_halo_chunks - 1))

    quarters = pl.pallas_call(
        kernel,
        out_shape=jax.ShapeDtypeStruct((n, 4 * c2, hw), compute_dtype),
        grid=(n, n_row_tiles),
        in_specs=[
            pl.BlockSpec((2,), lambda i, r: (0,), memory_space=pltpu.SMEM),
            pl.BlockSpec((1, c, halo * w), up_map),                  # halo above
            pl.BlockSpec((1, c, tr * w), lambda i, r: (i, 0, r)),    # centre rows
            pl.BlockSpec((1, c, halo * w), dn_map),                  # halo below
            pl.BlockSpec((c, c), lambda i, r: (0, 0)),               # conv1x1 W
            pl.BlockSpec((9, c, c), lambda i, r: (0, 0, 0)),         # conv3x3 W
            pl.BlockSpec((c2, c), lambda i, r: (0, 0)),              # left  out W
            pl.BlockSpec((c2, c), lambda i, r: (0, 0)),              # right out W
        ],
        out_specs=pl.BlockSpec((1, 4 * c2, tr * w), lambda i, r: (i, 0, r)),
        compiler_params=pltpu.CompilerParams(
            dimension_semantics=("parallel", "parallel"),   # batch & row tiles
            vmem_limit_bytes=vmem_limit,
        ),
    )(alphas, x_flat, x_flat, x_flat, w1, w3, wl, wr)

    # Interleave the 4 quarter planes -> (N, C/2, 2H, 2W), then re-flatten for
    # the next block.  This single XLA transpose is the remaining per-block
    # HBM round-trip (folding it into the next block's index math is the only
    # way to remove it; see header note).
    out = quarters.reshape(n, 2, 2, c2, h, w)        # (n, ry, rx, c, y, x)
    out = out.transpose(0, 3, 4, 1, 5, 2)            # (n, c, y, ry, x, rx)
    return out.reshape(n, c2, (2 * h) * (2 * w))


def upsample_forward(x_nchw, all_params, *, compute_dtype=jnp.float32,
                     tile_rows=None):
    n, c, h, w = x_nchw.shape
    cur = x_nchw.reshape(n, c, h * w)                # free reshape, no transpose
    for params in all_params:
        cur = upsample_block(cur, params, h, w, compute_dtype=compute_dtype,
                             tile_rows=tile_rows)
        c, h, w = c // 2, 2 * h, 2 * w
    return cur.reshape(n, c, h, w).astype(x_nchw.dtype)


def init_params(key, channels, num_blocks):
    """Deterministic synthetic params (bias=False, PReLU num_parameters=1, 0.25).

    Layout convention (for importing real torch weights):
      w1    = conv1x1.weight[:, :, 0, 0]                         (C, C)
      w3[k] = conv3x3.weight[:, :, k // 3, k % 3]                 (9, C, C)
      wl/wr = left/right out-conv1x1.weight[:, :, 0, 0]           (C/2, C)
    """
    params = []
    c = channels
    for _ in range(num_blocks):
        key, k1, k3, kl, kr = jax.random.split(key, 5)
        w1 = jax.random.normal(k1, (c, c), jnp.float32) / np.sqrt(c)
        w3 = jax.random.normal(k3, (9, c, c), jnp.float32) / np.sqrt(9 * c)
        wl = jax.random.normal(kl, (c // 2, c), jnp.float32) / np.sqrt(c)
        wr = jax.random.normal(kr, (c // 2, c), jnp.float32) / np.sqrt(c)
        alphas = jnp.array([0.25, 0.25], jnp.float32)
        params.append((alphas, w1, w3, wl, wr))
        c //= 2
    return params


# ----------------------------------------------------------------------------
# Pure-JAX reference (PyTorch semantics) for numerical cross-checks.
# ----------------------------------------------------------------------------
def _bilinear_matrix_1d(n: int) -> np.ndarray:
    """2x bilinear upsample matrix, PyTorch align_corners=False semantics."""
    out = np.zeros((2 * n, n), dtype=np.float32)
    for i in range(2 * n):
        src = max((i + 0.5) / 2.0 - 0.5, 0.0)
        i0 = min(int(np.floor(src)), n - 1)
        i1 = min(i0 + 1, n - 1)
        w1 = src - i0
        out[i, i0] += 1.0 - w1
        out[i, i1] += w1
    return out


def _reference_block(x, params):
    alphas, w1, w3, wl, wr = params
    n, c, h, w = x.shape
    hi = "highest"
    a = jnp.einsum("oi,nihw->nohw", w1, x, precision=hi)
    a = jnp.where(a >= 0, a, alphas[0] * a)
    ap = jnp.pad(a, ((0, 0), (0, 0), (1, 1), (1, 1)))
    b = jnp.zeros_like(a)
    for k in range(9):
        ky, kx = k // 3, k % 3
        b = b + jnp.einsum("oi,nihw->nohw", w3[k],
                           ap[:, :, ky:ky + h, kx:kx + w], precision=hi)
    b = jnp.where(b >= 0, b, alphas[1] * b)
    uh = jnp.asarray(_bilinear_matrix_1d(h))
    uw = jnp.asarray(_bilinear_matrix_1d(w))

    def up2(t):
        t = jnp.einsum("ph,nchw->ncpw", uh, t, precision=hi)
        return jnp.einsum("qw,ncpw->ncpq", uw, t, precision=hi)

    left = jnp.einsum("oi,nihw->nohw", wl, up2(b), precision=hi)
    right = jnp.einsum("oi,nihw->nohw", wr, up2(x), precision=hi)
    return left + right


def reference_forward(x, all_params):
    for p in all_params:
        x = _reference_block(x, p)
    return x


def _check(actual, ref, *, atol, rtol, l2):
    """Elementwise tolerance (robust to MXU f32 pass-precision) plus a tight
    global relative-L2 bound that layout/weight-packing bugs cannot hide in."""
    actual = np.asarray(actual, np.float64)
    ref = np.asarray(ref, np.float64)
    np.testing.assert_allclose(actual, ref, rtol=rtol, atol=atol)
    rel = float(np.linalg.norm(actual - ref) / np.linalg.norm(ref))
    assert rel < l2, f"relative L2 error {rel} >= {l2}"


if __name__ == "__main__":
    channels = 8
    scale_factor = 4                           # -> 2 UpsampleBlocks (log2(4))
    num_blocks = int(np.log2(scale_factor))
    batch, height, width = 2, 16, 16

    key = jax.random.PRNGKey(0)
    key, kx = jax.random.split(key)
    x = jax.random.normal(kx, (batch, channels, height, width), jnp.float32)
    params = init_params(key, channels, num_blocks)

    ref = reference_forward(x, params)
    expected = (batch, channels // scale_factor,
                height * scale_factor, width * scale_factor)

    # f32, auto row tiling.
    out = jax.block_until_ready(jax.jit(upsample_forward)(x, params))
    assert out.shape == expected, (out.shape, expected)
    assert bool(jnp.all(jnp.isfinite(out)))
    _check(out, ref, atol=2e-2, rtol=2e-2, l2=5e-3)

    # f32, forced multi-row-tile path (exercises the halo machinery: 2 row
    # tiles in block 1, 4 row tiles in block 2).
    out_tiled = jax.block_until_ready(
        jax.jit(functools.partial(upsample_forward, tile_rows=8))(x, params))
    _check(out_tiled, ref, atol=2e-2, rtol=2e-2, l2=5e-3)

    # bf16 activations/weights with f32 MXU accumulation (halves HBM/VMEM).
    out_bf16 = jax.block_until_ready(
        jax.jit(functools.partial(upsample_forward,
                                  compute_dtype=jnp.bfloat16))(x, params))
    _check(out_bf16, ref, atol=1e-1, rtol=5e-2, l2=2.5e-2)

    print("KERNEL_OK")
</pallas_src>

<mosaic_0001>
module attributes {stable_mosaic.version = 11 : i64} {
  func.func @upsample_block_kernel(%arg0: i32, %arg1: i32, %arg2: memref<2xf32, #tpu.memory_space<smem>>, %arg3: memref<1x8x128xf32, #tpu.memory_space<vmem>>, %arg4: memref<1x8x256xf32, #tpu.memory_space<vmem>>, %arg5: memref<1x8x128xf32, #tpu.memory_space<vmem>>, %arg6: memref<8x8xf32, #tpu.memory_space<vmem>>, %arg7: memref<9x8x8xf32, #tpu.memory_space<vmem>>, %arg8: memref<4x8xf32, #tpu.memory_space<vmem>>, %arg9: memref<4x8xf32, #tpu.memory_space<vmem>>, %arg10: memref<1x16x256xf32, #tpu.memory_space<vmem>>) attributes {dimension_semantics = [#tpu.dimension_semantics<parallel>, #tpu.dimension_semantics<parallel>], iteration_bounds = array<i64: 2, 1>, scalar_prefetch = 0 : i64, scratch_operands = 0 : i64, tpu.core_type = #tpu.core_type<tc>, window_params = [{transform_indices = @transform_0, window_bounds = array<i64: 2>}, {transform_indices = @transform_1, window_bounds = array<i64: 1, 8, 128>}, {transform_indices = @transform_2, window_bounds = array<i64: 1, 8, 256>}, {transform_indices = @transform_3, window_bounds = array<i64: 1, 8, 128>}, {pipeline_mode = #tpu.pipeline_mode<synchronous>, transform_indices = @transform_4, window_bounds = array<i64: 8, 8>}, {pipeline_mode = #tpu.pipeline_mode<synchronous>, transform_indices = @transform_5, window_bounds = array<i64: 9, 8, 8>}, {pipeline_mode = #tpu.pipeline_mode<synchronous>, transform_indices = @transform_6, window_bounds = array<i64: 4, 8>}, {pipeline_mode = #tpu.pipeline_mode<synchronous>, transform_indices = @transform_7, window_bounds = array<i64: 4, 8>}, {transform_indices = @transform_8, window_bounds = array<i64: 1, 16, 256>}]} {
    %c16_i32 = arith.constant 16 : i32
    %0 = arith.muli %arg1, %c16_i32 : i32
    %c0 = arith.constant 0 : index
    %1 = memref.load %arg2[%c0] : memref<2xf32, #tpu.memory_space<smem>>
    %c1 = arith.constant 1 : index
    %2 = memref.load %arg2[%c1] : memref<2xf32, #tpu.memory_space<smem>>
    %c0_0 = arith.constant 0 : index
    %c0_1 = arith.constant 0 : index
    %c0_2 = arith.constant 0 : index
    %3 = vector.load %arg3[%c0_0, %c0_1, %c0_2] : memref<1x8x128xf32, #tpu.memory_space<vmem>>, vector<1x8x128xf32>
    %4 = vector.shape_cast %3 : vector<1x8x128xf32> to vector<8x128xf32>
    %c0_3 = arith.constant 0 : index
    %c0_4 = arith.constant 0 : index
    %c0_5 = arith.constant 0 : index
    %5 = vector.load %arg4[%c0_3, %c0_4, %c0_5] : memref<1x8x256xf32, #tpu.memory_space<vmem>>, vector<1x8x256xf32>
    %6 = vector.shape_cast %5 : vector<1x8x256xf32> to vector<8x256xf32>
    %c0_6 = arith.constant 0 : index
    %c0_7 = arith.constant 0 : index
    %c0_8 = arith.constant 0 : index
    %7 = vector.load %arg5[%c0_6, %c0_7, %c0_8] : memref<1x8x128xf32, #tpu.memory_space<vmem>>, vector<1x8x128xf32>
    %8 = vector.shape_cast %7 : vector<1x8x128xf32> to vector<8x128xf32>
    %9 = tpu.concatenate %4, %6, %8 in 1 : vector<8x128xf32>, vector<8x256xf32>, vector<8x128xf32> -> vector<8x512xf32>
    %10 = tpu.iota {dimensions = array<i32: 1>} : vector<1x512xi32>
    %c4_i32 = arith.constant 4 : i32
    %11 = vector.broadcast %c4_i32 : i32 to vector<1x512xi32>
    %12 = arith.shrsi %10, %11 : vector<1x512xi32>
    %c15_i32 = arith.constant 15 : i32
    %13 = vector.broadcast %c15_i32 : i32 to vector<1x512xi32>
    %14 = arith.andi %10, %13 : vector<1x512xi32>
    %c8_i32 = arith.constant 8 : i32
    %15 = arith.subi %0, %c8_i32 : i32
    %16 = vector.broadcast %15 : i32 to vector<1x512xi32>
    %17 = arith.addi %12, %16 : vector<1x512xi32>
    %c1_i32 = arith.constant 1 : i32
    %18 = vector.broadcast %c1_i32 : i32 to vector<1x512xi32>
    %19 = arith.cmpi sge, %17, %18 : vector<1x512xi32>
    %c14_i32 = arith.constant 14 : i32
    %20 = vector.broadcast %c14_i32 : i32 to vector<1x512xi32>
    %21 = arith.cmpi sle, %17, %20 : vector<1x512xi32>
    %c1_i32_9 = arith.constant 1 : i32
    %22 = vector.broadcast %c1_i32_9 : i32 to vector<1x512xi32>
    %23 = arith.cmpi sge, %14, %22 : vector<1x512xi32>
    %c14_i32_10 = arith.constant 14 : i32
    %24 = vector.broadcast %c14_i32_10 : i32 to vector<1x512xi32>
    %25 = arith.cmpi sle, %14, %24 : vector<1x512xi32>
    %26 = arith.andi %19, %23 : vector<1x512xi1>
    %27 = arith.andi %19, %25 : vector<1x512xi1>
    %28 = arith.andi %21, %23 : vector<1x512xi1>
    %29 = arith.andi %21, %25 : vector<1x512xi1>
    %c0_11 = arith.constant 0 : index
    %c0_12 = arith.constant 0 : index
    %30 = vector.load %arg6[%c0_11, %c0_12] : memref<8x8xf32, #tpu.memory_space<vmem>>, vector<8x8xf32>
    %cst = arith.constant dense<0.000000e+00> : vector<8x512xf32>
    %31 = tpu.matmul %30, %9, %cst {dimension_numbers = #tpu.dot_dimension_numbers<[1], [0], [0], [1], [0, 0, 1, 1], [], []>} : vector<8x8xf32>, vector<8x512xf32>, vector<8x512xf32> -> vector<8x512xf32>
    %cst_13 = arith.constant 0.000000e+00 : f32
    %32 = vector.broadcast %cst_13 : f32 to vector<8x512xf32>
    %33 = arith.cmpf oge, %31, %32 : vector<8x512xf32>
    %34 = vector.broadcast %1 : f32 to vector<8x512xf32>
    %35 = arith.mulf %34, %31 : vector<8x512xf32>
    %36 = arith.select %33, %31, %35 : vector<8x512xi1>, vector<8x512xf32>
    %c0_14 = arith.constant 0 : index
    %c0_15 = arith.constant 0 : index
    %c0_16 = arith.constant 0 : index
    %37 = vector.load %arg7[%c0_14, %c0_15, %c0_16] : memref<9x8x8xf32, #tpu.memory_space<vmem>>, vector<1x8x8xf32>
    %38 = vector.shape_cast %37 : vector<1x8x8xf32> to vector<8x8xf32>
    %c17_i32 = arith.constant 17 : i32
    %39 = tpu.dynamic_rotate %36 by %c17_i32 dim 1 : vector<8x512xf32>, i32 -> vector<8x512xf32>
    %cst_17 = arith.constant 0.000000e+00 : f32
    %40 = vector.shape_cast %26 : vector<1x512xi1> to vector<1x512xi1>
    %41 = vector.broadcast %40 : vector<1x512xi1> to vector<8x512xi1>
    %42 = vector.broadcast %cst_17 : f32 to vector<8x512xf32>
    %43 = arith.select %41, %39, %42 : vector<8x512xi1>, vector<8x512xf32>
    %cst_18 = arith.constant dense<0.000000e+00> : vector<8x512xf32>
    %44 = tpu.matmul %38, %43, %cst_18 {dimension_numbers = #tpu.dot_dimension_numbers<[1], [0], [0], [1], [0, 0, 1, 1], [], []>} : vector<8x8xf32>, vector<8x512xf32>, vector<8x512xf32> -> vector<8x512xf32>
    %c1_19 = arith.constant 1 : index
    %c0_20 = arith.constant 0 : index
    %c0_21 = arith.constant 0 : index
    %45 = vector.load %arg7[%c1_19, %c0_20, %c0_21] : memref<9x8x8xf32, #tpu.memory_space<vmem>>, vector<1x8x8xf32>
    %46 = vector.shape_cast %45 : vector<1x8x8xf32> to vector<8x8xf32>
    %c16_i32_22 = arith.constant 16 : i32
    %47 = tpu.dynamic_rotate %36 by %c16_i32_22 dim 1 : vector<8x512xf32>, i32 -> vector<8x512xf32>
    %cst_23 = arith.constant 0.000000e+00 : f32
    %48 = vector.shape_cast %19 : vector<1x512xi1> to vector<1x512xi1>
    %49 = vector.broadcast %48 : vector<1x512xi1> to vector<8x512xi1>
    %50 = vector.broadcast %cst_23 : f32 to vector<8x512xf32>
    %51 = arith.select %49, %47, %50 : vector<8x512xi1>, vector<8x512xf32>
    %cst_24 = arith.constant dense<0.000000e+00> : vector<8x512xf32>
    %52 = tpu.matmul %46, %51, %cst_24 {dimension_numbers = #tpu.dot_dimension_numbers<[1], [0], [0], [1], [0, 0, 1, 1], [], []>} : vector<8x8xf32>, vector<8x512xf32>, vector<8x512xf32> -> vector<8x512xf32>
    %53 = arith.addf %44, %52 : vector<8x512xf32>
    %c2 = arith.constant 2 : index
    %c0_25 = arith.constant 0 : index
    %c0_26 = arith.constant 0 : index
    %54 = vector.load %arg7[%c2, %c0_25, %c0_26] : memref<9x8x8xf32, #tpu.memory_space<vmem>>, vector<1x8x8xf32>
    %55 = vector.shape_cast %54 : vector<1x8x8xf32> to vector<8x8xf32>
    %c15_i32_27 = arith.constant 15 : i32
    %56 = tpu.dynamic_rotate %36 by %c15_i32_27 dim 1 : vector<8x512xf32>, i32 -> vector<8x512xf32>
    %cst_28 = arith.constant 0.000000e+00 : f32
    %57 = vector.shape_cast %27 : vector<1x512xi1> to vector<1x512xi1>
    %58 = vector.broadcast %57 : vector<1x512xi1> to vector<8x512xi1>
    %59 = vector.broadcast %cst_28 : f32 to vector<8x512xf32>
    %60 = arith.select %58, %56, %59 : vector<8x512xi1>, vector<8x512xf32>
    %cst_29 = arith.constant dense<0.000000e+00> : vector<8x512xf32>
    %61 = tpu.matmul %55, %60, %cst_29 {dimension_numbers = #tpu.dot_dimension_numbers<[1], [0], [0], [1], [0, 0, 1, 1], [], []>} : vector<8x8xf32>, vector<8x512xf32>, vector<8x512xf32> -> vector<8x512xf32>
    %62 = arith.addf %53, %61 : vector<8x512xf32>
    %c3 = arith.constant 3 : index
    %c0_30 = arith.constant 0 : index
    %c0_31 = arith.constant 0 : index
    %63 = vector.load %arg7[%c3, %c0_30, %c0_31] : memref<9x8x8xf32, #tpu.memory_space<vmem>>, vector<1x8x8xf32>
    %64 = vector.shape_cast %63 : vector<1x8x8xf32> to vector<8x8xf32>
    %c1_i32_32 = arith.constant 1 : i32
    %65 = tpu.dynamic_rotate %36 by %c1_i32_32 dim 1 : vector<8x512xf32>, i32 -> vector<8x512xf32>
    %cst_33 = arith.constant 0.000000e+00 : f32
    %66 = vector.shape_cast %23 : vector<1x512xi1> to vector<1x512xi1>
    %67 = vector.broadcast %66 : vector<1x512xi1> to vector<8x512xi1>
    %68 = vector.broadcast %cst_33 : f32 to vector<8x512xf32>
    %69 = arith.select %67, %65, %68 : vector<8x512xi1>, vector<8x512xf32>
    %cst_34 = arith.constant dense<0.000000e+00> : vector<8x512xf32>
    %70 = tpu.matmul %64, %69, %cst_34 {dimension_numbers = #tpu.dot_dimension_numbers<[1], [0], [0], [1], [0, 0, 1, 1], [], []>} : vector<8x8xf32>, vector<8x512xf32>, vector<8x512xf32> -> vector<8x512xf32>
    %71 = arith.addf %62, %70 : vector<8x512xf32>
    %c4 = arith.constant 4 : index
    %c0_35 = arith.constant 0 : index
    %c0_36 = arith.constant 0 : index
    %72 = vector.load %arg7[%c4, %c0_35, %c0_36] : memref<9x8x8xf32, #tpu.memory_space<vmem>>, vector<1x8x8xf32>
    %73 = vector.shape_cast %72 : vector<1x8x8xf32> to vector<8x8xf32>
    %cst_37 = arith.constant dense<0.000000e+00> : vector<8x512xf32>
    %74 = tpu.matmul %73, %36, %cst_37 {dimension_numbers = #tpu.dot_dimension_numbers<[1], [0], [0], [1], [0, 0, 1, 1], [], []>} : vector<8x8xf32>, vector<8x512xf32>, vector<8x512xf32> -> vector<8x512xf32>
    %75 = arith.addf %71, %74 : vector<8x512xf32>
    %c5 = arith.constant 5 : index
    %c0_38 = arith.constant 0 : index
    %c0_39 = arith.constant 0 : index
    %76 = vector.load %arg7[%c5, %c0_38, %c0_39] : memref<9x8x8xf32, #tpu.memory_space<vmem>>, vector<1x8x8xf32>
    %77 = vector.shape_cast %76 : vector<1x8x8xf32> to vector<8x8xf32>
    %c511_i32 = arith.constant 511 : i32
    %78 = tpu.dynamic_rotate %36 by %c511_i32 dim 1 : vector<8x512xf32>, i32 -> vector<8x512xf32>
    %cst_40 = arith.constant 0.000000e+00 : f32
    %79 = vector.shape_cast %25 : vector<1x512xi1> to vector<1x512xi1>
    %80 = vector.broadcast %79 : vector<1x512xi1> to vector<8x512xi1>
    %81 = vector.broadcast %cst_40 : f32 to vector<8x512xf32>
    %82 = arith.select %80, %78, %81 : vector<8x512xi1>, vector<8x512xf32>
    %cst_41 = arith.constant dense<0.000000e+00> : vector<8x512xf32>
    %83 = tpu.matmul %77, %82, %cst_41 {dimension_numbers = #tpu.dot_dimension_numbers<[1], [0], [0], [1], [0, 0, 1, 1], [], []>} : vector<8x8xf32>, vector<8x512xf32>, vector<8x512xf32> -> vector<8x512xf32>
    %84 = arith.addf %75, %83 : vector<8x512xf32>
    %c6 = arith.constant 6 : index
    %c0_42 = arith.constant 0 : index
    %c0_43 = arith.constant 0 : index
    %85 = vector.load %arg7[%c6, %c0_42, %c0_43] : memref<9x8x8xf32, #tpu.memory_space<vmem>>, vector<1x8x8xf32>
    %86 = vector.shape_cast %85 : vector<1x8x8xf32> to vector<8x8xf32>
    %c497_i32 = arith.constant 497 : i32
    %87 = tpu.dynamic_rotate %36 by %c497_i32 dim 1 : vector<8x512xf32>, i32 -> vector<8x512xf32>
    %cst_44 = arith.constant 0.000000e+00 : f32
    %88 = vector.shape_cast %28 : vector<1x512xi1> to vector<1x512xi1>
    %89 = vector.broadcast %88 : vector<1x512xi1> to vector<8x512xi1>
    %90 = vector.broadcast %cst_44 : f32 to vector<8x512xf32>
    %91 = arith.select %89, %87, %90 : vector<8x512xi1>, vector<8x512xf32>
    %cst_45 = arith.constant dense<0.000000e+00> : vector<8x512xf32>
    %92 = tpu.matmul %86, %91, %cst_45 {dimension_numbers = #tpu.dot_dimension_numbers<[1], [0], [0], [1], [0, 0, 1, 1], [], []>} : vector<8x8xf32>, vector<8x512xf32>, vector<8x512xf32> -> vector<8x512xf32>
    %93 = arith.addf %84, %92 : vector<8x512xf32>
    %c7 = arith.constant 7 : index
    %c0_46 = arith.constant 0 : index
    %c0_47 = arith.constant 0 : index
    %94 = vector.load %arg7[%c7, %c0_46, %c0_47] : memref<9x8x8xf32, #tpu.memory_space<vmem>>, vector<1x8x8xf32>
    %95 = vector.shape_cast %94 : vector<1x8x8xf32> to vector<8x8xf32>
    %c496_i32 = arith.constant 496 : i32
    %96 = tpu.dynamic_rotate %36 by %c496_i32 dim 1 : vector<8x512xf32>, i32 -> vector<8x512xf32>
    %cst_48 = arith.constant 0.000000e+00 : f32
    %97 = vector.shape_cast %21 : vector<1x512xi1> to vector<1x512xi1>
    %98 = vector.broadcast %97 : vector<1x512xi1> to vector<8x512xi1>
    %99 = vector.broadcast %cst_48 : f32 to vector<8x512xf32>
    %100 = arith.select %98, %96, %99 : vector<8x512xi1>, vector<8x512xf32>
    %cst_49 = arith.constant dense<0.000000e+00> : vector<8x512xf32>
    %101 = tpu.matmul %95, %100, %cst_49 {dimension_numbers = #tpu.dot_dimension_numbers<[1], [0], [0], [1], [0, 0, 1, 1], [], []>} : vector<8x8xf32>, vector<8x512xf32>, vector<8x512xf32> -> vector<8x512xf32>
    %102 = arith.addf %93, %101 : vector<8x512xf32>
    %c8 = arith.constant 8 : index
    %c0_50 = arith.constant 0 : index
    %c0_51 = arith.constant 0 : index
    %103 = vector.load %arg7[%c8, %c0_50, %c0_51] : memref<9x8x8xf32, #tpu.memory_space<vmem>>, vector<1x8x8xf32>
    %104 = vector.shape_cast %103 : vector<1x8x8xf32> to vector<8x8xf32>
    %c495_i32 = arith.constant 495 : i32
    %105 = tpu.dynamic_rotate %36 by %c495_i32 dim 1 : vector<8x512xf32>, i32 -> vector<8x512xf32>
    %cst_52 = arith.constant 0.000000e+00 : f32
    %106 = vector.shape_cast %29 : vector<1x512xi1> to vector<1x512xi1>
    %107 = vector.broadcast %106 : vector<1x512xi1> to vector<8x512xi1>
    %108 = vector.broadcast %cst_52 : f32 to vector<8x512xf32>
    %109 = arith.select %107, %105, %108 : vector<8x512xi1>, vector<8x512xf32>
    %cst_53 = arith.constant dense<0.000000e+00> : vector<8x512xf32>
    %110 = tpu.matmul %104, %109, %cst_53 {dimension_numbers = #tpu.dot_dimension_numbers<[1], [0], [0], [1], [0, 0, 1, 1], [], []>} : vector<8x8xf32>, vector<8x512xf32>, vector<8x512xf32> -> vector<8x512xf32>
    %111 = arith.addf %102, %110 : vector<8x512xf32>
    %cst_54 = arith.constant 0.000000e+00 : f32
    %112 = vector.broadcast %cst_54 : f32 to vector<8x512xf32>
    %113 = arith.cmpf oge, %111, %112 : vector<8x512xf32>
    %114 = vector.broadcast %2 : f32 to vector<8x512xf32>
    %115 = arith.mulf %114, %111 : vector<8x512xf32>
    %116 = arith.select %113, %111, %115 : vector<8x512xi1>, vector<8x512xf32>
    %c0_55 = arith.constant 0 : index
    %c0_56 = arith.constant 0 : index
    %117 = vector.load %arg8[%c0_55, %c0_56] : memref<4x8xf32, #tpu.memory_space<vmem>>, vector<4x8xf32>
    %cst_57 = arith.constant dense<0.000000e+00> : vector<4x512xf32>
    %118 = tpu.matmul %117, %116, %cst_57 {dimension_numbers = #tpu.dot_dimension_numbers<[1], [0], [0], [1], [0, 0, 1, 1], [], []>} : vector<4x8xf32>, vector<8x512xf32>, vector<4x512xf32> -> vector<4x512xf32>
    %c0_58 = arith.constant 0 : index
    %c0_59 = arith.constant 0 : index
    %119 = vector.load %arg9[%c0_58, %c0_59] : memref<4x8xf32, #tpu.memory_space<vmem>>, vector<4x8xf32>
    %cst_60 = arith.constant dense<0.000000e+00> : vector<4x512xf32>
    %120 = tpu.matmul %119, %9, %cst_60 {dimension_numbers = #tpu.dot_dimension_numbers<[1], [0], [0], [1], [0, 0, 1, 1], [], []>} : vector<4x8xf32>, vector<8x512xf32>, vector<4x512xf32> -> vector<4x512xf32>
    %121 = arith.addf %118, %120 : vector<4x512xf32>
    %cst_61 = arith.constant 7.500000e-01 : f32
    %122 = vector.broadcast %cst_61 : f32 to vector<4x512xf32>
    %123 = arith.mulf %122, %121 : vector<4x512xf32>
    %c1_i32_62 = arith.constant 1 : i32
    %124 = tpu.dynamic_rotate %121 by %c1_i32_62 dim 1 : vector<4x512xf32>, i32 -> vector<4x512xf32>
    %125 = vector.shape_cast %23 : vector<1x512xi1> to vector<1x512xi1>
    %126 = vector.broadcast %125 : vector<1x512xi1> to vector<4x512xi1>
    %127 = arith.select %126, %124, %121 : vector<4x512xi1>, vector<4x512xf32>
    %cst_63 = arith.constant 2.500000e-01 : f32
    %128 = vector.broadcast %cst_63 : f32 to vector<4x512xf32>
    %129 = arith.mulf %128, %127 : vector<4x512xf32>
    %130 = arith.addf %123, %129 : vector<4x512xf32>
    %cst_64 = arith.constant 7.500000e-01 : f32
    %131 = vector.broadcast %cst_64 : f32 to vector<4x512xf32>
    %132 = arith.mulf %131, %121 : vector<4x512xf32>
    %c511_i32_65 = arith.constant 511 : i32
    %133 = tpu.dynamic_rotate %121 by %c511_i32_65 dim 1 : vector<4x512xf32>, i32 -> vector<4x512xf32>
    %134 = vector.shape_cast %25 : vector<1x512xi1> to vector<1x512xi1>
    %135 = vector.broadcast %134 : vector<1x512xi1> to vector<4x512xi1>
    %136 = arith.select %135, %133, %121 : vector<4x512xi1>, vector<4x512xf32>
    %cst_66 = arith.constant 2.500000e-01 : f32
    %137 = vector.broadcast %cst_66 : f32 to vector<4x512xf32>
    %138 = arith.mulf %137, %136 : vector<4x512xf32>
    %139 = arith.addf %132, %138 : vector<4x512xf32>
    %cst_67 = arith.constant 7.500000e-01 : f32
    %140 = vector.broadcast %cst_67 : f32 to vector<4x512xf32>
    %141 = arith.mulf %140, %130 : vector<4x512xf32>
    %cst_68 = arith.constant 7.500000e-01 : f32
    %142 = vector.broadcast %cst_68 : f32 to vector<4x512xf32>
    %143 = arith.mulf %142, %139 : vector<4x512xf32>
    %c16_i32_69 = arith.constant 16 : i32
    %144 = tpu.dynamic_rotate %130 by %c16_i32_69 dim 1 : vector<4x512xf32>, i32 -> vector<4x512xf32>
    %145 = vector.shape_cast %19 : vector<1x512xi1> to vector<1x512xi1>
    %146 = vector.broadcast %145 : vector<1x512xi1> to vector<4x512xi1>
    %147 = arith.select %146, %144, %130 : vector<4x512xi1>, vector<4x512xf32>
    %cst_70 = arith.constant 2.500000e-01 : f32
    %148 = vector.broadcast %cst_70 : f32 to vector<4x512xf32>
    %149 = arith.mulf %148, %147 : vector<4x512xf32>
    %150 = arith.addf %141, %149 : vector<4x512xf32>
    %c16_i32_71 = arith.constant 16 : i32
    %151 = tpu.dynamic_rotate %139 by %c16_i32_71 dim 1 : vector<4x512xf32>, i32 -> vector<4x512xf32>
    %152 = vector.shape_cast %19 : vector<1x512xi1> to vector<1x512xi1>
    %153 = vector.broadcast %152 : vector<1x512xi1> to vector<4x512xi1>
    %154 = arith.select %153, %151, %139 : vector<4x512xi1>, vector<4x512xf32>
    %cst_72 = arith.constant 2.500000e-01 : f32
    %155 = vector.broadcast %cst_72 : f32 to vector<4x512xf32>
    %156 = arith.mulf %155, %154 : vector<4x512xf32>
    %157 = arith.addf %143, %156 : vector<4x512xf32>
    %c496_i32_73 = arith.constant 496 : i32
    %158 = tpu.dynamic_rotate %130 by %c496_i32_73 dim 1 : vector<4x512xf32>, i32 -> vector<4x512xf32>
    %159 = vector.shape_cast %21 : vector<1x512xi1> to vector<1x512xi1>
    %160 = vector.broadcast %159 : vector<1x512xi1> to vector<4x512xi1>
    %161 = arith.select %160, %158, %130 : vector<4x512xi1>, vector<4x512xf32>
    %cst_74 = arith.constant 2.500000e-01 : f32
    %162 = vector.broadcast %cst_74 : f32 to vector<4x512xf32>
    %163 = arith.mulf %162, %161 : vector<4x512xf32>
    %164 = arith.addf %141, %163 : vector<4x512xf32>
    %c496_i32_75 = arith.constant 496 : i32
    %165 = tpu.dynamic_rotate %139 by %c496_i32_75 dim 1 : vector<4x512xf32>, i32 -> vector<4x512xf32>
    %166 = vector.shape_cast %21 : vector<1x512xi1> to vector<1x512xi1>
    %167 = vector.broadcast %166 : vector<1x512xi1> to vector<4x512xi1>
    %168 = arith.select %167, %165, %139 : vector<4x512xi1>, vector<4x512xf32>
    %cst_76 = arith.constant 2.500000e-01 : f32
    %169 = vector.broadcast %cst_76 : f32 to vector<4x512xf32>
    %170 = arith.mulf %169, %168 : vector<4x512xf32>
    %171 = arith.addf %143, %170 : vector<4x512xf32>
    %172 = vector.extract_strided_slice %150 {offsets = [0, 128], sizes = [4, 256], strides = [1, 1]} : vector<4x512xf32> to vector<4x256xf32>
    %c0_77 = arith.constant 0 : index
    %c0_78 = arith.constant 0 : index
    %c0_79 = arith.constant 0 : index
    %173 = vector.load %arg10[%c0_77, %c0_78, %c0_79] : memref<1x16x256xf32, #tpu.memory_space<vmem>>, vector<1x4x256xf32>
    %174 = vector.shape_cast %173 : vector<1x4x256xf32> to vector<4x256xf32>
    %175 = vector.shape_cast %172 : vector<4x256xf32> to vector<1x4x256xf32>
    tpu.vector_store %arg10[%c0_77, %c0_78, %c0_79], %175 {strides = array<i32>} : memref<1x16x256xf32, #tpu.memory_space<vmem>>, vector<1x4x256xf32>,
    %176 = vector.extract_strided_slice %157 {offsets = [0, 128], sizes = [4, 256], strides = [1, 1]} : vector<4x512xf32> to vector<4x256xf32>
    %c0_80 = arith.constant 0 : index
    %c4_81 = arith.constant 4 : index
    %c0_82 = arith.constant 0 : index
    %177 = vector.load %arg10[%c0_80, %c4_81, %c0_82] : memref<1x16x256xf32, #tpu.memory_space<vmem>>, vector<1x4x256xf32>
    %178 = vector.shape_cast %177 : vector<1x4x256xf32> to vector<4x256xf32>
    %179 = vector.shape_cast %176 : vector<4x256xf32> to vector<1x4x256xf32>
    tpu.vector_store %arg10[%c0_80, %c4_81, %c0_82], %179 {strides = array<i32>} : memref<1x16x256xf32, #tpu.memory_space<vmem>>, vector<1x4x256xf32>,
    %180 = vector.extract_strided_slice %164 {offsets = [0, 128], sizes = [4, 256], strides = [1, 1]} : vector<4x512xf32> to vector<4x256xf32>
    %c0_83 = arith.constant 0 : index
    %c8_84 = arith.constant 8 : index
    %c0_85 = arith.constant 0 : index
    %181 = vector.load %arg10[%c0_83, %c8_84, %c0_85] : memref<1x16x256xf32, #tpu.memory_space<vmem>>, vector<1x4x256xf32>
    %182 = vector.shape_cast %181 : vector<1x4x256xf32> to vector<4x256xf32>
    %183 = vector.shape_cast %180 : vector<4x256xf32> to vector<1x4x256xf32>
    tpu.vector_store %arg10[%c0_83, %c8_84, %c0_85], %183 {strides = array<i32>} : memref<1x16x256xf32, #tpu.memory_space<vmem>>, vector<1x4x256xf32>,
    %184 = vector.extract_strided_slice %171 {offsets = [0, 128], sizes = [4, 256], strides = [1, 1]} : vector<4x512xf32> to vector<4x256xf32>
    %c0_86 = arith.constant 0 : index
    %c12 = arith.constant 12 : index
    %c0_87 = arith.constant 0 : index
    %185 = vector.load %arg10[%c0_86, %c12, %c0_87] : memref<1x16x256xf32, #tpu.memory_space<vmem>>, vector<1x4x256xf32>
    %186 = vector.shape_cast %185 : vector<1x4x256xf32> to vector<4x256xf32>
    %187 = vector.shape_cast %184 : vector<4x256xf32> to vector<1x4x256xf32>
    tpu.vector_store %arg10[%c0_86, %c12, %c0_87], %187 {strides = array<i32>} : memref<1x16x256xf32, #tpu.memory_space<vmem>>, vector<1x4x256xf32>,
    return
  }
  func.func @transform_0(%arg0: i32, %arg1: i32) -> i32 {
    %c0_i32 = arith.constant 0 : i32
    %c0_i32_0 = arith.constant 0 : i32
    return %c0_i32 : i32
  }
  func.func @transform_1(%arg0: i32, %arg1: i32) -> (i32, i32, i32) {
    %c2_i32 = arith.constant 2 : i32
    %0 = arith.muli %arg1, %c2_i32 : i32
    %c1_i32 = arith.constant 1 : i32
    %1 = arith.subi %0, %c1_i32 : i32
    %c0_i32 = arith.constant 0 : i32
    %2 = arith.maxsi %1, %c0_i32 : i32
    %c0_i32_0 = arith.constant 0 : i32
    %c0_i32_1 = arith.constant 0 : i32
    return %arg0, %c0_i32_0, %2 : i32, i32, i32
  }
  func.func @transform_2(%arg0: i32, %arg1: i32) -> (i32, i32, i32) {
    %c0_i32 = arith.constant 0 : i32
    %c0_i32_0 = arith.constant 0 : i32
    return %arg0, %c0_i32, %arg1 : i32, i32, i32
  }
  func.func @transform_3(%arg0: i32, %arg1: i32) -> (i32, i32, i32) {
    %c1_i32 = arith.constant 1 : i32
    %0 = arith.addi %arg1, %c1_i32 : i32
    %c2_i32 = arith.constant 2 : i32
    %1 = arith.muli %0, %c2_i32 : i32
    %c1_i32_0 = arith.constant 1 : i32
    %2 = arith.minsi %1, %c1_i32_0 : i32
    %c0_i32 = arith.constant 0 : i32
    %c0_i32_1 = arith.constant 0 : i32
    return %arg0, %c0_i32, %2 : i32, i32, i32
  }
  func.func @transform_4(%arg0: i32, %arg1: i32) -> (i32, i32) {
    %c0_i32 = arith.constant 0 : i32
    %c0_i32_0 = arith.constant 0 : i32
    %c0_i32_1 = arith.constant 0 : i32
    return %c0_i32, %c0_i32_0 : i32, i32
  }
  func.func @transform_5(%arg0: i32, %arg1: i32) -> (i32, i32, i32) {
    %c0_i32 = arith.constant 0 : i32
    %c0_i32_0 = arith.constant 0 : i32
    %c0_i32_1 = arith.constant 0 : i32
    %c0_i32_2 = arith.constant 0 : i32
    return %c0_i32, %c0_i32_0, %c0_i32_1 : i32, i32, i32
  }
  func.func @transform_6(%arg0: i32, %arg1: i32) -> (i32, i32) {
    %c0_i32 = arith.constant 0 : i32
    %c0_i32_0 = arith.constant 0 : i32
    %c0_i32_1 = arith.constant 0 : i32
    return %c0_i32, %c0_i32_0 : i32, i32
  }
  func.func @transform_7(%arg0: i32, %arg1: i32) -> (i32, i32) {
    %c0_i32 = arith.constant 0 : i32
    %c0_i32_0 = arith.constant 0 : i32
    %c0_i32_1 = arith.constant 0 : i32
    return %c0_i32, %c0_i32_0 : i32, i32
  }
  func.func @transform_8(%arg0: i32, %arg1: i32) -> (i32, i32, i32) {
    %c0_i32 = arith.constant 0 : i32
    %c0_i32_0 = arith.constant 0 : i32
    return %arg0, %c0_i32, %arg1 : i32, i32, i32
  }
}

module attributes {stable_mosaic.version = 11 : i64} {
  func.func @upsample_block_kernel(%arg0: i32, %arg1: i32, %arg2: memref<2xf32, #tpu.memory_space<smem>>, %arg3: memref<1x4x128xf32, #tpu.memory_space<vmem>>, %arg4: memref<1x4x1024xf32, #tpu.memory_space<vmem>>, %arg5: memref<1x4x128xf32, #tpu.memory_space<vmem>>, %arg6: memref<4x4xf32, #tpu.memory_space<vmem>>, %arg7: memref<9x4x4xf32, #tpu.memory_space<vmem>>, %arg8: memref<2x4xf32, #tpu.memory_space<vmem>>, %arg9: memref<2x4xf32, #tpu.memory_space<vmem>>, %arg10: memref<1x8x1024xf32, #tpu.memory_space<vmem>>) attributes {dimension_semantics = [#tpu.dimension_semantics<parallel>, #tpu.dimension_semantics<parallel>], iteration_bounds = array<i64: 2, 1>, scalar_prefetch = 0 : i64, scratch_operands = 0 : i64, tpu.core_type = #tpu.core_type<tc>, window_params = [{transform_indices = @transform_0, window_bounds = array<i64: 2>}, {transform_indices = @transform_1, window_bounds = array<i64: 1, 4, 128>}, {transform_indices = @transform_2, window_bounds = array<i64: 1, 4, 1024>}, {transform_indices = @transform_3, window_bounds = array<i64: 1, 4, 128>}, {pipeline_mode = #tpu.pipeline_mode<synchronous>, transform_indices = @transform_4, window_bounds = array<i64: 4, 4>}, {pipeline_mode = #tpu.pipeline_mode<synchronous>, transform_indices = @transform_5, window_bounds = array<i64: 9, 4, 4>}, {pipeline_mode = #tpu.pipeline_mode<synchronous>, transform_indices = @transform_6, window_bounds = array<i64: 2, 4>}, {pipeline_mode = #tpu.pipeline_mode<synchronous>, transform_indices = @transform_7, window_bounds = array<i64: 2, 4>}, {transform_indices = @transform_8, window_bounds = array<i64: 1, 8, 1024>}]} {
    %c32_i32 = arith.constant 32 : i32
    %0 = arith.muli %arg1, %c32_i32 : i32
    %c0 = arith.constant 0 : index
    %1 = memref.load %arg2[%c0] : memref<2xf32, #tpu.memory_space<smem>>
    %c1 = arith.constant 1 : index
    %2 = memref.load %arg2[%c1] : memref<2xf32, #tpu.memory_space<smem>>
    %c0_0 = arith.constant 0 : index
    %c0_1 = arith.constant 0 : index
    %c0_2 = arith.constant 0 : index
    %3 = vector.load %arg3[%c0_0, %c0_1, %c0_2] : memref<1x4x128xf32, #tpu.memory_space<vmem>>, vector<1x4x128xf32>
    %4 = vector.shape_cast %3 : vector<1x4x128xf32> to vector<4x128xf32>
    %c0_3 = arith.constant 0 : index
    %c0_4 = arith.constant 0 : index
    %c0_5 = arith.constant 0 : index
    %5 = vector.load %arg4[%c0_3, %c0_4, %c0_5] : memref<1x4x1024xf32, #tpu.memory_space<vmem>>, vector<1x4x1024xf32>
    %6 = vector.shape_cast %5 : vector<1x4x1024xf32> to vector<4x1024xf32>
    %c0_6 = arith.constant 0 : index
    %c0_7 = arith.constant 0 : index
    %c0_8 = arith.constant 0 : index
    %7 = vector.load %arg5[%c0_6, %c0_7, %c0_8] : memref<1x4x128xf32, #tpu.memory_space<vmem>>, vector<1x4x128xf32>
    %8 = vector.shape_cast %7 : vector<1x4x128xf32> to vector<4x128xf32>
    %9 = tpu.concatenate %4, %6, %8 in 1 : vector<4x128xf32>, vector<4x1024xf32>, vector<4x128xf32> -> vector<4x1280xf32>
    %10 = tpu.iota {dimensions = array<i32: 1>} : vector<1x1280xi32>
    %c5_i32 = arith.constant 5 : i32
    %11 = vector.broadcast %c5_i32 : i32 to vector<1x1280xi32>
    %12 = arith.shrsi %10, %11 : vector<1x1280xi32>
    %c31_i32 = arith.constant 31 : i32
    %13 = vector.broadcast %c31_i32 : i32 to vector<1x1280xi32>
    %14 = arith.andi %10, %13 : vector<1x1280xi32>
    %c4_i32 = arith.constant 4 : i32
    %15 = arith.subi %0, %c4_i32 : i32
    %16 = vector.broadcast %15 : i32 to vector<1x1280xi32>
    %17 = arith.addi %12, %16 : vector<1x1280xi32>
    %c1_i32 = arith.constant 1 : i32
    %18 = vector.broadcast %c1_i32 : i32 to vector<1x1280xi32>
    %19 = arith.cmpi sge, %17, %18 : vector<1x1280xi32>
    %c30_i32 = arith.constant 30 : i32
    %20 = vector.broadcast %c30_i32 : i32 to vector<1x1280xi32>
    %21 = arith.cmpi sle, %17, %20 : vector<1x1280xi32>
    %c1_i32_9 = arith.constant 1 : i32
    %22 = vector.broadcast %c1_i32_9 : i32 to vector<1x1280xi32>
    %23 = arith.cmpi sge, %14, %22 : vector<1x1280xi32>
    %c30_i32_10 = arith.constant 30 : i32
    %24 = vector.broadcast %c30_i32_10 : i32 to vector<1x1280xi32>
    %25 = arith.cmpi sle, %14, %24 : vector<1x1280xi32>
    %26 = arith.andi %19, %23 : vector<1x1280xi1>
    %27 = arith.andi %19, %25 : vector<1x1280xi1>
    %28 = arith.andi %21, %23 : vector<1x1280xi1>
    %29 = arith.andi %21, %25 : vector<1x1280xi1>
    %c0_11 = arith.constant 0 : index
    %c0_12 = arith.constant 0 : index
    %30 = vector.load %arg6[%c0_11, %c0_12] : memref<4x4xf32, #tpu.memory_space<vmem>>, vector<4x4xf32>
    %cst = arith.constant dense<0.000000e+00> : vector<4x1280xf32>
    %31 = tpu.matmul %30, %9, %cst {dimension_numbers = #tpu.dot_dimension_numbers<[1], [0], [0], [1], [0, 0, 1, 1], [], []>} : vector<4x4xf32>, vector<4x1280xf32>, vector<4x1280xf32> -> vector<4x1280xf32>
    %cst_13 = arith.constant 0.000000e+00 : f32
    %32 = vector.broadcast %cst_13 : f32 to vector<4x1280xf32>
    %33 = arith.cmpf oge, %31, %32 : vector<4x1280xf32>
    %34 = vector.broadcast %1 : f32 to vector<4x1280xf32>
    %35 = arith.mulf %34, %31 : vector<4x1280xf32>
    %36 = arith.select %33, %31, %35 : vector<4x1280xi1>, vector<4x1280xf32>
    %c0_14 = arith.constant 0 : index
    %c0_15 = arith.constant 0 : index
    %c0_16 = arith.constant 0 : index
    %37 = vector.load %arg7[%c0_14, %c0_15, %c0_16] : memref<9x4x4xf32, #tpu.memory_space<vmem>>, vector<1x4x4xf32>
    %38 = vector.shape_cast %37 : vector<1x4x4xf32> to vector<4x4xf32>
    %c33_i32 = arith.constant 33 : i32
    %39 = tpu.dynamic_rotate %36 by %c33_i32 dim 1 : vector<4x1280xf32>, i32 -> vector<4x1280xf32>
    %cst_17 = arith.constant 0.000000e+00 : f32
    %40 = vector.shape_cast %26 : vector<1x1280xi1> to vector<1x1280xi1>
    %41 = vector.broadcast %40 : vector<1x1280xi1> to vector<4x1280xi1>
    %42 = vector.broadcast %cst_17 : f32 to vector<4x1280xf32>
    %43 = arith.select %41, %39, %42 : vector<4x1280xi1>, vector<4x1280xf32>
    %cst_18 = arith.constant dense<0.000000e+00> : vector<4x1280xf32>
    %44 = tpu.matmul %38, %43, %cst_18 {dimension_numbers = #tpu.dot_dimension_numbers<[1], [0], [0], [1], [0, 0, 1, 1], [], []>} : vector<4x4xf32>, vector<4x1280xf32>, vector<4x1280xf32> -> vector<4x1280xf32>
    %c1_19 = arith.constant 1 : index
    %c0_20 = arith.constant 0 : index
    %c0_21 = arith.constant 0 : index
    %45 = vector.load %arg7[%c1_19, %c0_20, %c0_21] : memref<9x4x4xf32, #tpu.memory_space<vmem>>, vector<1x4x4xf32>
    %46 = vector.shape_cast %45 : vector<1x4x4xf32> to vector<4x4xf32>
    %c32_i32_22 = arith.constant 32 : i32
    %47 = tpu.dynamic_rotate %36 by %c32_i32_22 dim 1 : vector<4x1280xf32>, i32 -> vector<4x1280xf32>
    %cst_23 = arith.constant 0.000000e+00 : f32
    %48 = vector.shape_cast %19 : vector<1x1280xi1> to vector<1x1280xi1>
    %49 = vector.broadcast %48 : vector<1x1280xi1> to vector<4x1280xi1>
    %50 = vector.broadcast %cst_23 : f32 to vector<4x1280xf32>
    %51 = arith.select %49, %47, %50 : vector<4x1280xi1>, vector<4x1280xf32>
    %cst_24 = arith.constant dense<0.000000e+00> : vector<4x1280xf32>
    %52 = tpu.matmul %46, %51, %cst_24 {dimension_numbers = #tpu.dot_dimension_numbers<[1], [0], [0], [1], [0, 0, 1, 1], [], []>} : vector<4x4xf32>, vector<4x1280xf32>, vector<4x1280xf32> -> vector<4x1280xf32>
    %53 = arith.addf %44, %52 : vector<4x1280xf32>
    %c2 = arith.constant 2 : index
    %c0_25 = arith.constant 0 : index
    %c0_26 = arith.constant 0 : index
    %54 = vector.load %arg7[%c2, %c0_25, %c0_26] : memref<9x4x4xf32, #tpu.memory_space<vmem>>, vector<1x4x4xf32>
    %55 = vector.shape_cast %54 : vector<1x4x4xf32> to vector<4x4xf32>
    %c31_i32_27 = arith.constant 31 : i32
    %56 = tpu.dynamic_rotate %36 by %c31_i32_27 dim 1 : vector<4x1280xf32>, i32 -> vector<4x1280xf32>
    %cst_28 = arith.constant 0.000000e+00 : f32
    %57 = vector.shape_cast %27 : vector<1x1280xi1> to vector<1x1280xi1>
    %58 = vector.broadcast %57 : vector<1x1280xi1> to vector<4x1280xi1>
    %59 = vector.broadcast %cst_28 : f32 to vector<4x1280xf32>
    %60 = arith.select %58, %56, %59 : vector<4x1280xi1>, vector<4x1280xf32>
    %cst_29 = arith.constant dense<0.000000e+00> : vector<4x1280xf32>
    %61 = tpu.matmul %55, %60, %cst_29 {dimension_numbers = #tpu.dot_dimension_numbers<[1], [0], [0], [1], [0, 0, 1, 1], [], []>} : vector<4x4xf32>, vector<4x1280xf32>, vector<4x1280xf32> -> vector<4x1280xf32>
    %62 = arith.addf %53, %61 : vector<4x1280xf32>
    %c3 = arith.constant 3 : index
    %c0_30 = arith.constant 0 : index
    %c0_31 = arith.constant 0 : index
    %63 = vector.load %arg7[%c3, %c0_30, %c0_31] : memref<9x4x4xf32, #tpu.memory_space<vmem>>, vector<1x4x4xf32>
    %64 = vector.shape_cast %63 : vector<1x4x4xf32> to vector<4x4xf32>
    %c1_i32_32 = arith.constant 1 : i32
    %65 = tpu.dynamic_rotate %36 by %c1_i32_32 dim 1 : vector<4x1280xf32>, i32 -> vector<4x1280xf32>
    %cst_33 = arith.constant 0.000000e+00 : f32
    %66 = vector.shape_cast %23 : vector<1x1280xi1> to vector<1x1280xi1>
    %67 = vector.broadcast %66 : vector<1x1280xi1> to vector<4x1280xi1>
    %68 = vector.broadcast %cst_33 : f32 to vector<4x1280xf32>
    %69 = arith.select %67, %65, %68 : vector<4x1280xi1>, vector<4x1280xf32>
    %cst_34 = arith.constant dense<0.000000e+00> : vector<4x1280xf32>
    %70 = tpu.matmul %64, %69, %cst_34 {dimension_numbers = #tpu.dot_dimension_numbers<[1], [0], [0], [1], [0, 0, 1, 1], [], []>} : vector<4x4xf32>, vector<4x1280xf32>, vector<4x1280xf32> -> vector<4x1280xf32>
    %71 = arith.addf %62, %70 : vector<4x1280xf32>
    %c4 = arith.constant 4 : index
    %c0_35 = arith.constant 0 : index
    %c0_36 = arith.constant 0 : index
    %72 = vector.load %arg7[%c4, %c0_35, %c0_36] : memref<9x4x4xf32, #tpu.memory_space<vmem>>, vector<1x4x4xf32>
    %73 = vector.shape_cast %72 : vector<1x4x4xf32> to vector<4x4xf32>
    %cst_37 = arith.constant dense<0.000000e+00> : vector<4x1280xf32>
    %74 = tpu.matmul %73, %36, %cst_37 {dimension_numbers = #tpu.dot_dimension_numbers<[1], [0], [0], [1], [0, 0, 1, 1], [], []>} : vector<4x4xf32>, vector<4x1280xf32>, vector<4x1280xf32> -> vector<4x1280xf32>
    %75 = arith.addf %71, %74 : vector<4x1280xf32>
    %c5 = arith.constant 5 : index
    %c0_38 = arith.constant 0 : index
    %c0_39 = arith.constant 0 : index
    %76 = vector.load %arg7[%c5, %c0_38, %c0_39] : memref<9x4x4xf32, #tpu.memory_space<vmem>>, vector<1x4x4xf32>
    %77 = vector.shape_cast %76 : vector<1x4x4xf32> to vector<4x4xf32>
    %c1279_i32 = arith.constant 1279 : i32
    %78 = tpu.dynamic_rotate %36 by %c1279_i32 dim 1 : vector<4x1280xf32>, i32 -> vector<4x1280xf32>
    %cst_40 = arith.constant 0.000000e+00 : f32
    %79 = vector.shape_cast %25 : vector<1x1280xi1> to vector<1x1280xi1>
    %80 = vector.broadcast %79 : vector<1x1280xi1> to vector<4x1280xi1>
    %81 = vector.broadcast %cst_40 : f32 to vector<4x1280xf32>
    %82 = arith.select %80, %78, %81 : vector<4x1280xi1>, vector<4x1280xf32>
    %cst_41 = arith.constant dense<0.000000e+00> : vector<4x1280xf32>
    %83 = tpu.matmul %77, %82, %cst_41 {dimension_numbers = #tpu.dot_dimension_numbers<[1], [0], [0], [1], [0, 0, 1, 1], [], []>} : vector<4x4xf32>, vector<4x1280xf32>, vector<4x1280xf32> -> vector<4x1280xf32>
    %84 = arith.addf %75, %83 : vector<4x1280xf32>
    %c6 = arith.constant 6 : index
    %c0_42 = arith.constant 0 : index
    %c0_43 = arith.constant 0 : index
    %85 = vector.load %arg7[%c6, %c0_42, %c0_43] : memref<9x4x4xf32, #tpu.memory_space<vmem>>, vector<1x4x4xf32>
    %86 = vector.shape_cast %85 : vector<1x4x4xf32> to vector<4x4xf32>
    %c1249_i32 = arith.constant 1249 : i32
    %87 = tpu.dynamic_rotate %36 by %c1249_i32 dim 1 : vector<4x1280xf32>, i32 -> vector<4x1280xf32>
    %cst_44 = arith.constant 0.000000e+00 : f32
    %88 = vector.shape_cast %28 : vector<1x1280xi1> to vector<1x1280xi1>
    %89 = vector.broadcast %88 : vector<1x1280xi1> to vector<4x1280xi1>
    %90 = vector.broadcast %cst_44 : f32 to vector<4x1280xf32>
    %91 = arith.select %89, %87, %90 : vector<4x1280xi1>, vector<4x1280xf32>
    %cst_45 = arith.constant dense<0.000000e+00> : vector<4x1280xf32>
    %92 = tpu.matmul %86, %91, %cst_45 {dimension_numbers = #tpu.dot_dimension_numbers<[1], [0], [0], [1], [0, 0, 1, 1], [], []>} : vector<4x4xf32>, vector<4x1280xf32>, vector<4x1280xf32> -> vector<4x1280xf32>
    %93 = arith.addf %84, %92 : vector<4x1280xf32>
    %c7 = arith.constant 7 : index
    %c0_46 = arith.constant 0 : index
    %c0_47 = arith.constant 0 : index
    %94 = vector.load %arg7[%c7, %c0_46, %c0_47] : memref<9x4x4xf32, #tpu.memory_space<vmem>>, vector<1x4x4xf32>
    %95 = vector.shape_cast %94 : vector<1x4x4xf32> to vector<4x4xf32>
    %c1248_i32 = arith.constant 1248 : i32
    %96 = tpu.dynamic_rotate %36 by %c1248_i32 dim 1 : vector<4x1280xf32>, i32 -> vector<4x1280xf32>
    %cst_48 = arith.constant 0.000000e+00 : f32
    %97 = vector.shape_cast %21 : vector<1x1280xi1> to vector<1x1280xi1>
    %98 = vector.broadcast %97 : vector<1x1280xi1> to vector<4x1280xi1>
    %99 = vector.broadcast %cst_48 : f32 to vector<4x1280xf32>
    %100 = arith.select %98, %96, %99 : vector<4x1280xi1>, vector<4x1280xf32>
    %cst_49 = arith.constant dense<0.000000e+00> : vector<4x1280xf32>
    %101 = tpu.matmul %95, %100, %cst_49 {dimension_numbers = #tpu.dot_dimension_numbers<[1], [0], [0], [1], [0, 0, 1, 1], [], []>} : vector<4x4xf32>, vector<4x1280xf32>, vector<4x1280xf32> -> vector<4x1280xf32>
    %102 = arith.addf %93, %101 : vector<4x1280xf32>
    %c8 = arith.constant 8 : index
    %c0_50 = arith.constant 0 : index
    %c0_51 = arith.constant 0 : index
    %103 = vector.load %arg7[%c8, %c0_50, %c0_51] : memref<9x4x4xf32, #tpu.memory_space<vmem>>, vector<1x4x4xf32>
    %104 = vector.shape_cast %103 : vector<1x4x4xf32> to vector<4x4xf32>
    %c1247_i32 = arith.constant 1247 : i32
    %105 = tpu.dynamic_rotate %36 by %c1247_i32 dim 1 : vector<4x1280xf32>, i32 -> vector<4x1280xf32>
    %cst_52 = arith.constant 0.000000e+00 : f32
    %106 = vector.shape_cast %29 : vector<1x1280xi1> to vector<1x1280xi1>
    %107 = vector.broadcast %106 : vector<1x1280xi1> to vector<4x1280xi1>
    %108 = vector.broadcast %cst_52 : f32 to vector<4x1280xf32>
    %109 = arith.select %107, %105, %108 : vector<4x1280xi1>, vector<4x1280xf32>
    %cst_53 = arith.constant dense<0.000000e+00> : vector<4x1280xf32>
    %110 = tpu.matmul %104, %109, %cst_53 {dimension_numbers = #tpu.dot_dimension_numbers<[1], [0], [0], [1], [0, 0, 1, 1], [], []>} : vector<4x4xf32>, vector<4x1280xf32>, vector<4x1280xf32> -> vector<4x1280xf32>
    %111 = arith.addf %102, %110 : vector<4x1280xf32>
    %cst_54 = arith.constant 0.000000e+00 : f32
    %112 = vector.broadcast %cst_54 : f32 to vector<4x1280xf32>
    %113 = arith.cmpf oge, %111, %112 : vector<4x1280xf32>
    %114 = vector.broadcast %2 : f32 to vector<4x1280xf32>
    %115 = arith.mulf %114, %111 : vector<4x1280xf32>
    %116 = arith.select %113, %111, %115 : vector<4x1280xi1>, vector<4x1280xf32>
    %c0_55 = arith.constant 0 : index
    %c0_56 = arith.constant 0 : index
    %117 = vector.load %arg8[%c0_55, %c0_56] : memref<2x4xf32, #tpu.memory_space<vmem>>, vector<2x4xf32>
    %cst_57 = arith.constant dense<0.000000e+00> : vector<2x1280xf32>
    %118 = tpu.matmul %117, %116, %cst_57 {dimension_numbers = #tpu.dot_dimension_numbers<[1], [0], [0], [1], [0, 0, 1, 1], [], []>} : vector<2x4xf32>, vector<4x1280xf32>, vector<2x1280xf32> -> vector<2x1280xf32>
    %c0_58 = arith.constant 0 : index
    %c0_59 = arith.constant 0 : index
    %119 = vector.load %arg9[%c0_58, %c0_59] : memref<2x4xf32, #tpu.memory_space<vmem>>, vector<2x4xf32>
    %cst_60 = arith.constant dense<0.000000e+00> : vector<2x1280xf32>
    %120 = tpu.matmul %119, %9, %cst_60 {dimension_numbers = #tpu.dot_dimension_numbers<[1], [0], [0], [1], [0, 0, 1, 1], [], []>} : vector<2x4xf32>, vector<4x1280xf32>, vector<2x1280xf32> -> vector<2x1280xf32>
    %121 = arith.addf %118, %120 : vector<2x1280xf32>
    %cst_61 = arith.constant 7.500000e-01 : f32
    %122 = vector.broadcast %cst_61 : f32 to vector<2x1280xf32>
    %123 = arith.mulf %122, %121 : vector<2x1280xf32>
    %c1_i32_62 = arith.constant 1 : i32
    %124 = tpu.dynamic_rotate %121 by %c1_i32_62 dim 1 : vector<2x1280xf32>, i32 -> vector<2x1280xf32>
    %125 = vector.shape_cast %23 : vector<1x1280xi1> to vector<1x1280xi1>
    %126 = vector.broadcast %125 : vector<1x1280xi1> to vector<2x1280xi1>
    %127 = arith.select %126, %124, %121 : vector<2x1280xi1>, vector<2x1280xf32>
    %cst_63 = arith.constant 2.500000e-01 : f32
    %128 = vector.broadcast %cst_63 : f32 to vector<2x1280xf32>
    %129 = arith.mulf %128, %127 : vector<2x1280xf32>
    %130 = arith.addf %123, %129 : vector<2x1280xf32>
    %cst_64 = arith.constant 7.500000e-01 : f32
    %131 = vector.broadcast %cst_64 : f32 to vector<2x1280xf32>
    %132 = arith.mulf %131, %121 : vector<2x1280xf32>
    %c1279_i32_65 = arith.constant 1279 : i32
    %133 = tpu.dynamic_rotate %121 by %c1279_i32_65 dim 1 : vector<2x1280xf32>, i32 -> vector<2x1280xf32>
    %134 = vector.shape_cast %25 : vector<1x1280xi1> to vector<1x1280xi1>
    %135 = vector.broadcast %134 : vector<1x1280xi1> to vector<2x1280xi1>
    %136 = arith.select %135, %133, %121 : vector<2x1280xi1>, vector<2x1280xf32>
    %cst_66 = arith.constant 2.500000e-01 : f32
    %137 = vector.broadcast %cst_66 : f32 to vector<2x1280xf32>
    %138 = arith.mulf %137, %136 : vector<2x1280xf32>
    %139 = arith.addf %132, %138 : vector<2x1280xf32>
    %cst_67 = arith.constant 7.500000e-01 : f32
    %140 = vector.broadcast %cst_67 : f32 to vector<2x1280xf32>
    %141 = arith.mulf %140, %130 : vector<2x1280xf32>
    %cst_68 = arith.constant 7.500000e-01 : f32
    %142 = vector.broadcast %cst_68 : f32 to vector<2x1280xf32>
    %143 = arith.mulf %142, %139 : vector<2x1280xf32>
    %c32_i32_69 = arith.constant 32 : i32
    %144 = tpu.dynamic_rotate %130 by %c32_i32_69 dim 1 : vector<2x1280xf32>, i32 -> vector<2x1280xf32>
    %145 = vector.shape_cast %19 : vector<1x1280xi1> to vector<1x1280xi1>
    %146 = vector.broadcast %145 : vector<1x1280xi1> to vector<2x1280xi1>
    %147 = arith.select %146, %144, %130 : vector<2x1280xi1>, vector<2x1280xf32>
    %cst_70 = arith.constant 2.500000e-01 : f32
    %148 = vector.broadcast %cst_70 : f32 to vector<2x1280xf32>
    %149 = arith.mulf %148, %147 : vector<2x1280xf32>
    %150 = arith.addf %141, %149 : vector<2x1280xf32>
    %c32_i32_71 = arith.constant 32 : i32
    %151 = tpu.dynamic_rotate %139 by %c32_i32_71 dim 1 : vector<2x1280xf32>, i32 -> vector<2x1280xf32>
    %152 = vector.shape_cast %19 : vector<1x1280xi1> to vector<1x1280xi1>
    %153 = vector.broadcast %152 : vector<1x1280xi1> to vector<2x1280xi1>
    %154 = arith.select %153, %151, %139 : vector<2x1280xi1>, vector<2x1280xf32>
    %cst_72 = arith.constant 2.500000e-01 : f32
    %155 = vector.broadcast %cst_72 : f32 to vector<2x1280xf32>
    %156 = arith.mulf %155, %154 : vector<2x1280xf32>
    %157 = arith.addf %143, %156 : vector<2x1280xf32>
    %c1248_i32_73 = arith.constant 1248 : i32
    %158 = tpu.dynamic_rotate %130 by %c1248_i32_73 dim 1 : vector<2x1280xf32>, i32 -> vector<2x1280xf32>
    %159 = vector.shape_cast %21 : vector<1x1280xi1> to vector<1x1280xi1>
    %160 = vector.broadcast %159 : vector<1x1280xi1> to vector<2x1280xi1>
    %161 = arith.select %160, %158, %130 : vector<2x1280xi1>, vector<2x1280xf32>
    %cst_74 = arith.constant 2.500000e-01 : f32
    %162 = vector.broadcast %cst_74 : f32 to vector<2x1280xf32>
    %163 = arith.mulf %162, %161 : vector<2x1280xf32>
    %164 = arith.addf %141, %163 : vector<2x1280xf32>
    %c1248_i32_75 = arith.constant 1248 : i32
    %165 = tpu.dynamic_rotate %139 by %c1248_i32_75 dim 1 : vector<2x1280xf32>, i32 -> vector<2x1280xf32>
    %166 = vector.shape_cast %21 : vector<1x1280xi1> to vector<1x1280xi1>
    %167 = vector.broadcast %166 : vector<1x1280xi1> to vector<2x1280xi1>
    %168 = arith.select %167, %165, %139 : vector<2x1280xi1>, vector<2x1280xf32>
    %cst_76 = arith.constant 2.500000e-01 : f32
    %169 = vector.broadcast %cst_76 : f32 to vector<2x1280xf32>
    %170 = arith.mulf %169, %168 : vector<2x1280xf32>
    %171 = arith.addf %143, %170 : vector<2x1280xf32>
    %172 = vector.extract_strided_slice %150 {offsets = [0, 128], sizes = [2, 1024], strides = [1, 1]} : vector<2x1280xf32> to vector<2x1024xf32>
    %c0_77 = arith.constant 0 : index
    %c0_78 = arith.constant 0 : index
    %c0_79 = arith.constant 0 : index
    %173 = vector.load %arg10[%c0_77, %c0_78, %c0_79] : memref<1x8x1024xf32, #tpu.memory_space<vmem>>, vector<1x2x1024xf32>
    %174 = vector.shape_cast %173 : vector<1x2x1024xf32> to vector<2x1024xf32>
    %175 = vector.shape_cast %172 : vector<2x1024xf32> to vector<1x2x1024xf32>
    tpu.vector_store %arg10[%c0_77, %c0_78, %c0_79], %175 {strides = array<i32>} : memref<1x8x1024xf32, #tpu.memory_space<vmem>>, vector<1x2x1024xf32>,
    %176 = vector.extract_strided_slice %157 {offsets = [0, 128], sizes = [2, 1024], strides = [1, 1]} : vector<2x1280xf32> to vector<2x1024xf32>
    %c0_80 = arith.constant 0 : index
    %c2_81 = arith.constant 2 : index
    %c0_82 = arith.constant 0 : index
    %177 = vector.load %arg10[%c0_80, %c2_81, %c0_82] : memref<1x8x1024xf32, #tpu.memory_space<vmem>>, vector<1x2x1024xf32>
    %178 = vector.shape_cast %177 : vector<1x2x1024xf32> to vector<2x1024xf32>
    %179 = vector.shape_cast %176 : vector<2x1024xf32> to vector<1x2x1024xf32>
    tpu.vector_store %arg10[%c0_80, %c2_81, %c0_82], %179 {strides = array<i32>} : memref<1x8x1024xf32, #tpu.memory_space<vmem>>, vector<1x2x1024xf32>,
    %180 = vector.extract_strided_slice %164 {offsets = [0, 128], sizes = [2, 1024], strides = [1, 1]} : vector<2x1280xf32> to vector<2x1024xf32>
    %c0_83 = arith.constant 0 : index
    %c4_84 = arith.constant 4 : index
    %c0_85 = arith.constant 0 : index
    %181 = vector.load %arg10[%c0_83, %c4_84, %c0_85] : memref<1x8x1024xf32, #tpu.memory_space<vmem>>, vector<1x2x1024xf32>
    %182 = vector.shape_cast %181 : vector<1x2x1024xf32> to vector<2x1024xf32>
    %183 = vector.shape_cast %180 : vector<2x1024xf32> to vector<1x2x1024xf32>
    tpu.vector_store %arg10[%c0_83, %c4_84, %c0_85], %183 {strides = array<i32>} : memref<1x8x1024xf32, #tpu.memory_space<vmem>>, vector<1x2x1024xf32>,
    %184 = vector.extract_strided_slice %171 {offsets = [0, 128], sizes = [2, 1024], strides = [1, 1]} : vector<2x1280xf32> to vector<2x1024xf32>
    %c0_86 = arith.constant 0 : index
    %c6_87 = arith.constant 6 : index
    %c0_88 = arith.constant 0 : index
    %185 = vector.load %arg10[%c0_86, %c6_87, %c0_88] : memref<1x8x1024xf32, #tpu.memory_space<vmem>>, vector<1x2x1024xf32>
    %186 = vector.shape_cast %185 : vector<1x2x1024xf32> to vector<2x1024xf32>
    %187 = vector.shape_cast %184 : vector<2x1024xf32> to vector<1x2x1024xf32>
    tpu.vector_store %arg10[%c0_86, %c6_87, %c0_88], %187 {strides = array<i32>} : memref<1x8x1024xf32, #tpu.memory_space<vmem>>, vector<1x2x1024xf32>,
    return
  }
  func.func @transform_0(%arg0: i32, %arg1: i32) -> i32 {
    %c0_i32 = arith.constant 0 : i32
    %c0_i32_0 = arith.constant 0 : i32
    return %c0_i32 : i32
  }
  func.func @transform_1(%arg0: i32, %arg1: i32) -> (i32, i32, i32) {
    %c8_i32 = arith.constant 8 : i32
    %0 = arith.muli %arg1, %c8_i32 : i32
    %c1_i32 = arith.constant 1 : i32
    %1 = arith.subi %0, %c1_i32 : i32
    %c0_i32 = arith.constant 0 : i32
    %2 = arith.maxsi %1, %c0_i32 : i32
    %c0_i32_0 = arith.constant 0 : i32
    %c0_i32_1 = arith.constant 0 : i32
    return %arg0, %c0_i32_0, %2 : i32, i32, i32
  }
  func.func @transform_2(%arg0: i32, %arg1: i32) -> (i32, i32, i32) {
    %c0_i32 = arith.constant 0 : i32
    %c0_i32_0 = arith.constant 0 : i32
    return %arg0, %c0_i32, %arg1 : i32, i32, i32
  }
  func.func @transform_3(%arg0: i32, %arg1: i32) -> (i32, i32, i32) {
    %c1_i32 = arith.constant 1 : i32
    %0 = arith.addi %arg1, %c1_i32 : i32
    %c8_i32 = arith.constant 8 : i32
    %1 = arith.muli %0, %c8_i32 : i32
    %c7_i32 = arith.constant 7 : i32
    %2 = arith.minsi %1, %c7_i32 : i32
    %c0_i32 = arith.constant 0 : i32
    %c0_i32_0 = arith.constant 0 : i32
    return %arg0, %c0_i32, %2 : i32, i32, i32
  }
  func.func @transform_4(%arg0: i32, %arg1: i32) -> (i32, i32) {
    %c0_i32 = arith.constant 0 : i32
    %c0_i32_0 = arith.constant 0 : i32
    %c0_i32_1 = arith.constant 0 : i32
    return %c0_i32, %c0_i32_0 : i32, i32
  }
  func.func @transform_5(%arg0: i32, %arg1: i32) -> (i32, i32, i32) {
    %c0_i32 = arith.constant 0 : i32
    %c0_i32_0 = arith.constant 0 : i32
    %c0_i32_1 = arith.constant 0 : i32
    %c0_i32_2 = arith.constant 0 : i32
    return %c0_i32, %c0_i32_0, %c0_i32_1 : i32, i32, i32
  }
  func.func @transform_6(%arg0: i32, %arg1: i32) -> (i32, i32) {
    %c0_i32 = arith.constant 0 : i32
    %c0_i32_0 = arith.constant 0 : i32
    %c0_i32_1 = arith.constant 0 : i32
    return %c0_i32, %c0_i32_0 : i32, i32
  }
  func.func @transform_7(%arg0: i32, %arg1: i32) -> (i32, i32) {
    %c0_i32 = arith.constant 0 : i32
    %c0_i32_0 = arith.constant 0 : i32
    %c0_i32_1 = arith.constant 0 : i32
    return %c0_i32, %c0_i32_0 : i32, i32
  }
  func.func @transform_8(%arg0: i32, %arg1: i32) -> (i32, i32, i32) {
    %c0_i32 = arith.constant 0 : i32
    %c0_i32_0 = arith.constant 0 : i32
    return %arg0, %c0_i32, %arg1 : i32, i32, i32
  }
}

</mosaic_0001>

<bundles_post_ra>
// kernel: upsample_forward.2
= control target key start
LH: loop header
LB: loop body
LE: loop exit
PB: predicated region body
PF: predicated region fallthrough
CT: control target
= control target key end

     0   :  { %13 = vsyncpa [#allocation4], 0  ;;  %s3931_s0 = inlined_call_operand.hbm [shape: f32[2], index: 0, kind: input, shape index: {}]   ;;  %s3932_s1 = inlined_call_operand.vmem [shape: f32[2,8,256], index: 1, kind: input, shape index: {}, may-alias: {1,2,3}]   ;;  %s3933_s2 = inlined_call_operand.vmem [shape: f32[2,8,256], index: 2, kind: input, shape index: {}, may-alias: {1,2,3}]   ;;  %s3934_s3 = inlined_call_operand.vmem [shape: f32[2,8,256], index: 3, kind: input, shape index: {}, may-alias: {1,2,3}]   ;;  %s3935_s4 = inlined_call_operand.hbm [shape: f32[8,8], index: 4, kind: input, shape index: {}]   ;;  %s3936_s5 = inlined_call_operand.vmem [shape: f32[9,8,8], index: 5, kind: input, shape index: {}]   ;;  %s3937_s6 = inlined_call_operand.hbm [shape: f32[4,8], index: 6, kind: input, shape index: {}]   ;;  %s3938_s7 = inlined_call_operand.hbm [shape: f32[4,8], index: 7, kind: input, shape index: {}]   ;;  %s3939_s8 = inlined_call_operand.vmem [shape: f32[2,16,256], index: 8, kind: output, shape index: {}]  }
   0x1   :  { %14 = vsyncpa [#allocation3], 0 }
   0x2   :  { %15 = vsyncpa [#allocation7], 0  ;;  %s3279_s27 = smov 0   ;;  %s3281_s28 = smov 0  }
   0x3   :  { %s3283_s29 = smov 0  }
   0x4 LB: > { %s3221_s30 = smov [#allocation6]   ;;  %s2884_s10 = sadd.s32 4294967295, %s3219_s29   ;;  %s3219_s29 = sphi %s3283_s29, %s21_s29   ;;  %s3215_s28 = sphi %s3281_s28, %s4010_s28   ;;  %s3211_s27 = sphi %s3279_s27, %s4009_s27  }
   0x5   : > { %s307_s9 = sshll.u32 %s3221_s30, 4  ;;  %p2886_p0 = scmp.ge.s32.totalorder %s3219_s29, 1  ;;  %s308_s9 = int_to_ptr.vmem [resolvable:$true] %s307_s9 }
   0x6   : > { %p271_p1 = scmp.lt.s32.totalorder %s3219_s29, 3  ;;  %p3297_p2 = scmp.eq.s32.totalorder %s2884_s10, 0 }
   0x7   : > { %s33_s13 = sadd.s32 1, %s3215_s28  ;;  %s3222_s16 = smov [#allocation5]  }
   0x8   : > { %s3952_s11 = scalar_select %p3297_p2, 1, 0 }
   0x9   : > { %p3301_p3 = pnand %p2886_p0, %p271_p1  ;;  %p3314_p6 = scmp.ge.s32.totalorder %s33_s13, 2 }
   0xa   : > { %s3318_s17 = sshll.u32 %s3222_s16, 4  ;;  %s3088_s20 = scalar_lea.hbm %s3937_s6, 64  ;;  %s294_s17 = int_to_ptr.vmem [resolvable:$true] %s3318_s17 }
   0xb   : > { %s3953_s12 = scalar_select %p3301_p3, 1, 0 }
   0xc   : > { %p3030_p4 = pneg %p3301_p3  ;;  %p3089_p7 = scmp.ne.s32.totalorder %s3937_s6, %s3088_s20 }
   0xd   : > { %s3955_s15 = scalar_select %p3314_p6, 1, 0 }
   0xe   : > { %p3310_p5 = pnand %p3297_p2, %p3030_p4  ;;  %p3095_p11 = scmp.lt.u32.totalorder %s3088_s20, %s3937_s6 }
  0x10   : > { %p3328_p8 = pneg %p3310_p5 }
  0x12   : > { %p3091_p9 = pnand %p3328_p8, %p3089_p7 }
  0x14   : > { %p3092_p10 = pneg %p3091_p9 }
  0x16   : > { %p3097_p12 = pnand %p3095_p11, %p3092_p10 }
  0x18   : > { %3100 = shalt.err (!%p3097_p12)
}
  0x19   : > { %s3101_s26 = scalar_lea.vmem %s308_s9, 64  ;;  %p3109_p4 = scmp.lt.s32.totalorder %s308_s9, %s308_s9 }
  0x1a   : > { %p3102_p13 = scmp.ne.s32.totalorder %s308_s9, %s3101_s26  ;;  %p3110_p2 = scmp.lt.s32.totalorder %s3101_s26, %s3101_s26 }
  0x1c   : > { %p3104_p0 = pnand %p3102_p13, %p3328_p8  ;;  %p3111_p3 = por %p3110_p2, %p3109_p4 }
  0x1e   : > { %p3105_p1 = pneg %p3104_p0 }
  0x20   : > { %p3112_p6 = pnand %p3111_p3, %p3105_p1 }
  0x22   : > { %3115 = shalt.err (!%p3112_p6)
}
  0x23   : > { %3039 = dma.hbm_to_vmem [thread:$0]  (!%p3310_p5), %s3937_s6, 64, %s308_s9, [#allocation7]  }
  0x24   : > { %p3957_p7 = scmp.ne.s32.totalorder %s3955_s15, 0  ;;  %s3116_s19 = scalar_lea.hbm %s3931_s0, 16 }
  0x25   : > { %p3117_p2 = scmp.ne.s32.totalorder %s3931_s0, %s3116_s19  ;;  %p3123_p9 = scmp.lt.u32.totalorder %s3116_s19, %s3931_s0 }
  0x26   : > { %s4012_s13 = smov (%p3957_p7, %s33_s13), 0 }
  0x27   : > { %p3119_p3 = pnand %p3117_p2, %p3328_p8 }
  0x29   : > { %p3120_p6 = pneg %p3119_p3 }
  0x2b   : > { %p3125_p10 = pnand %p3123_p9, %p3120_p6 }
  0x2d   : > { %3128 = shalt.err (!%p3125_p10)
}
  0x2e   : > { %s3223_s9 = smov [#allocation2]   ;;  %s3224_s26 = smov [#allocation8]  }
  0x2f   : > { %3033 = dma.hbm_to_smem (!%p3310_p5), %s3931_s0, 16, %s3223_s9, [#allocation4]  }
  0x30   : > { %s318_s30 = sshll.u32 %s3224_s26, 4  ;;  %s3129_s18 = scalar_lea.hbm %s3935_s4, 128  ;;  %s319_s30 = int_to_ptr.vmem [resolvable:$true] %s318_s30 }
  0x31   : > { %p3130_p11 = scmp.ne.s32.totalorder %s3935_s4, %s3129_s18  ;;  %p3136_p0 = scmp.lt.u32.totalorder %s3129_s18, %s3935_s4 }
  0x33   : > { %p3132_p12 = pnand %p3130_p11, %p3328_p8 }
  0x35   : > { %p3133_p13 = pneg %p3132_p12 }
  0x37   : > { %p3138_p1 = pnand %p3136_p0, %p3133_p13 }
  0x39   : > { %3141 = shalt.err (!%p3138_p1)
}
  0x3a   : > { %s3142_s24 = scalar_lea.vmem %s294_s17, 128  ;;  %p3150_p3 = scmp.lt.s32.totalorder %s294_s17, %s294_s17 }
  0x3b   : > { %p3143_p4 = scmp.ne.s32.totalorder %s294_s17, %s3142_s24  ;;  %p3151_p6 = scmp.lt.s32.totalorder %s3142_s24, %s3142_s24 }
  0x3d   : > { %p3145_p7 = pnand %p3143_p4, %p3328_p8  ;;  %p3152_p9 = por %p3151_p6, %p3150_p3 }
  0x3f   : > { %p3146_p2 = pneg %p3145_p7 }
  0x41   : > { %p3153_p10 = pnand %p3152_p9, %p3146_p2 }
  0x43   : > { %3156 = shalt.err (!%p3153_p10)
}
  0x44   : > { %3036 = dma.hbm_to_vmem [thread:$0]  (!%p3310_p5), %s3935_s4, 128, %s294_s17, [#allocation3]  }
  0x45   : > { %s3157_s10 = scalar_lea.hbm %s3938_s7, 64 }
  0x46   : > { %p3158_p11 = scmp.ne.s32.totalorder %s3938_s7, %s3157_s10  ;;  %p3164_p0 = scmp.lt.u32.totalorder %s3157_s10, %s3938_s7 }
  0x48   : > { %p3160_p12 = pnand %p3158_p11, %p3328_p8 }
  0x4a   : > { %p3161_p13 = pneg %p3160_p12 }
  0x4c   : > { %p3166_p1 = pnand %p3164_p0, %p3161_p13 }
  0x4e   : > { %3169 = shalt.err (!%p3166_p1)
}
  0x4f   : > { %s3170_s21 = scalar_lea.vmem %s319_s30, 64  ;;  %p3178_p3 = scmp.lt.s32.totalorder %s319_s30, %s319_s30 }
  0x50   : > { %p3171_p4 = scmp.ne.s32.totalorder %s319_s30, %s3170_s21  ;;  %p3179_p6 = scmp.lt.s32.totalorder %s3170_s21, %s3170_s21 }
  0x52   : > { %p3173_p7 = pnand %p3171_p4, %p3328_p8  ;;  %p3180_p9 = por %p3179_p6, %p3178_p3 }
  0x54   : > { %p3174_p2 = pneg %p3173_p7 }
  0x56   : > { %p3181_p10 = pnand %p3180_p9, %p3174_p2 }
  0x58   : > { %3184 = shalt.err (!%p3181_p10)
}
  0x59   : > { %3042 = dma.hbm_to_vmem [thread:$0]  (!%p3310_p5), %s3938_s7, 64, %s319_s30, [#allocation7]  }
  0x5a   : > { %p3958_p11 = scmp.ne.s32.totalorder %s3953_s12, 0 }
  0x5b   : > { %p3959_p12 = scmp.ne.s32.totalorder (!%p3958_p11), %s3952_s11, 0 }
  0x5c   : > { %382 = sbr.rel (%p3958_p11) target bundleno = 1217 (0x4c1), region = 52 }
  0x63   : > { %3198 = dma.done.wait (%p3959_p12), [#allocation4], 16  }
  0x64   : > { %3200 = vsyncadd (%p3959_p12), [#allocation4], 4294967280 }
  0x65   : > { %3202 = dma.done.wait (%p3959_p12), [#allocation3], 128  }
  0x66   : > { %3204 = vsyncadd (%p3959_p12), [#allocation3], 4294967168 }
  0x67   : > { %3206 = dma.done.wait (%p3959_p12), [#allocation7], 128  }
  0x68   : > { %3208 = vsyncadd (%p3959_p12), [#allocation7], 4294967168 }
  0x69   : > { %400 = sfence }
  0x6a   : > { %p465_p5 = scmp.lt.s32.totalorder %s3211_s27, 1  ;;  %v3225_v0 = vmov 0.0   ;;  %v571_v2 = vld [vmem:[#allocation5] sm:$0xff]  ;;  %vm3951_vm0 = vcmask 64512   ;;  %s514_s16 = sld [smem:[#allocation2]]  ;;  %v520_v19 = vlaneseq  ;;  %v2908_v39 = vld [vmem:[%s3936_s5 + $0x8] sm:$0xff] }
  0x6b   : > { %640 = vmatprep.mubr.f32.mxu0 %v3225_v0  ;;  %711 = vmatprep.mubr.f32.mxu1 %v3225_v0  ;;  %s3226_s18 = smov 16   ;;  %s3227_s20 = smov 17   ;;  %v731_v54 = vld [vmem:[%s3936_s5] sm:$0xff] }
  0x6c   : > { %s4014_s27 = smov (!%p465_p5, %s3211_s27), 1  ;;  %s3228_s19 = smov 15   ;;  %v3503_v20 = vand.u32 127, %v520_v19 }
  0x6d   : > { %s2972_s12 = sshll.u32 %s4014_s27, 4  ;;  %s3229_s21 = smov 1  }
  0x6e   : > { %s485_s30 = scalar_lea.vmem %s3933_s2, %s2972_s12  ;;  %s472_s9 = scalar_lea.vmem %s3932_s1, %s2972_s12  ;;  %v522_v21 = vadd.s32 128, %v3503_v20  ;;  %v3507_v22 = vadd.s32 384, %v3503_v20  ;;  %v3510_v23 = vadd.s32 256, %v3503_v20  ;;  %v525_v25 = vshra.s32 %v3503_v20, 4 }
  0x6f   : > { %v3425_v1 = vld [vmem:[%s485_s30] sm:$0xff]  ;;  %s2975_s15 = sadd.s32 8, %s2972_s12  ;;  %v3436_v4 = vld [vmem:[%s485_s30 + $0x8] sm:$0xff]  ;;  %s3230_s17 = smov 127   ;;  %vm3943_vm5 = vcmp.lt.s32.totalorder %v3503_v20, 16  ;;  %v529_v37 = vand.u32 15, %v3503_v20 }
  0x70   : > { %576 = vmatprep.subr.mxu0 %v3425_v1  ;;  %v3431_v3 = vld [vmem:[%s472_s9] sm:$0xff]  ;;  %s498_s10 = scalar_lea.vmem %s3934_s3, %s2975_s15  ;;  %v722_v6 = vstv %s514_s16  ;;  %s3231_s22 = smov 113   ;;  %v526_v24 = vshra.s32 %v522_v21, 4  ;;  %v528_v26 = vshra.s32 %v3507_v22, 4  ;;  %v527_v27 = vshra.s32 %v3510_v23, 4 }
  0x71   : > { %577 = vmatpush1.msra.mxu0 %v3431_v3  ;;  %v3439_v5 = vld [vmem:[%s498_s10] sm:$0xff]  ;;  %s3232_s12 = smov 112   ;;  %s3233_s14 = smov 111   ;;  %v3517_v30 = vadd.s32 4294967288, %v525_v25  ;;  %v530_v34 = vand.u32 15, %v522_v21  ;;  %v532_v41 = vand.u32 15, %v3507_v22 }
  0x72   : > { %647 = vmatprep.subr.mxu1 %v3439_v5  ;;  %2906 = vmatmul.mubr.msk.f32.vlgmr.msra.gmra.mrb[0].mxu0 %vm3951_vm0, %v571_v2  ;;  %v3515_v28 = vadd.s32 4294967288, %v526_v24  ;;  %v3519_v31 = vadd.s32 4294967288, %v528_v26  ;;  %v3522_v33 = vadd.s32 4294967288, %v527_v27  ;;  %v531_v44 = vand.u32 15, %v3510_v23  ;;  %v2928_v22 = vld [vmem:[%s3936_s5 + $0x18] sm:$0xff]  ;;  %s2905_s9 = sld [smem:[#allocation2 + $0x1]] }
  0x73   : > { %648 = vmatpush1.msra.mxu1 %v3436_v4  ;;  %851 = vmatprep.mubr.f32.mxu0 %v3225_v0  ;;  %vm539_vm7 = vcmp.ge.s32.totalorder %v3517_v30, 1  ;;  %vm3536_vm10 = vcmp.ge.s32.totalorder %v530_v34, 1  ;;  %vm740_vm11 = vcmp.lt.s32.totalorder %v3503_v20, 17  ;;  %vm3560_vm13 = vcmp.ge.s32.totalorder %v529_v37, 1 }
  0x74   : > { %2907 = vmatmul.mubr.msk.f32.vlgmr.msra.gmra.mrb[0].mxu1 %vm3951_vm0, %v571_v2  ;;  %vm3945_vm6 = vcmp.ge.s32.totalorder %v3515_v28, 1  ;;  %vm542_vm8 = vcmp.ge.s32.totalorder %v3519_v31, 1  ;;  %vm3944_vm9 = vcmp.ge.s32.totalorder %v3522_v33, 1  ;;  %vm3566_vm14 = vcmp.ge.s32.totalorder %v532_v41, 1 }
  0x75   : > { %922 = vmatprep.mubr.f32.mxu1 %v3225_v0  ;;  %vm556_vm12 = vmand %vm3945_vm6, %vm3536_vm10  ;;  %vm3572_vm15 = vcmp.ge.s32.totalorder %v531_v44, 1 }
 0x145   : > { %v642_v7 = vpop.f32.mrb[0].mxu0 }
 0x146   : > { %vm718_vm1 = vcmp.ge.f32.partialorder %v642_v7, 0.0  ;;  %v723_v8 = vmul.f32 %v722_v6, %v642_v7  ;;  %v644_v9 = vpop.f32.mrb[1].mxu0 }
 0x147   : > { %v713_v10 = vpop.f32.mrb[0].mxu1  ;;  %v724_v12 = vmul.f32 %v722_v6, %v644_v9  ;;  %vm719_vm3 = vcmp.ge.f32.partialorder %v644_v9, 0.0 }
 0x148   : > { %v3447_v11 = vsel %vm718_vm1, %v642_v7, %v723_v8  ;;  %vm720_vm2 = vcmp.ge.f32.partialorder %v713_v10, 0.0  ;;  %v725_v13 = vmul.f32 %v722_v6, %v713_v10  ;;  %v715_v14 = vpop.f32.mrb[1].mxu1  ;;  %vm555_vm1 = vmand %vm539_vm7, %vm3560_vm13  ;;  %v2921_v8 = vld [vmem:[%s3936_s5 + $0x10] sm:$0xff] }
 0x149   : > { %759 = vrot.lane.b32.xlu0 %v3447_v11, %s3226_s18  ;;  %v726_v16 = vmul.f32 %v722_v6, %v715_v14  ;;  %vm721_vm4 = vcmp.ge.f32.partialorder %v715_v14, 0.0  ;;  %v3455_v17 = vsel %vm719_vm3, %v644_v9, %v724_v12  ;;  %vm557_vm3 = vmand %vm3944_vm9, %vm3572_vm15 }
 0x14a   : > { %v3451_v15 = vsel %vm720_vm2, %v713_v10, %v725_v13  ;;  %vm558_vm2 = vmand %vm542_vm8, %vm3566_vm14 }
 0x14b   : > { %763 = vrot.lane.b32.xlu1 %v3451_v15, %s3226_s18  ;;  %v3459_v18 = vsel %vm721_vm4, %v715_v14, %v726_v16  ;;  %vm3592_vm4 = vcmp.le.s32.totalorder %v530_v34, 14 }
 0x14d   : > { %761 = vrot.lane.b32.xlu0 %v3455_v17, %s3226_s18 }
 0x14f   : > { %765 = vrot.lane.b32.xlu1 %v3459_v18, %s3226_s18 }
 0x151   : > { %732 = vrot.lane.b32.xlu0 %v3447_v11, %s3227_s20 }
 0x153   : > { %734 = vrot.lane.b32.xlu1 %v3455_v17, %s3227_s20 }
 0x155   : > { %736 = vrot.lane.b32.xlu0 %v3451_v15, %s3227_s20 }
 0x157   : > { %738 = vrot.lane.b32.xlu1 %v3459_v18, %s3227_s20 }
 0x159   : > { %1076 = vrot.lane.b32.xlu0 %v3447_v11, %s3228_s19 }
 0x15b   : > { %1078 = vrot.lane.b32.xlu1 %v3455_v17, %s3228_s19 }
 0x15d   : > { %1080 = vrot.lane.b32.xlu0 %v3451_v15, %s3228_s19 }
 0x15f   : > { %1082 = vrot.lane.b32.xlu1 %v3459_v18, %s3228_s19 }
 0x161   : > { %1252 = vrot.lane.b32.xlu0 %v3447_v11, %s3229_s21 }
 0x163   : > { %1254 = vrot.lane.b32.xlu1 %v3455_v17, %s3229_s21 }
 0x165   : > { %1256 = vrot.lane.b32.xlu0 %v3451_v15, %s3229_s21 }
 0x167   : > { %1258 = vrot.lane.b32.xlu1 %v3459_v18, %s3229_s21 }
 0x169   : > { %1579 = vrot.lane.b32.xlu0 %v3447_v11, %s3230_s17 }
 0x16b   : > { %1581 = vrot.lane.b32.xlu1 %v3455_v17, %s3230_s17 }
 0x16d   : > { %1583 = vrot.lane.b32.xlu0 %v3451_v15, %s3230_s17 }
 0x16f   : > { %1585 = vrot.lane.b32.xlu1 %v3459_v18, %s3230_s17 }
 0x171   : > { %1755 = vrot.lane.b32.xlu0 %v3447_v11, %s3231_s22 }
 0x173   : > { %1757 = vrot.lane.b32.xlu1 %v3455_v17, %s3231_s22 }
 0x175   : > { %1759 = vrot.lane.b32.xlu0 %v3451_v15, %s3231_s22 }
 0x177   : > { %1761 = vrot.lane.b32.xlu1 %v3459_v18, %s3231_s22 }
 0x179   : > { %1931 = vrot.lane.b32.xlu0 %v3447_v11, %s3232_s12 }
 0x17b   : > { %1933 = vrot.lane.b32.xlu1 %v3455_v17, %s3232_s12 }
 0x17d   : > { %1935 = vrot.lane.b32.xlu0 %v3451_v15, %s3232_s12 }
 0x17f   : > { %1937 = vrot.lane.b32.xlu1 %v3459_v18, %s3232_s12 }
 0x181   : > { %2107 = vrot.lane.b32.xlu0 %v3447_v11, %s3233_s14 }
 0x183   : > { %2109 = vrot.lane.b32.xlu1 %v3455_v17, %s3233_s14 }
 0x185   : > { %2111 = vrot.lane.b32.xlu0 %v3451_v15, %s3233_s14 }
 0x187   : > { %2113 = vrot.lane.b32.xlu1 %v3459_v18, %s3233_s14 }
 0x1bb   : > { %v760_v29 = vpop.permute.xlu0 %759 }
 0x1bd   : > { %v764_v32 = vpop.permute.xlu1 %763 }
 0x1bf   : > { %v762_v35 = vpop.permute.xlu0 %761 }
 0x1c0   : > { %v770_v36 = vsel %vm3943_vm5, %v760_v29, %v762_v35  ;;  %v769_v45 = vsel %vm3943_vm5, %v762_v35, %v764_v32 }
 0x1c1   : > { %v766_v38 = vpop.permute.xlu1 %765  ;;  %2909 = vmatprep.subr.msk.mxu0 %vm3945_vm6, %v770_v36 }
 0x1c2   : > { %v768_v42 = vsel %vm3943_vm5, %v764_v32, %v766_v38  ;;  %v771_v43 = vsel %vm3943_vm5, %v766_v38, %v760_v29  ;;  %vm560_vm5 = vmand %vm3945_vm6, %vm3592_vm4 }
 0x1c3   : > { %2910 = vmatpush1.msk.msra.mxu0 %vm539_vm7, %v771_v43  ;;  %2912 = vmatprep.subr.msk.mxu1 %vm542_vm8, %v768_v42  ;;  %v733_v46 = vpop.permute.xlu0 %732 }
 0x1c4   : > { %2911 = vmatmul.mubr.msk.f32.vlgmr.msra.gmra.mrb[2].mxu0 %vm3951_vm0, %v2908_v39  ;;  %2913 = vmatpush1.msk.msra.mxu1 %vm3944_vm9, %v769_v45  ;;  %vm3608_vm9 = vcmp.le.s32.totalorder %v529_v37, 14 }
 0x1c5   : > { %v735_v48 = vpop.permute.xlu1 %734  ;;  %2914 = vmatmul.mubr.msk.f32.vlgmr.msra.gmra.mrb[2].mxu1 %vm3951_vm0, %v2908_v39  ;;  %996 = vmatprep.mubr.f32.mxu0 %v3225_v0 }
 0x1c6   : > { %v743_v50 = vsel %vm740_vm11, %v733_v46, %v735_v48  ;;  %1067 = vmatprep.mubr.f32.mxu1 %v3225_v0 }
 0x1c7   : > { %2915 = vmatprep.subr.msk.mxu0 %vm556_vm12, %v743_v50  ;;  %v737_v52 = vpop.permute.xlu0 %736  ;;  %vm1084_vm12 = vcmp.lt.s32.totalorder %v3503_v20, 15 }
 0x1c8   : > { %v742_v58 = vsel %vm740_vm11, %v735_v48, %v737_v52 }
 0x1c9   : > { %v739_v53 = vpop.permute.xlu1 %738 }
 0x1ca   : > { %v741_v56 = vsel %vm740_vm11, %v737_v52, %v739_v53  ;;  %v744_v57 = vsel %vm740_vm11, %v739_v53, %v733_v46  ;;  %vm3614_vm11 = vcmp.le.s32.totalorder %v532_v41, 14  ;;  %v2938_v41 = vld [vmem:[%s3936_s5 + $0x28] sm:$0xff]  ;;  %v2945_v53 = vld [vmem:[%s3936_s5 + $0x30] sm:$0xff] }
 0x1cb   : > { %2916 = vmatpush1.msk.msra.mxu0 %vm555_vm1, %v744_v57  ;;  %2918 = vmatprep.subr.msk.mxu1 %vm558_vm2, %v741_v56  ;;  %v1077_v59 = vpop.permute.xlu0 %1076  ;;  %vm3620_vm1 = vcmp.le.s32.totalorder %v531_v44, 14  ;;  %vm559_vm2 = vmand %vm539_vm7, %vm3608_vm9  ;;  %vm3946_vm7 = vcmp.lt.s32.totalorder %v3503_v20, 1 }
 0x1cc   : > { %2917 = vmatmul.mubr.msk.f32.vlgmr.msra.gmra.mrb[2].mxu0 %vm3951_vm0, %v731_v54  ;;  %2919 = vmatpush1.msk.msra.mxu1 %vm557_vm3, %v742_v58  ;;  %vm562_vm3 = vmand %vm542_vm8, %vm3614_vm11  ;;  %vm3948_vm8 = vcmp.le.s32.totalorder %v3515_v28, 14 }
 0x1cd   : > { %v1079_v61 = vpop.permute.xlu1 %1078  ;;  %2920 = vmatmul.mubr.msk.f32.vlgmr.msra.gmra.mrb[2].mxu1 %vm3951_vm0, %v731_v54  ;;  %1168 = vmatprep.mubr.f32.mxu0 %v3225_v0 }
 0x1ce   : > { %v1087_v63 = vsel %vm1084_vm12, %v1077_v59, %v1079_v61  ;;  %1239 = vmatprep.mubr.f32.mxu1 %v3225_v0 }
 0x1cf   : > { %2922 = vmatprep.subr.msk.mxu0 %vm560_vm5, %v1087_v63  ;;  %v1081_v6 = vpop.permute.xlu0 %1080  ;;  %vm3976_vm5 = vcmp.ge.s32.totalorder %v3522_v33, 1 }
 0x1d0   : > { %vm561_vm6 = vmand %vm3976_vm5, %vm3620_vm1  ;;  %v1086_v12 = vsel %vm1084_vm12, %v1079_v61, %v1081_v6  ;;  %vm543_vm5 = vcmp.le.s32.totalorder %v3517_v30, 14  ;;  %v2959_v30 = vld [vmem:[%s3936_s5 + $0x40] sm:$0xff] }
 0x1d1   : > { %v1083_v7 = vpop.permute.xlu1 %1082 }
 0x1d2   : > { %v1085_v9 = vsel %vm1084_vm12, %v1081_v6, %v1083_v7  ;;  %v1088_v10 = vsel %vm1084_vm12, %v1083_v7, %v1077_v59  ;;  %vm3949_vm12 = vcmp.le.s32.totalorder %v3519_v31, 14  ;;  %v2952_v7 = vld [vmem:[%s3936_s5 + $0x38] sm:$0xff] }
 0x1d3   : > { %2923 = vmatpush1.msk.msra.mxu0 %vm559_vm2, %v1088_v10  ;;  %2925 = vmatprep.subr.msk.mxu1 %vm562_vm3, %v1085_v9  ;;  %v1253_v13 = vpop.permute.xlu0 %1252  ;;  %vm564_vm2 = vmand %vm3948_vm8, %vm3536_vm10  ;;  %vm1763_vm3 = vcmp.lt.s32.totalorder %v3503_v20, 113  ;;  %v2295_v10 = vld [vmem:[#allocation8] sm:$0xf] }
 0x1d4   : > { %2924 = vmatmul.mubr.msk.f32.vlgmr.msra.gmra.mrb[2].mxu0 %vm3951_vm0, %v2921_v8  ;;  %2926 = vmatpush1.msk.msra.mxu1 %vm561_vm6, %v1086_v12  ;;  %vm3947_vm6 = vcmp.lt.s32.totalorder %v3503_v20, 127  ;;  %vm563_vm8 = vmand %vm543_vm5, %vm3560_vm13 }
 0x1d5   : > { %v1255_v14 = vpop.permute.xlu1 %1254  ;;  %2927 = vmatmul.mubr.msk.f32.vlgmr.msra.gmra.mrb[2].mxu1 %vm3951_vm0, %v2921_v8  ;;  %1344 = vmatprep.mubr.f32.mxu0 %v3225_v0 }
 0x1d6   : > { %v1263_v16 = vsel %vm3946_vm7, %v1253_v13, %v1255_v14  ;;  %1415 = vmatprep.mubr.f32.mxu1 %v3225_v0 }
 0x1d7   : > { %2929 = vmatprep.subr.msk.mxu0 %vm3536_vm10, %v1263_v16  ;;  %v1257_v19 = vpop.permute.xlu0 %1256 }
 0x1d8   : > { %v1262_v25 = vsel %vm3946_vm7, %v1255_v14, %v1257_v19 }
 0x1d9   : > { %v1259_v21 = vpop.permute.xlu1 %1258 }
 0x1da   : > { %v1261_v23 = vsel %vm3946_vm7, %v1257_v19, %v1259_v21  ;;  %v1264_v24 = vsel %vm3946_vm7, %v1259_v21, %v1253_v13  ;;  %vm545_vm7 = vcmp.le.s32.totalorder %v3522_v33, 14 }
 0x1db   : > { %2930 = vmatpush1.msk.msra.mxu0 %vm3560_vm13, %v1264_v24  ;;  %2932 = vmatprep.subr.msk.mxu1 %vm3566_vm14, %v1261_v23  ;;  %v1580_v26 = vpop.permute.xlu0 %1579 }
 0x1dc   : > { %2931 = vmatmul.mubr.msk.f32.vlgmr.msra.gmra.mrb[2].mxu0 %vm3951_vm0, %v2928_v22  ;;  %2933 = vmatpush1.msk.msra.mxu1 %vm3572_vm15, %v1262_v25 }
 0x1dd   : > { %1431 = vmatprep.subr.mxu0 %v3455_v17  ;;  %v1582_v27 = vpop.permute.xlu1 %1581  ;;  %2934 = vmatmul.mubr.msk.f32.vlgmr.msra.gmra.mrb[2].mxu1 %vm3951_vm0, %v2928_v22  ;;  %v2294_v22 = vld [vmem:[#allocation6] sm:$0xf] }
 0x1de   : > { %1432 = vmatpush1.msra.mxu0 %v3447_v11  ;;  %1502 = vmatprep.subr.mxu1 %v3459_v18  ;;  %v2935_v11 = vld [vmem:[%s3936_s5 + $0x20] sm:$0xff]  ;;  %v1590_v34 = vsel %vm3947_vm6, %v1580_v26, %v1582_v27 }
 0x1df   : > { %1503 = vmatpush1.msra.mxu1 %v3451_v15  ;;  %v1584_v29 = vpop.permute.xlu0 %1583  ;;  %1495 = vmatprep.mubr.f32.mxu0 %v3225_v0 }
 0x1e0   : > { %v1589_v32 = vsel %vm3947_vm6, %v1582_v27, %v1584_v29  ;;  %1566 = vmatprep.mubr.f32.mxu1 %v3225_v0 }
 0x1e1   : > { %v1586_v17 = vpop.permute.xlu1 %1585  ;;  %2939 = vmatprep.subr.msk.mxu0 %vm3592_vm4, %v1589_v32 }
 0x1e2   : > { %v1591_v18 = vsel %vm3947_vm6, %v1586_v17, %v1580_v26  ;;  %v1588_v35 = vsel %vm3947_vm6, %v1584_v29, %v1586_v17  ;;  %vm566_vm6 = vmand %vm3949_vm12, %vm3566_vm14 }
 0x1e3   : > { %2942 = vmatprep.subr.msk.mxu1 %vm3614_vm11, %v1591_v18  ;;  %v1756_v15 = vpop.permute.xlu0 %1755  ;;  %vm565_vm12 = vmand %vm545_vm7, %vm3572_vm15 }
 0x1e4   : > { %2936 = vmatmul.mubr.msk.f32.vlgmr.msra.gmra.mrb[2].mxu0 %vm3951_vm0, %v2935_v11 }
 0x1e5   : > { %2940 = vmatpush1.msk.msra.mxu0 %vm3608_vm9, %v1590_v34  ;;  %v1758_v36 = vpop.permute.xlu1 %1757  ;;  %2937 = vmatmul.mubr.msk.f32.vlgmr.msra.gmra.mrb[2].mxu1 %vm3951_vm0, %v2935_v11 }
 0x1e6   : > { %2943 = vmatpush1.msk.msra.mxu1 %vm3620_vm1, %v1588_v35  ;;  %1671 = vmatprep.mubr.f32.mxu0 %v3225_v0  ;;  %v1766_v44 = vsel %vm1763_vm3, %v1756_v15, %v1758_v36 }
 0x1e7   : > { %v1760_v37 = vpop.permute.xlu0 %1759  ;;  %1742 = vmatprep.mubr.f32.mxu1 %v3225_v0 }
 0x1e8   : > { %v1765_v38 = vsel %vm1763_vm3, %v1758_v36, %v1760_v37 }
 0x1e9   : > { %v1762_v39 = vpop.permute.xlu1 %1761  ;;  %2946 = vmatprep.subr.msk.mxu0 %vm564_vm2, %v1765_v38  ;;  %vm3977_vm2 = vcmp.le.s32.totalorder %v3515_v28, 14 }
 0x1ea   : > { %v1767_v42 = vsel %vm1763_vm3, %v1762_v39, %v1756_v15  ;;  %v1764_v45 = vsel %vm1763_vm3, %v1760_v37, %v1762_v39 }
 0x1eb   : > { %2949 = vmatprep.subr.msk.mxu1 %vm566_vm6, %v1767_v42  ;;  %v1932_v43 = vpop.permute.xlu0 %1931  ;;  %vm3950_vm6 = vcmp.lt.s32.totalorder %v3503_v20, 112 }
 0x1ec   : > { %2941 = vmatmul.mubr.msk.f32.vlgmr.msra.gmra.mrb[2].mxu0 %vm3951_vm0, %v2938_v41 }
 0x1ed   : > { %2947 = vmatpush1.msk.msra.mxu0 %vm563_vm8, %v1766_v44  ;;  %v1934_v46 = vpop.permute.xlu1 %1933  ;;  %2944 = vmatmul.mubr.msk.f32.vlgmr.msra.gmra.mrb[2].mxu1 %vm3951_vm0, %v2938_v41  ;;  %vm3978_vm8 = vcmp.le.s32.totalorder %v3519_v31, 14 }
 0x1ee   : > { %2950 = vmatpush1.msk.msra.mxu1 %vm565_vm12, %v1764_v45  ;;  %1847 = vmatprep.mubr.f32.mxu0 %v3225_v0  ;;  %v1942_v57 = vsel %vm3950_vm6, %v1932_v43, %v1934_v46  ;;  %vm3979_vm12 = vmmov %vm3977_vm2 }
 0x1ef   : > { %v1936_v48 = vpop.permute.xlu0 %1935  ;;  %1918 = vmatprep.mubr.f32.mxu1 %v3225_v0  ;;  %vm568_vm3 = vmand %vm3979_vm12, %vm3592_vm4 }
 0x1f0   : > { %v1941_v50 = vsel %vm3950_vm6, %v1934_v46, %v1936_v48  ;;  %vm567_vm12 = vmand %vm543_vm5, %vm3608_vm9 }
 0x1f1   : > { %v1938_v52 = vpop.permute.xlu1 %1937  ;;  %2953 = vmatprep.subr.msk.mxu0 %vm3977_vm2, %v1941_v50  ;;  %vm2115_vm2 = vcmp.lt.s32.totalorder %v3503_v20, 111 }
 0x1f2   : > { %v1943_v54 = vsel %vm3950_vm6, %v1938_v52, %v1932_v43  ;;  %v1940_v58 = vsel %vm3950_vm6, %v1936_v48, %v1938_v52  ;;  %vm570_vm6 = vmand %vm3978_vm8, %vm3614_vm11 }
 0x1f3   : > { %2956 = vmatprep.subr.msk.mxu1 %vm3978_vm8, %v1943_v54  ;;  %v2108_v56 = vpop.permute.xlu0 %2107  ;;  %vm3980_vm8 = vcmask 64512  }
 0x1f4   : > { %2948 = vmatmul.mubr.msk.f32.vlgmr.msra.gmra.mrb[2].mxu0 %vm3951_vm0, %v2945_v53 }
 0x1f5   : > { %2954 = vmatpush1.msk.msra.mxu0 %vm543_vm5, %v1942_v57  ;;  %v2110_v59 = vpop.permute.xlu1 %2109  ;;  %2951 = vmatmul.mubr.msk.f32.vlgmr.msra.gmra.mrb[2].mxu1 %vm3951_vm0, %v2945_v53  ;;  %vm569_vm0 = vmand %vm545_vm7, %vm3620_vm1 }
 0x1f6   : > { %2957 = vmatpush1.msk.msra.mxu1 %vm545_vm7, %v1940_v58  ;;  %2023 = vmatprep.mubr.f32.mxu0 %v3225_v0  ;;  %v2118_v31 = vsel %vm2115_vm2, %v2108_v56, %v2110_v59 }
 0x1f7   : > { %v2112_v61 = vpop.permute.xlu0 %2111  ;;  %2094 = vmatprep.mubr.f32.mxu1 %v3225_v0 }
 0x1f8   : > { %v2117_v63 = vsel %vm2115_vm2, %v2110_v59, %v2112_v61 }
 0x1f9   : > { %v2114_v6 = vpop.permute.xlu1 %2113  ;;  %2960 = vmatprep.subr.msk.mxu0 %vm568_vm3, %v2117_v63  ;;  %vm3981_vm3 = vmmov %vm3980_vm8 }
 0x1fa   : > { %v2119_v8 = vsel %vm2115_vm2, %v2114_v6, %v2108_v56  ;;  %v2116_v9 = vsel %vm2115_vm2, %v2112_v61, %v2114_v6  ;;  %vm3982_vm5 = vmmov %vm3981_vm3 }
 0x1fb   : > { %2963 = vmatprep.subr.msk.mxu1 %vm570_vm6, %v2119_v8  ;;  %vm3983_vm6 = vmmov %vm3981_vm3 }
 0x1fc   : > { %2955 = vmatmul.mubr.msk.f32.vlgmr.msra.gmra.mrb[2].mxu0 %vm3980_vm8, %v2952_v7 }
 0x1fd   : > { %2961 = vmatpush1.msk.msra.mxu0 %vm567_vm12, %v2118_v31  ;;  %2958 = vmatmul.mubr.msk.f32.vlgmr.msra.gmra.mrb[2].mxu1 %vm3981_vm3, %v2952_v7 }
 0x1fe   : > { %2964 = vmatpush1.msk.msra.mxu1 %vm569_vm0, %v2116_v9  ;;  %2199 = vmatprep.mubr.f32.mxu0 %v3225_v0  ;;  %vm3984_vm0 = vmmov %vm3981_vm3 }
 0x1ff   : > { %2270 = vmatprep.mubr.f32.mxu1 %v3225_v0  ;;  %2299 = vmatprep.subr.mxu0 %v3425_v1  ;;  %vm3985_vm2 = vmmov %vm3984_vm0  ;;  %v2285_v1 = vstv %s2905_s9 }
 0x200   : > { %2370 = vmatprep.subr.mxu1 %v3439_v5 }
 0x204   : > { %2962 = vmatmul.mubr.msk.f32.vlgmr.msra.gmra.mrb[2].mxu0 %vm3982_vm5, %v2959_v30 }
 0x205   : > { %2965 = vmatmul.mubr.msk.f32.vlgmr.msra.gmra.mrb[2].mxu1 %vm3983_vm6, %v2959_v30  ;;  %2300 = vmatpush1.msra.mxu0 %v3431_v3  ;;  %vm3986_vm6 = vmmov %vm3984_vm0 }
 0x206   : > { %2363 = vmatprep.mubr.f32.mxu0 %v3225_v0  ;;  %2371 = vmatpush1.msra.mxu1 %v3436_v4 }
 0x207   : > { %2434 = vmatprep.mubr.f32.mxu1 %v3225_v0 }
 0x208   : > { %2966 = vmatmul.mubr.msk.f32.vlgmr.msra.gmra.mrb[4].mxu0 %vm3984_vm0, %v2295_v10 }
 0x209   : > { %2967 = vmatmul.mubr.msk.f32.vlgmr.msra.gmra.mrb[4].mxu1 %vm3985_vm2, %v2295_v10  ;;  %2508 = vmatprep.mubr.f32.mxu0 %v3225_v0  ;;  %vm3987_vm2 = vcmp.lt.s32.totalorder %v3503_v20, 127 }
 0x20a   : > { %2579 = vmatprep.mubr.f32.mxu1 %v3225_v0 }
 0x2d7   : > { %v2201_v5 = vpop.f32.mrb[2].mxu0 }
 0x2d8   : > { %v2286_v12 = vmul.f32 %v2285_v1, %v2201_v5  ;;  %v2203_v3 = vpop.f32.mrb[3].mxu0  ;;  %v2272_v13 = vpop.f32.mrb[2].mxu1  ;;  %vm2281_vm12 = vcmp.ge.f32.partialorder %v2201_v5, 0.0 }
 0x2d9   : > { %vm2282_vm8 = vcmp.ge.f32.partialorder %v2203_v3, 0.0  ;;  %v2287_v14 = vmul.f32 %v2285_v1, %v2203_v3  ;;  %v2288_v4 = vmul.f32 %v2285_v1, %v2272_v13  ;;  %v2274_v16 = vpop.f32.mrb[3].mxu1  ;;  %vm2283_vm3 = vcmp.ge.f32.partialorder %v2272_v13, 0.0 }
 0x2da   : > { %vm2284_vm5 = vcmp.ge.f32.partialorder %v2274_v16, 0.0  ;;  %v2289_v19 = vmul.f32 %v2285_v1, %v2274_v16  ;;  %v2290_v23 = vsel %vm2281_vm12, %v2201_v5, %v2286_v12  ;;  %vm3988_vm12 = vmmov %vm3987_vm2 }
 0x2db   : > { %v2291_v21 = vsel %vm2282_vm8, %v2203_v3, %v2287_v14  ;;  %v2292_v0 = vsel %vm2283_vm3, %v2272_v13, %v2288_v4  ;;  %vm3989_vm8 = vcmp.lt.s32.totalorder %v3503_v20, 1 }
 0x2dc   : > { %2444 = vmatprep.subr.mxu0 %v2291_v21  ;;  %v2293_v24 = vsel %vm2284_vm5, %v2274_v16, %v2289_v19  ;;  %vm3991_vm3 = vmmov %vm3989_vm8  ;;  %vm3999_vm5 = vcmp.ge.s32.totalorder %v3522_v33, 1 }
 0x2dd   : > { %2445 = vmatpush1.msra.mxu0 %v2290_v23  ;;  %2515 = vmatprep.subr.mxu1 %v2293_v24 }
 0x2de   : > { %2968 = vmatmul.mubr.msk.f32.vlgmr.msra.gmra.mrb[4].mxu0 %vm3986_vm6, %v2294_v22  ;;  %2516 = vmatpush1.msra.mxu1 %v2292_v0  ;;  %vm4000_vm6 = vmmov %vm3999_vm5 }
 0x2df   : > { %2969 = vmatmul.mubr.msk.f32.vlgmr.msra.gmra.mrb[4].mxu1 %vm3984_vm0, %v2294_v22  ;;  %vm4001_vm0 = vcmp.lt.s32.totalorder %v3503_v20, 112 }
 0x3b1   : > { %v2510_v25 = vpop.f32.mrb[4].mxu0 }
 0x3b2   : > { %2614 = vrot.lane.b32.xlu0 %v2510_v25, %s3230_s17  ;;  %v2512_v26 = vpop.f32.mrb[5].mxu0  ;;  %v2581_v27 = vpop.f32.mrb[4].mxu1  ;;  %v2586_v35 = vmul.f32 0.75, %v2510_v25 }
 0x3b3   : > { %2616 = vrot.lane.b32.xlu1 %v2512_v26, %s3230_s17  ;;  %v2583_v29 = vpop.f32.mrb[5].mxu1  ;;  %v2587_v43 = vmul.f32 0.75, %v2512_v26  ;;  %v2588_v54 = vmul.f32 0.75, %v2581_v27 }
 0x3b4   : > { %v2589_v10 = vmul.f32 0.75, %v2583_v29 }
 0x3b6   : > { %2590 = vrot.lane.b32.xlu0 %v2510_v25, %s3229_s21 }
 0x3b7   : > { %2592 = vrot.lane.b32.xlu1 %v2512_v26, %s3229_s21 }
 0x3ba   : > { %2618 = vrot.lane.b32.xlu0 %v2581_v27, %s3230_s17 }
 0x3bb   : > { %2620 = vrot.lane.b32.xlu1 %v2583_v29, %s3230_s17 }
 0x3be   : > { %2594 = vrot.lane.b32.xlu0 %v2581_v27, %s3229_s21 }
 0x3bf   : > { %2596 = vrot.lane.b32.xlu1 %v2583_v29, %s3229_s21  ;;  %s2976_s21 = sshll.u32 %s4014_s27, 5 }
 0x424   : > { %v2615_v32 = vpop.permute.xlu0 %2614 }
 0x425   : > { %v2617_v17 = vpop.permute.xlu1 %2616 }
 0x426   : > { %v2624_v11 = vsel %vm3987_vm2, %v2615_v32, %v2617_v17 }
 0x427   : > { %v2626_v18 = vsel %vm3608_vm9, %v2624_v11, %v2510_v25  ;;  %vm3990_vm9 = vmmov %vm3987_vm2 }
 0x428   : > { %v2630_v15 = vmul.f32 0.25, %v2626_v18  ;;  %v2591_v34 = vpop.permute.xlu0 %2590 }
 0x429   : > { %v2593_v36 = vpop.permute.xlu1 %2592 }
 0x42a   : > { %v2634_v37 = vadd.f32 %v2630_v15, %v2586_v35  ;;  %v2600_v60 = vsel %vm3989_vm8, %v2591_v34, %v2593_v36  ;;  %vm4004_vm8 = vmmov %vm4001_vm0 }
 0x42b   : > { %v2603_v52 = vsel %vm3536_vm10, %v2600_v60, %v2512_v26  ;;  %vm3993_vm10 = vmmov %vm3991_vm3 }
 0x42c   : > { %2656 = vrot.lane.b32.xlu0 %v2634_v37, %s3226_s18  ;;  %v2619_v38 = vpop.permute.xlu0 %2618  ;;  %v2607_v58 = vmul.f32 0.25, %v2603_v52 }
 0x42d   : > { %v2623_v39 = vsel %vm3988_vm12, %v2617_v17, %v2619_v38  ;;  %v2621_v41 = vpop.permute.xlu1 %2620 }
 0x42e   : > { %v2627_v42 = vsel %vm3592_vm4, %v2623_v39, %v2512_v26  ;;  %v2622_v45 = vsel %vm3990_vm9, %v2619_v38, %v2621_v41  ;;  %vm3992_vm4 = vmmov %vm3987_vm2  ;;  %v3846_v51 = vadd.f32 %v2607_v58, %v2587_v43  ;;  %vm4002_vm2 = vcmp.le.s32.totalorder %v3515_v28, 14 }
 0x42f   : > { %v2631_v44 = vmul.f32 0.25, %v2627_v42  ;;  %v2628_v55 = vsel %vm3620_vm1, %v2622_v45, %v2581_v27  ;;  %v2625_v40 = vsel %vm3992_vm4, %v2621_v41, %v2615_v32  ;;  %vm4007_vm4 = vmmov %vm4001_vm0 }
 0x430   : > { %v2595_v46 = vpop.permute.xlu0 %2594  ;;  %v2632_v59 = vmul.f32 0.25, %v2628_v55  ;;  %v2629_v6 = vsel %vm3614_vm11, %v2625_v40, %v2583_v29 }
 0x431   : > { %v3824_v48 = vadd.f32 %v2631_v44, %v2587_v43  ;;  %v2599_v50 = vsel %vm3991_vm3, %v2593_v36, %v2595_v46  ;;  %v2597_v57 = vpop.permute.xlu1 %2596  ;;  %v2633_v31 = vmul.f32 0.25, %v2629_v6 }
 0x432   : > { %v2604_v53 = vsel %vm3572_vm15, %v2599_v50, %v2581_v27  ;;  %v2601_v2 = vsel %vm3993_vm10, %v2597_v57, %v2591_v34  ;;  %v2636_v63 = vadd.f32 %v2632_v59, %v2588_v54  ;;  %vm3994_vm15 = vmmov %vm3991_vm3  ;;  %v2638_v50 = vmul.f32 0.75, %v3846_v51 }
 0x433   : > { %v2608_v56 = vmul.f32 0.25, %v2604_v53  ;;  %2658 = vrot.lane.b32.xlu1 %v3824_v48, %s3226_s18  ;;  %v2602_v7 = vsel %vm3560_vm13, %v2601_v2, %v2510_v25  ;;  %v2598_v8 = vsel %vm3994_vm15, %v2595_v46, %v2597_v57  ;;  %v2637_v1 = vadd.f32 %v2633_v31, %v2589_v10  ;;  %vm4006_vm3 = vmmov %vm4001_vm0 }
 0x434   : > { %v2606_v9 = vmul.f32 0.25, %v2602_v7  ;;  %v2605_v30 = vsel %vm3566_vm14, %v2598_v8, %v2583_v29  ;;  %vm3995_vm13 = vcmp.lt.s32.totalorder %v3503_v20, 16  ;;  %vm3996_vm14 = vcmp.ge.s32.totalorder %v3515_v28, 1  ;;  %vm4008_vm10 = vmmov %vm4002_vm2 }
 0x435   : > { %v3836_v61 = vadd.f32 %v2608_v56, %v2588_v54  ;;  %v2609_v47 = vmul.f32 0.25, %v2605_v30  ;;  %v2640_v14 = vmul.f32 0.75, %v3824_v48  ;;  %vm3997_vm11 = vmmov %vm3995_vm13  ;;  %v2641_v29 = vmul.f32 0.75, %v2636_v63 }
 0x436   : > { %v2610_v62 = vadd.f32 %v2606_v9, %v2586_v35  ;;  %vm3998_vm1 = vmmov %vm3997_vm11 }
 0x437   : > { %2646 = vrot.lane.b32.xlu0 %v3836_v61, %s3226_s18  ;;  %2684 = vrot.lane.b32.xlu1 %v3824_v48, %s3232_s12  ;;  %v2613_v5 = vadd.f32 %v2609_v47, %v2589_v10  ;;  %v2639_v17 = vmul.f32 0.75, %v3836_v61  ;;  %vm4003_vm12 = vmmov %vm3998_vm1 }
 0x438   : > { %vm4005_vm9 = vmmov %vm3996_vm14 }
 0x43b   : > { %2644 = vrot.lane.b32.xlu1 %v3846_v51, %s3226_s18  ;;  %2660 = vrot.lane.b32.xlu0 %v2636_v63, %s3226_s18 }
 0x43f   : > { %2670 = vrot.lane.b32.xlu1 %v3846_v51, %s3232_s12  ;;  %2686 = vrot.lane.b32.xlu0 %v2636_v63, %s3232_s12 }
 0x443   : > { %2642 = vrot.lane.b32.xlu0 %v2610_v62, %s3226_s18  ;;  %2688 = vrot.lane.b32.xlu1 %v2637_v1, %s3232_s12 }
 0x447   : > { %2672 = vrot.lane.b32.xlu0 %v3836_v61, %s3232_s12  ;;  %2674 = vrot.lane.b32.xlu1 %v2613_v5, %s3232_s12  ;;  %s3877_s12 = scalar_lea.vmem %s3939_s8, %s2976_s21 }
 0x49e   : > { %v2657_v49 = vpop.permute.xlu0 %2656 }
 0x4a5   : > { %v2659_v12 = vpop.permute.xlu1 %2658 }
 0x4a6   : > { %v2663_v3 = vsel %vm3995_vm13, %v2657_v49, %v2659_v12 }
 0x4a7   : > { %v2664_v13 = vsel %vm3996_vm14, %v2663_v3, %v3824_v48 }
 0x4a8   : > { %v2666_v4 = vmul.f32 0.25, %v2664_v13 }
 0x4a9   : > { %v2647_v16 = vpop.permute.xlu0 %2646  ;;  %v2685_v19 = vpop.permute.xlu1 %2684 }
 0x4aa   : > { %v2668_v21 = vadd.f32 %v2666_v4, %v2640_v14 }
 0x4ac   : > { %v2702_v22 = vrot.slane %v2668_v21, 4 }
 0x4ad   : > { %v2661_v23 = vpop.permute.xlu0 %2660  ;;  %v2645_v24 = vpop.permute.xlu1 %2644 }
 0x4ae   : > { %2706 = vst [vmem:[%s3877_s12] sm:$0xf0] %v2702_v22  ;;  %v2662_v0 = vsel %vm3997_vm11, %v2659_v12, %v2661_v23  ;;  %v2648_v25 = vsel %vm3998_vm1, %v2645_v24, %v2647_v16 }
 0x4af   : > { %v2665_v26 = vsel %vm3999_vm5, %v2662_v0, %v2636_v63  ;;  %v2651_v27 = vsel %vm4000_vm6, %v2648_v25, %v3836_v61 }
 0x4b0   : > { %v2667_v32 = vmul.f32 0.25, %v2665_v26  ;;  %v2653_v11 = vmul.f32 0.25, %v2651_v27 }
 0x4b1   : > { %v2687_v18 = vpop.permute.xlu0 %2686  ;;  %v2671_v15 = vpop.permute.xlu1 %2670 }
 0x4b2   : > { %v2669_v34 = vadd.f32 %v2667_v32, %v2641_v29  ;;  %v2655_v35 = vadd.f32 %v2653_v11, %v2639_v17  ;;  %v2691_v36 = vsel %vm4001_vm0, %v2685_v19, %v2687_v18 }
 0x4b3   : > { %v2692_v37 = vsel %vm4002_vm2, %v2691_v36, %v3824_v48 }
 0x4b4   : > { %v2703_v38 = vrot.slane %v2669_v34, 4  ;;  %2699 = vst [vmem:[%s3877_s12 + $0x8] sm:$0xf] %v2655_v35  ;;  %v2694_v39 = vmul.f32 0.25, %v2692_v37 }
 0x4b5   : > { %v2643_v41 = vpop.permute.xlu0 %2642  ;;  %v2689_v42 = vpop.permute.xlu1 %2688 }
 0x4b6   : > { %2707 = vst [vmem:[%s3877_s12 + $0x8] sm:$0xf0] %v2703_v38  ;;  %v2696_v43 = vadd.f32 %v2694_v39, %v2640_v14  ;;  %v2649_v60 = vsel %vm4003_vm12, %v2643_v41, %v2645_v24  ;;  %v2690_v44 = vsel %vm4004_vm8, %v2687_v18, %v2689_v42 }
 0x4b7   : > { %v2650_v45 = vsel %vm4005_vm9, %v2649_v60, %v3846_v51  ;;  %v2693_v46 = vsel %vm545_vm7, %v2690_v44, %v2636_v63 }
 0x4b8   : > { %v2712_v48 = vrot.slane %v2696_v43, 4  ;;  %v2652_v52 = vmul.f32 0.25, %v2650_v45  ;;  %v2695_v55 = vmul.f32 0.25, %v2693_v46 }
 0x4b9   : > { %v2673_v53 = vpop.permute.xlu0 %2672  ;;  %v2675_v54 = vpop.permute.xlu1 %2674 }
 0x4ba   : > { %2716 = vst [vmem:[%s3877_s12 + $0x10] sm:$0xf0] %v2712_v48  ;;  %v2654_v56 = vadd.f32 %v2652_v52, %v2638_v50  ;;  %v2697_v57 = vadd.f32 %v2695_v55, %v2641_v29  ;;  %v2677_v58 = vsel %vm4006_vm3, %v2671_v15, %v2673_v53  ;;  %v2676_v59 = vsel %vm4007_vm4, %v2673_v53, %v2675_v54 }
 0x4bb   : > { %v2678_v40 = vsel %vm4008_vm10, %v2677_v58, %v3846_v51  ;;  %v2679_v2 = vsel %vm545_vm7, %v2676_v59, %v3836_v61 }
 0x4bc   : > { %2698 = vst [vmem:[%s3877_s12] sm:$0xf] %v2654_v56  ;;  %v2713_v63 = vrot.slane %v2697_v57, 4  ;;  %v2680_v6 = vmul.f32 0.25, %v2678_v40  ;;  %v2681_v7 = vmul.f32 0.25, %v2679_v2 }
 0x4be   : > { %2717 = vst [vmem:[%s3877_s12 + $0x18] sm:$0xf0] %v2713_v63  ;;  %v2682_v8 = vadd.f32 %v2680_v6, %v2638_v50  ;;  %v2683_v31 = vadd.f32 %v2681_v7, %v2639_v17 }
 0x4c0   : > { %2708 = vst [vmem:[%s3877_s12 + $0x10] sm:$0xf] %v2682_v8  ;;  %2709 = vst [vmem:[%s3877_s12 + $0x18] sm:$0xf] %v2683_v31 }
 0x4c1 PF: > { %s21_s29 = sadd.s32 1, %s3219_s29   ;;  %s4009_s27 = smov %s3215_s28 }
 0x4c2   : > { %p18_p8 = scmp.ge.s32.totalorder %s21_s29, 4   ;;  %s4010_s28 = smov %s4012_s13 }
 0x4c4   :  { %20 = sbr.rel (!%p18_p8) target bundleno = 4 (0x4), region = 114 }
 0x4cb   :  { %2748 = vsyncpa [#allocation3], 1 }
 0x4cc   :  { %2750 = vsyncpa [#allocation3 + $0x1], 1 }
 0x4cd   :  { %2751 = vsyncpa [#allocation7], 1 }
 0x4ce   :  { %2752 = vsyncpa [#allocation4], 1 }
 0x4cf   :  { %2754 = vsyncpa [#allocation4 + $0x1], 1 }

// kernel: upsample_forward.3
= control target key start
LH: loop header
LB: loop body
LE: loop exit
PB: predicated region body
PF: predicated region fallthrough
CT: control target
= control target key end

     0   :  { %13 = vsyncpa [#allocation4], 0  ;;  %s9328_s0 = inlined_call_operand.hbm [shape: f32[2], index: 0, kind: input, shape index: {}]   ;;  %s9329_s1 = inlined_call_operand.vmem [shape: f32[2,4,1024], index: 1, kind: input, shape index: {}, may-alias: {1,2,3}]   ;;  %s9330_s2 = inlined_call_operand.vmem [shape: f32[2,4,1024], index: 2, kind: input, shape index: {}, may-alias: {1,2,3}]   ;;  %s9331_s3 = inlined_call_operand.vmem [shape: f32[2,4,1024], index: 3, kind: input, shape index: {}, may-alias: {1,2,3}]   ;;  %s9332_s4 = inlined_call_operand.hbm [shape: f32[4,4], index: 4, kind: input, shape index: {}]   ;;  %s9333_s5 = inlined_call_operand.vmem [shape: f32[9,4,4], index: 5, kind: input, shape index: {}]   ;;  %s9334_s6 = inlined_call_operand.hbm [shape: f32[2,4], index: 6, kind: input, shape index: {}]   ;;  %s9335_s7 = inlined_call_operand.hbm [shape: f32[2,4], index: 7, kind: input, shape index: {}]   ;;  %s9336_s8 = inlined_call_operand.vmem [shape: f32[2,8,1024], index: 8, kind: output, shape index: {}]  }
   0x1   :  { %14 = vsyncpa [#allocation3], 0 }
   0x2   :  { %15 = vsyncpa [#allocation7], 0  ;;  %s7112_s27 = smov 0   ;;  %s7114_s28 = smov 0  }
   0x3   :  { %s7116_s29 = smov 0  }
   0x4 LB: > { %s7054_s30 = smov [#allocation6]   ;;  %s6529_s10 = sadd.s32 4294967295, %s7052_s29   ;;  %s7052_s29 = sphi %s7116_s29, %s21_s29   ;;  %s7048_s28 = sphi %s7114_s28, %s9933_s28   ;;  %s7044_s27 = sphi %s7112_s27, %s9932_s27  }
   0x5   : > { %s307_s9 = sshll.u32 %s7054_s30, 4  ;;  %p6531_p0 = scmp.ge.s32.totalorder %s7052_s29, 1  ;;  %s308_s9 = int_to_ptr.vmem [resolvable:$true] %s307_s9 }
   0x6   : > { %p271_p1 = scmp.lt.s32.totalorder %s7052_s29, 3  ;;  %p7130_p2 = scmp.eq.s32.totalorder %s6529_s10, 0 }
   0x7   : > { %s33_s13 = sadd.s32 1, %s7048_s28  ;;  %s7055_s16 = smov [#allocation5]  }
   0x8   : > { %s9429_s11 = scalar_select %p7130_p2, 1, 0 }
   0x9   : > { %p7134_p3 = pnand %p6531_p0, %p271_p1  ;;  %p7147_p6 = scmp.ge.s32.totalorder %s33_s13, 2 }
   0xa   : > { %s7151_s17 = sshll.u32 %s7055_s16, 4  ;;  %s6921_s20 = scalar_lea.hbm %s9334_s6, 32  ;;  %s294_s17 = int_to_ptr.vmem [resolvable:$true] %s7151_s17 }
   0xb   : > { %s9430_s12 = scalar_select %p7134_p3, 1, 0 }
   0xc   : > { %p6853_p4 = pneg %p7134_p3  ;;  %p6922_p7 = scmp.ne.s32.totalorder %s9334_s6, %s6921_s20 }
   0xd   : > { %s9432_s15 = scalar_select %p7147_p6, 1, 0 }
   0xe   : > { %p7143_p5 = pnand %p7130_p2, %p6853_p4  ;;  %p6928_p11 = scmp.lt.u32.totalorder %s6921_s20, %s9334_s6 }
  0x10   : > { %p7161_p8 = pneg %p7143_p5 }
  0x12   : > { %p6924_p9 = pnand %p7161_p8, %p6922_p7 }
  0x14   : > { %p6925_p10 = pneg %p6924_p9 }
  0x16   : > { %p6930_p12 = pnand %p6928_p11, %p6925_p10 }
  0x18   : > { %6933 = shalt.err (!%p6930_p12)
}
  0x19   : > { %s6934_s26 = scalar_lea.vmem %s308_s9, 32  ;;  %p6942_p4 = scmp.lt.s32.totalorder %s308_s9, %s308_s9 }
  0x1a   : > { %p6935_p13 = scmp.ne.s32.totalorder %s308_s9, %s6934_s26  ;;  %p6943_p2 = scmp.lt.s32.totalorder %s6934_s26, %s6934_s26 }
  0x1c   : > { %p6937_p0 = pnand %p6935_p13, %p7161_p8  ;;  %p6944_p3 = por %p6943_p2, %p6942_p4 }
  0x1e   : > { %p6938_p1 = pneg %p6937_p0 }
  0x20   : > { %p6945_p6 = pnand %p6944_p3, %p6938_p1 }
  0x22   : > { %6948 = shalt.err (!%p6945_p6)
}
  0x23   : > { %6862 = dma.hbm_to_vmem [thread:$0]  (!%p7143_p5), %s9334_s6, 32, %s308_s9, [#allocation7]  }
  0x24   : > { %p9434_p7 = scmp.ne.s32.totalorder %s9432_s15, 0  ;;  %s6949_s19 = scalar_lea.hbm %s9328_s0, 16 }
  0x25   : > { %p6950_p2 = scmp.ne.s32.totalorder %s9328_s0, %s6949_s19  ;;  %p6956_p9 = scmp.lt.u32.totalorder %s6949_s19, %s9328_s0 }
  0x26   : > { %s9935_s13 = smov (%p9434_p7, %s33_s13), 0 }
  0x27   : > { %p6952_p3 = pnand %p6950_p2, %p7161_p8 }
  0x29   : > { %p6953_p6 = pneg %p6952_p3 }
  0x2b   : > { %p6958_p10 = pnand %p6956_p9, %p6953_p6 }
  0x2d   : > { %6961 = shalt.err (!%p6958_p10)
}
  0x2e   : > { %s7056_s9 = smov [#allocation2]   ;;  %s7057_s26 = smov [#allocation8]  }
  0x2f   : > { %6856 = dma.hbm_to_smem (!%p7143_p5), %s9328_s0, 16, %s7056_s9, [#allocation4]  }
  0x30   : > { %s318_s30 = sshll.u32 %s7057_s26, 4  ;;  %s6962_s18 = scalar_lea.hbm %s9332_s4, 64  ;;  %s319_s30 = int_to_ptr.vmem [resolvable:$true] %s318_s30 }
  0x31   : > { %p6963_p11 = scmp.ne.s32.totalorder %s9332_s4, %s6962_s18  ;;  %p6969_p0 = scmp.lt.u32.totalorder %s6962_s18, %s9332_s4 }
  0x33   : > { %p6965_p12 = pnand %p6963_p11, %p7161_p8 }
  0x35   : > { %p6966_p13 = pneg %p6965_p12 }
  0x37   : > { %p6971_p1 = pnand %p6969_p0, %p6966_p13 }
  0x39   : > { %6974 = shalt.err (!%p6971_p1)
}
  0x3a   : > { %s6975_s24 = scalar_lea.vmem %s294_s17, 64  ;;  %p6983_p3 = scmp.lt.s32.totalorder %s294_s17, %s294_s17 }
  0x3b   : > { %p6976_p4 = scmp.ne.s32.totalorder %s294_s17, %s6975_s24  ;;  %p6984_p6 = scmp.lt.s32.totalorder %s6975_s24, %s6975_s24 }
  0x3d   : > { %p6978_p7 = pnand %p6976_p4, %p7161_p8  ;;  %p6985_p9 = por %p6984_p6, %p6983_p3 }
  0x3f   : > { %p6979_p2 = pneg %p6978_p7 }
  0x41   : > { %p6986_p10 = pnand %p6985_p9, %p6979_p2 }
  0x43   : > { %6989 = shalt.err (!%p6986_p10)
}
  0x44   : > { %6859 = dma.hbm_to_vmem [thread:$0]  (!%p7143_p5), %s9332_s4, 64, %s294_s17, [#allocation3]  }
  0x45   : > { %s6990_s10 = scalar_lea.hbm %s9335_s7, 32 }
  0x46   : > { %p6991_p11 = scmp.ne.s32.totalorder %s9335_s7, %s6990_s10  ;;  %p6997_p0 = scmp.lt.u32.totalorder %s6990_s10, %s9335_s7 }
  0x48   : > { %p6993_p12 = pnand %p6991_p11, %p7161_p8 }
  0x4a   : > { %p6994_p13 = pneg %p6993_p12 }
  0x4c   : > { %p6999_p1 = pnand %p6997_p0, %p6994_p13 }
  0x4e   : > { %7002 = shalt.err (!%p6999_p1)
}
  0x4f   : > { %s7003_s21 = scalar_lea.vmem %s319_s30, 32  ;;  %p7011_p3 = scmp.lt.s32.totalorder %s319_s30, %s319_s30 }
  0x50   : > { %p7004_p4 = scmp.ne.s32.totalorder %s319_s30, %s7003_s21  ;;  %p7012_p6 = scmp.lt.s32.totalorder %s7003_s21, %s7003_s21 }
  0x52   : > { %p7006_p7 = pnand %p7004_p4, %p7161_p8  ;;  %p7013_p9 = por %p7012_p6, %p7011_p3 }
  0x54   : > { %p7007_p2 = pneg %p7006_p7 }
  0x56   : > { %p7014_p10 = pnand %p7013_p9, %p7007_p2 }
  0x58   : > { %7017 = shalt.err (!%p7014_p10)
}
  0x59   : > { %6865 = dma.hbm_to_vmem [thread:$0]  (!%p7143_p5), %s9335_s7, 32, %s319_s30, [#allocation7]  }
  0x5a   : > { %p9435_p11 = scmp.ne.s32.totalorder %s9430_s12, 0 }
  0x5c   : > { %382 = sbr.rel (%p9435_p11) target bundleno = 1368 (0x558), region = 52 }
  0x63   : > { %p9436_p12 = scmp.ne.s32.totalorder %s9429_s11, 0 }
  0x65   : > { %7031 = dma.done.wait (%p9436_p12), [#allocation4], 16  }
  0x66   : > { %7033 = vsyncadd (%p9436_p12), [#allocation4], 4294967280 }
  0x67   : > { %7035 = dma.done.wait (%p9436_p12), [#allocation3], 64  }
  0x68   : > { %7037 = vsyncadd (%p9436_p12), [#allocation3], 4294967232 }
  0x69   : > { %7039 = dma.done.wait (%p9436_p12), [#allocation7], 64  }
  0x6a   : > { %7041 = vsyncadd (%p9436_p12), [#allocation7], 4294967232 }
  0x6b   : > { %400 = sfence }
  0x6c   : > { %p465_p5 = scmp.lt.s32.totalorder %s7044_s27, 1  ;;  %v9343_v0 = vmov 0.0   ;;  %vm9365_vm0 = vcmask 1043456   ;;  %v653_v1 = vld [vmem:[#allocation5] sm:$0xf]  ;;  %vm9363_vm1 = vcmask 31744   ;;  %v530_v43 = vlaneseq }
  0x6d   : > { %745 = vmatprep.mubr.f32.mxu1 %v9343_v0  ;;  %887 = vmatprep.mubr.f32.mxu0 %v9343_v0  ;;  %s514_s16 = sld [smem:[#allocation2]]  ;;  %s7059_s18 = smov 1  }
  0x6e   : > { %s9937_s27 = smov (!%p465_p5, %s7044_s27), 1  ;;  %s7060_s20 = smov 32   ;;  %v7452_v44 = vand.u32 127, %v530_v43 }
  0x6f   : > { %s6741_s12 = sshll.u32 %s9937_s27, 5  ;;  %s7061_s19 = smov 33  }
  0x70   : > { %s7258_s30 = scalar_lea.vmem %s9330_s2, %s6741_s12  ;;  %s7265_s9 = scalar_lea.vmem %s9329_s1, %s6741_s12  ;;  %v7463_v47 = vadd.s32 128, %v7452_v44  ;;  %vm9346_vm12 = vcmp.lt.s32.totalorder %v7452_v44, 32  ;;  %v7519_v62 = vadd.s32 256, %v7452_v44  ;;  %v7522_v63 = vadd.s32 384, %v7452_v44 }
  0x71   : > { %v517_v2 = vld [vmem:[%s7258_s30] sm:$0xff]  ;;  %v520_v3 = vld [vmem:[%s7258_s30 + $0x18] sm:$0xff]  ;;  %v519_v4 = vld [vmem:[%s7258_s30 + $0x10] sm:$0xff]  ;;  %s6744_s15 = sadd.s32 28, %s6741_s12  ;;  %s7062_s21 = smov 31  }
  0x72   : > { %v7268_v5 = vcombine.high %v517_v2, %v517_v2  ;;  %6551 = vmatprep.subr.msk.mxu1 %vm9365_vm0, %v517_v2  ;;  %v516_v6 = vld [vmem:[%s7265_s9] sm:$0xf]  ;;  %6557 = vmatprep.subr.msk.mxu0 %vm9365_vm0, %v519_v4  ;;  %v518_v7 = vld [vmem:[%s7258_s30 + $0x8] sm:$0xff]  ;;  %s7277_s10 = scalar_lea.vmem %s9331_s3, %s6744_s15  ;;  %v7285_v10 = vcombine.high %v520_v3, %v520_v3  ;;  %v7291_v11 = vcombine.high %v519_v4, %v519_v4  ;;  %s7063_s17 = smov 127   ;;  %v542_v50 = vshra.s32 %v7463_v47, 5 }
  0x73   : > { %6552 = vmatpush1.msk.msra.mxu1 %vm9365_vm0, %v516_v6  ;;  %v7280_v8 = vcombine.high %v518_v7, %v518_v7  ;;  %v521_v9 = vld [vmem:[%s7277_s10] sm:$0xf]  ;;  %v7308_v12 = vstv %s514_s16  ;;  %s7064_s22 = smov 97   ;;  %s7065_s12 = smov 96   ;;  %v544_v4 = vshra.s32 %v7522_v63, 5 }
  0x74   : > { %9437 = vst [vmem:[#allocation12_spill] sm:$0xff] %v7268_v5  ;;  %6553 = vmatmul.mubr.msk.f32.vlgmr.msra.gmra.mrb[0].mxu1 %vm9363_vm1, %v653_v1  ;;  %6554 = vmatprep.subr.msk.mxu1 %vm9365_vm0, %v518_v7  ;;  %9439 = vst [vmem:[#allocation14_spill] sm:$0xff] %v7285_v10  ;;  %v7482_v53 = vadd.s32 4294967292, %v542_v50  ;;  %s7066_s14 = smov 95  }
  0x75   : > { %9438 = vst [vmem:[#allocation13_spill] sm:$0xff] %v7280_v8  ;;  %6558 = vmatpush1.msk.msra.mxu0 %vm9365_vm0, %v7280_v8  ;;  %6555 = vmatpush1.msk.msra.mxu1 %vm9365_vm0, %v7268_v5  ;;  %9440 = vst [vmem:[#allocation15_spill] sm:$0xff] %v7291_v11  ;;  %v9466_v8 = vmov 0 }
  0x76   : > { %6559 = vmatmul.mubr.msk.f32.vlgmr.msra.gmra.mrb[0].mxu0 %vm9363_vm1, %v653_v1  ;;  %816 = vmatprep.mubr.f32.mxu1 %v9343_v0  ;;  %9450 = vst [vmem:[#allocation25_spill] sm:$0xff] %v7482_v53  ;;  %vm9364_vm13 = vcmp.ge.s32.totalorder %v7482_v53, 1 }
  0x77   : > { %6563 = vmatprep.subr.msk.mxu0 %vm9365_vm0, %v521_v9  ;;  %1029 = vmatprep.mubr.f32.mxu0 %v9343_v0 }
  0x78   : > { %6556 = vmatmul.mubr.msk.f32.vlgmr.msra.gmra.mrb[2].mxu1 %vm9363_vm1, %v653_v1  ;;  %6564 = vmatpush1.msk.msra.mxu0 %vm9365_vm0, %v7285_v10 }
  0x79   : > { %6560 = vmatprep.subr.msk.mxu1 %vm9365_vm0, %v520_v3  ;;  %958 = vmatprep.mubr.f32.mxu1 %v9343_v0  ;;  %v543_v3 = vshra.s32 %v7519_v62, 5 }
  0x7a   : > { %6565 = vmatmul.mubr.msk.f32.vlgmr.msra.gmra.mrb[2].mxu0 %vm9363_vm1, %v653_v1  ;;  %6561 = vmatpush1.msk.msra.mxu1 %vm9365_vm0, %v7291_v11 }
  0x7b   : > { %1360 = vmatprep.mubr.f32.mxu0 %v9343_v0  ;;  %v7540_v9 = vadd.s32 4294967292, %v543_v3 }
  0x7c   : > { %6562 = vmatmul.mubr.msk.f32.vlgmr.msra.gmra.mrb[4].mxu1 %vm9363_vm1, %v653_v1 }
  0x7d   : > { %1289 = vmatprep.mubr.f32.mxu1 %v9343_v0  ;;  %vm9340_vm14 = vcmp.ge.s32.totalorder %v7540_v9, 1 }
 0x147   : > { %v747_v13 = vpop.f32.mrb[0].mxu1 }
 0x148   : > { %vm1036_vm2 = vcmp.ge.f32.partialorder %v747_v13, 0.0  ;;  %v1047_v14 = vmul.f32 %v7308_v12, %v747_v13  ;;  %v749_v15 = vpop.f32.mrb[1].mxu1 }
 0x149   : > { %v889_v16 = vpop.f32.mrb[0].mxu0  ;;  %v1048_v24 = vmul.f32 %v7308_v12, %v749_v15  ;;  %vm1037_vm4 = vcmp.ge.f32.partialorder %v749_v15, 0.0 }
 0x14a   : > { %v7311_v17 = vsel %vm1036_vm2, %v747_v13, %v1047_v14  ;;  %vm1040_vm3 = vcmp.ge.f32.partialorder %v889_v16, 0.0  ;;  %v1051_v18 = vmul.f32 %v7308_v12, %v889_v16  ;;  %v891_v19 = vpop.f32.mrb[1].mxu0 }
 0x14b   : > { %9441 = vst [vmem:[#allocation16_spill] sm:$0xff] %v7311_v17  ;;  %2431 = vrot.lane.b32.xlu1 %v7311_v17, %s7059_s18  ;;  %1131 = vrot.lane.b32.xlu0 %v7311_v17, %s7060_s20  ;;  %v818_v20 = vpop.f32.mrb[2].mxu1  ;;  %v7325_v28 = vsel %vm1037_vm4, %v749_v15, %v1048_v24  ;;  %v1052_v29 = vmul.f32 %v7308_v12, %v891_v19  ;;  %vm1041_vm5 = vcmp.ge.f32.partialorder %v891_v19, 0.0  ;;  %v7549_v15 = vadd.s32 640, %v7452_v44 }
 0x14c   : > { %v7318_v21 = vsel %vm1040_vm3, %v889_v16, %v1051_v18  ;;  %v820_v22 = vpop.f32.mrb[3].mxu1  ;;  %v1049_v33 = vmul.f32 %v7308_v12, %v818_v20  ;;  %vm1038_vm7 = vcmp.ge.f32.partialorder %v818_v20, 0.0  ;;  %v7552_v16 = vadd.s32 512, %v7452_v44 }
 0x14d   : > { %9442 = vst [vmem:[#allocation17_spill] sm:$0xff] %v7318_v21  ;;  %v1031_v23 = vpop.f32.mrb[2].mxu0  ;;  %v7340_v30 = vsel %vm1041_vm5, %v891_v19, %v1052_v29  ;;  %v1050_v31 = vmul.f32 %v7308_v12, %v820_v22  ;;  %vm1039_vm6 = vcmp.ge.f32.partialorder %v820_v22, 0.0  ;;  %v7559_v18 = vadd.s32 1152, %v7452_v44 }
 0x14e   : > { %v1033_v25 = vpop.f32.mrb[3].mxu0  ;;  %9443 = vst [vmem:[#allocation18_spill] sm:$0xff] %v7340_v30  ;;  %v7362_v34 = vsel %vm1038_vm7, %v818_v20, %v1049_v33  ;;  %v1055_v35 = vmul.f32 %v7308_v12, %v1031_v23  ;;  %vm1044_vm8 = vcmp.ge.f32.partialorder %v1031_v23, 0.0  ;;  %v541_v19 = vshra.s32 %v7452_v44, 5 }
 0x14f   : > { %1139 = vrot.lane.b32.xlu1 %v7318_v21, %s7060_s20  ;;  %1068 = vrot.lane.b32.xlu0 %v7311_v17, %s7061_s19  ;;  %v960_v26 = vpop.f32.mrb[4].mxu1  ;;  %v7351_v32 = vsel %vm1039_vm6, %v820_v22, %v1050_v31  ;;  %9445 = vst [vmem:[#allocation20_spill] sm:$0xff] %v7362_v34  ;;  %v1056_v36 = vmul.f32 %v7308_v12, %v1033_v25  ;;  %vm1045_vm9 = vcmp.ge.f32.partialorder %v1033_v25, 0.0  ;;  %v545_v24 = vshra.s32 %v7552_v16, 5 }
 0x150   : > { %v962_v27 = vpop.f32.mrb[5].mxu1  ;;  %9444 = vst [vmem:[#allocation19_spill] sm:$0xff] %v7351_v32  ;;  %v7374_v37 = vsel %vm1044_vm8, %v1031_v23, %v1055_v35  ;;  %v1053_v41 = vmul.f32 %v7308_v12, %v960_v26  ;;  %vm1042_vm11 = vcmp.ge.f32.partialorder %v960_v26, 0.0  ;;  %v546_v23 = vshra.s32 %v7549_v15, 5 }
 0x151   : > { %9446 = vst [vmem:[#allocation21_spill] sm:$0xff] %v7374_v37  ;;  %v7376_v38 = vsel %vm1045_vm9, %v1033_v25, %v1056_v36  ;;  %v1054_v39 = vmul.f32 %v7308_v12, %v962_v27  ;;  %vm1043_vm10 = vcmp.ge.f32.partialorder %v962_v27, 0.0  ;;  %v7542_v12 = vadd.s32 4294967292, %v544_v4 }
 0x152   : > { %9447 = vst [vmem:[#allocation22_spill] sm:$0xff] %v7376_v38  ;;  %v7398_v42 = vsel %vm1042_vm11, %v960_v26, %v1053_v41  ;;  %v550_v31 = vshra.s32 %v7559_v18, 5  ;;  %v7582_v33 = vadd.s32 4294967292, %v541_v19  ;;  %v7585_v35 = vadd.s32 1024, %v7452_v44  ;;  %v7595_v41 = vld [vmem:[%s9333_s5 + $0x4] sm:$0xf] }
 0x153   : > { %1970 = vrot.lane.b32.xlu0 %v7311_v17, %s7062_s21  ;;  %1070 = vrot.lane.b32.xlu1 %v7325_v28, %s7061_s19  ;;  %v7387_v40 = vsel %vm1043_vm10, %v962_v27, %v1054_v39  ;;  %9449 = vst [vmem:[#allocation24_spill] sm:$0xff] %v7398_v42  ;;  %vm9342_vm15 = vcmp.ge.s32.totalorder %v7542_v12, 1  ;;  %v7597_v43 = vadd.s32 4294967292, %v546_v23  ;;  %v7599_v50 = vadd.s32 4294967292, %v545_v24 }
 0x154   : > { %9448 = vst [vmem:[#allocation23_spill] sm:$0xff] %v7387_v40  ;;  %9451 = vst [vmem:[#allocation26_spill] sm:$0xff] %v7582_v33  ;;  %vm9350_vm2 = vcmp.ge.s32.totalorder %v7582_v33, 1  ;;  %v552_v23 = vand.u32 31, %v7463_v47  ;;  %vm9361_vm6 = vcmp.lt.s32.totalorder %v7452_v44, 33  ;;  %v9465_v11 = vand.u32 31, %v7559_v18 }
 0x155   : > { %9452 = vst [vmem:[#allocation27_spill] sm:$0xff] %v7597_v43  ;;  %vm9362_vm3 = vcmp.ge.s32.totalorder %v7597_v43, 1  ;;  %vm9356_vm4 = vcmp.ge.s32.totalorder %v7599_v50, 1 }
 0x156   : > { %vm7649_vm7 = vcmp.ge.s32.totalorder %v552_v23, 1 }
 0x157   : > { %1076 = vrot.lane.b32.xlu1 %v7318_v21, %s7061_s19  ;;  %1133 = vrot.lane.b32.xlu0 %v7325_v28, %s7060_s20  ;;  %vm7676_vm9 = vmand %vm9364_vm13, %vm7649_vm7 }
 0x15b   : > { %1972 = vrot.lane.b32.xlu1 %v7325_v28, %s7062_s21  ;;  %2433 = vrot.lane.b32.xlu0 %v7325_v28, %s7059_s18 }
 0x15f   : > { %1978 = vrot.lane.b32.xlu1 %v7318_v21, %s7062_s21  ;;  %1141 = vrot.lane.b32.xlu0 %v7340_v30, %s7060_s20 }
 0x163   : > { %2439 = vrot.lane.b32.xlu1 %v7318_v21, %s7059_s18  ;;  %1078 = vrot.lane.b32.xlu0 %v7340_v30, %s7061_s19 }
 0x167   : > { %1980 = vrot.lane.b32.xlu0 %v7340_v30, %s7062_s21  ;;  %1137 = vrot.lane.b32.xlu1 %v7351_v32, %s7060_s20 }
 0x16b   : > { %2441 = vrot.lane.b32.xlu0 %v7340_v30, %s7059_s18  ;;  %1074 = vrot.lane.b32.xlu1 %v7351_v32, %s7061_s19 }
 0x16f   : > { %1135 = vrot.lane.b32.xlu0 %v7362_v34, %s7060_s20  ;;  %1976 = vrot.lane.b32.xlu1 %v7351_v32, %s7062_s21 }
 0x173   : > { %1072 = vrot.lane.b32.xlu0 %v7362_v34, %s7061_s19  ;;  %2437 = vrot.lane.b32.xlu1 %v7351_v32, %s7059_s18 }
 0x177   : > { %1147 = vrot.lane.b32.xlu0 %v7374_v37, %s7060_s20  ;;  %1149 = vrot.lane.b32.xlu1 %v7376_v38, %s7060_s20 }
 0x17b   : > { %1084 = vrot.lane.b32.xlu0 %v7374_v37, %s7061_s19  ;;  %2449 = vrot.lane.b32.xlu1 %v7376_v38, %s7059_s18 }
 0x17f   : > { %1986 = vrot.lane.b32.xlu0 %v7374_v37, %s7062_s21  ;;  %1145 = vrot.lane.b32.xlu1 %v7387_v40, %s7060_s20 }
 0x183   : > { %1086 = vrot.lane.b32.xlu0 %v7376_v38, %s7061_s19  ;;  %2447 = vrot.lane.b32.xlu1 %v7374_v37, %s7059_s18 }
 0x187   : > { %1988 = vrot.lane.b32.xlu0 %v7376_v38, %s7062_s21  ;;  %1080 = vrot.lane.b32.xlu1 %v7398_v42, %s7061_s19 }
 0x18b   : > { %1143 = vrot.lane.b32.xlu0 %v7398_v42, %s7060_s20  ;;  %1082 = vrot.lane.b32.xlu1 %v7387_v40, %s7061_s19 }
 0x18f   : > { %1974 = vrot.lane.b32.xlu0 %v7362_v34, %s7062_s21  ;;  %1982 = vrot.lane.b32.xlu1 %v7398_v42, %s7062_s21 }
 0x193   : > { %2435 = vrot.lane.b32.xlu0 %v7362_v34, %s7059_s18  ;;  %3294 = vrot.lane.b32.xlu1 %v7325_v28, %s7063_s17 }
 0x197   : > { %3296 = vrot.lane.b32.xlu0 %v7362_v34, %s7063_s17  ;;  %1984 = vrot.lane.b32.xlu1 %v7387_v40, %s7062_s21 }
 0x19b   : > { %2443 = vrot.lane.b32.xlu0 %v7398_v42, %s7059_s18  ;;  %3292 = vrot.lane.b32.xlu1 %v7311_v17, %s7063_s17 }
 0x19f   : > { %3304 = vrot.lane.b32.xlu0 %v7398_v42, %s7063_s17  ;;  %3302 = vrot.lane.b32.xlu1 %v7340_v30, %s7063_s17 }
 0x1a3   : > { %3310 = vrot.lane.b32.xlu0 %v7376_v38, %s7063_s17  ;;  %3300 = vrot.lane.b32.xlu1 %v7318_v21, %s7063_s17 }
 0x1a7   : > { %2445 = vrot.lane.b32.xlu0 %v7387_v40, %s7059_s18  ;;  %3308 = vrot.lane.b32.xlu1 %v7374_v37, %s7063_s17 }
 0x1ab   : > { %3755 = vrot.lane.b32.xlu0 %v7325_v28, %s7064_s22  ;;  %3757 = vrot.lane.b32.xlu1 %v7362_v34, %s7064_s22 }
 0x1af   : > { %3753 = vrot.lane.b32.xlu0 %v7311_v17, %s7064_s22  ;;  %3298 = vrot.lane.b32.xlu1 %v7351_v32, %s7063_s17 }
 0x1b3   : > { %3763 = vrot.lane.b32.xlu0 %v7340_v30, %s7064_s22  ;;  %3765 = vrot.lane.b32.xlu1 %v7398_v42, %s7064_s22 }
 0x1b7   : > { %3761 = vrot.lane.b32.xlu0 %v7318_v21, %s7064_s22  ;;  %3769 = vrot.lane.b32.xlu1 %v7374_v37, %s7064_s22 }
 0x1bb   : > { %3771 = vrot.lane.b32.xlu0 %v7376_v38, %s7064_s22  ;;  %4216 = vrot.lane.b32.xlu1 %v7325_v28, %s7065_s12 }
 0x1bd   : > { %v7458_v45 = vpop.permute.xlu1 %2431  ;;  %v7460_v46 = vpop.permute.xlu0 %1131 }
 0x1bf   : > { %3759 = vrot.lane.b32.xlu0 %v7351_v32, %s7064_s22  ;;  %4214 = vrot.lane.b32.xlu1 %v7311_v17, %s7065_s12 }
 0x1c1   : > { %v7469_v48 = vpop.permute.xlu1 %1139  ;;  %v7471_v49 = vpop.permute.xlu0 %1068 }
 0x1c3   : > { %4218 = vrot.lane.b32.xlu0 %v7362_v34, %s7065_s12  ;;  %4224 = vrot.lane.b32.xlu1 %v7340_v30, %s7065_s12 }
 0x1c5   : > { %v7478_v51 = vpop.permute.xlu0 %1970  ;;  %v7480_v52 = vpop.permute.xlu1 %1070 }
 0x1c7   : > { %4226 = vrot.lane.b32.xlu0 %v7398_v42, %s7065_s12  ;;  %3306 = vrot.lane.b32.xlu1 %v7387_v40, %s7063_s17 }
 0x1c9   : > { %v7489_v54 = vpop.permute.xlu1 %1076  ;;  %v1134_v55 = vpop.permute.xlu0 %1133 }
 0x1ca   : > { %v1160_v56 = vsel %vm9346_vm12, %v7460_v46, %v1134_v55 }
 0x1cb   : > { %4220 = vrot.lane.b32.xlu0 %v7351_v32, %s7065_s12  ;;  %4222 = vrot.lane.b32.xlu1 %v7318_v21, %s7065_s12  ;;  %v1183_v57 = vsel %vm9364_vm13, %v1160_v56, 0.0  ;;  %v549_v56 = vshra.s32 %v7585_v35, 5 }
 0x1cc   : > { %6567 = vmatprep.subr.msk.mxu1 %vm9365_vm0, %v1183_v57 }
 0x1cd   : > { %v7502_v58 = vpop.permute.xlu1 %1972  ;;  %v7504_v59 = vpop.permute.xlu0 %2433 }
 0x1cf   : > { %4230 = vrot.lane.b32.xlu0 %v7374_v37, %s7065_s12  ;;  %4232 = vrot.lane.b32.xlu1 %v7376_v38, %s7065_s12 }
 0x1d1   : > { %v7510_v60 = vpop.permute.xlu1 %1978  ;;  %v7512_v61 = vpop.permute.xlu0 %1141 }
 0x1d2   : > { %v1156_v57 = vsel %vm9346_vm12, %v7469_v48, %v7512_v61 }
 0x1d3   : > { %3767 = vrot.lane.b32.xlu0 %v7387_v40, %s7064_s22  ;;  %4679 = vrot.lane.b32.xlu1 %v7362_v34, %s7066_s14  ;;  %v9375_v34 = vand.u32 31, %v7519_v62 }
 0x1d5   : > { %v7524_v1 = vpop.permute.xlu1 %2439  ;;  %v7526_v2 = vpop.permute.xlu0 %1078 }
 0x1d7   : > { %4677 = vrot.lane.b32.xlu0 %v7325_v28, %s7066_s14  ;;  %4228 = vrot.lane.b32.xlu1 %v7387_v40, %s7065_s12 }
 0x1d9   : > { %v7534_v6 = vpop.permute.xlu0 %1980  ;;  %v1138_v7 = vpop.permute.xlu1 %1137 }
 0x1da   : > { %v1157_v19 = vsel %vm9346_vm12, %v1138_v7, %v7469_v48  ;;  %v7633_v48 = vadd.s32 4294967292, %v549_v56  ;;  %v555_v56 = vand.u32 31, %v7552_v16 }
 0x1db   : > { %4675 = vrot.lane.b32.xlu0 %v7311_v17, %s7066_s14  ;;  %4681 = vrot.lane.b32.xlu1 %v7351_v32, %s7066_s14 }
 0x1dc   : > { %vm9370_vm8 = vcmp.ge.s32.totalorder %v7633_v48, 1  ;;  %vm7691_vm11 = vcmp.ge.s32.totalorder %v555_v56, 1 }
 0x1dd   : > { %v7544_v13 = vpop.permute.xlu0 %2441  ;;  %v7546_v14 = vpop.permute.xlu1 %1074 }
 0x1df   : > { %4683 = vrot.lane.b32.xlu0 %v7318_v21, %s7066_s14  ;;  %4685 = vrot.lane.b32.xlu1 %v7340_v30, %s7066_s14  ;;  %v9472_v21 = vmov 0.0  }
 0x1e1   : > { %v1136_v20 = vpop.permute.xlu0 %1135  ;;  %v7564_v22 = vpop.permute.xlu1 %1976 }
 0x1e2   : > { %v1158_v25 = vsel %vm9346_vm12, %v1136_v20, %v1138_v7  ;;  %v1159_v26 = vsel %vm9346_vm12, %v1134_v55, %v1136_v20  ;;  %v7607_v55 = vadd.s32 4294967292, %v550_v31  ;;  %v556_v31 = vand.u32 31, %v7549_v15 }
 0x1e3   : > { %v1184_v27 = vsel %vm9340_vm14, %v1159_v26, 0.0  ;;  %4687 = vrot.lane.b32.xlu0 %v7398_v42, %s7066_s14  ;;  %4689 = vrot.lane.b32.xlu1 %v7387_v40, %s7066_s14  ;;  %v1185_v29 = vsel %vm9342_vm15, %v1158_v25, 0.0  ;;  %v1187_v26 = vsel %vm9362_vm3, %v1156_v57, 0.0  ;;  %v551_v57 = vand.u32 31, %v7452_v44 }
 0x1e4   : > { %6570 = vmatprep.subr.msk.mxu0 %vm9365_vm0, %v1185_v29  ;;  %vm9360_vm5 = vcmp.ge.s32.totalorder %v7607_v55, 1  ;;  %vm7687_vm10 = vcmp.ge.s32.totalorder %v556_v31, 1 }
 0x1e5   : > { %v7587_v36 = vpop.permute.xlu0 %1072  ;;  %6571 = vmatpush1.msk.msra.mxu0 %vm9365_vm0, %v1184_v27  ;;  %v7590_v39 = vpop.permute.xlu1 %2437  ;;  %vm7695_vm14 = vcmp.ge.s32.totalorder %v551_v57, 1 }
 0x1e6   : > { %6572 = vmatmul.mubr.msk.f32.vlgmr.msra.gmra.mrb[4].mxu0 %vm9363_vm1, %v7595_v41  ;;  %vm7706_vm15 = vmand %vm9350_vm2, %vm7695_vm14 }
 0x1e7   : > { %4691 = vrot.lane.b32.xlu0 %v7374_v37, %s7066_s14  ;;  %4693 = vrot.lane.b32.xlu1 %v7376_v38, %s7066_s14  ;;  %v1094_v38 = vsel %vm9361_vm6, %v7546_v14, %v7489_v54  ;;  %v7757_v37 = vld [vmem:[%s9333_s5] sm:$0xf] }
 0x1e8   : > { %1502 = vmatprep.mubr.f32.mxu0 %v9343_v0 }
 0x1e9   : > { %v1148_v3 = vpop.permute.xlu0 %1147  ;;  %v1150_v4 = vpop.permute.xlu1 %1149 }
 0x1ea   : > { %v1161_v20 = vsel %vm9346_vm12, %v1150_v4, %v7460_v46  ;;  %v1152_v24 = vsel %vm9346_vm12, %v1148_v3, %v1150_v4  ;;  %v1186_v46 = vsel %vm9356_vm4, %v1157_v19, 0.0  ;;  %v7660_v19 = vadd.s32 896, %v7452_v44 }
 0x1eb   : > { %v1182_v25 = vsel %vm9350_vm2, %v1161_v20, 0.0  ;;  %v1191_v27 = vsel %vm9360_vm5, %v1152_v24, 0.0  ;;  %v1097_v20 = vsel %vm9361_vm6, %v7471_v49, %v7480_v52  ;;  %v9461_v4 = vmov 0  ;;  %vm7742_vm2 = vmand %vm9356_vm4, %vm7691_vm11 }
 0x1ec   : > { %6568 = vmatpush1.msk.msra.mxu1 %vm9365_vm0, %v1182_v25  ;;  %v7681_v25 = vadd.s32 768, %v7452_v44  ;;  %v9462_v4 = vsel %vm7695_vm14, 4294967295, %v9461_v4 }
 0x1ed   : > { %v7637_v7 = vpop.permute.xlu0 %1084  ;;  %6569 = vmatmul.mubr.msk.f32.vlgmr.msra.gmra.mrb[6].mxu1 %vm9363_vm1, %v7595_v41  ;;  %6573 = vmatprep.subr.msk.mxu1 %vm9365_vm0, %v1187_v26  ;;  %v7642_v47 = vpop.permute.xlu1 %2449 }
 0x1ee   : > { %6574 = vmatpush1.msk.msra.mxu1 %vm9365_vm0, %v1186_v46  ;;  %1431 = vmatprep.mubr.f32.mxu1 %v9343_v0  ;;  %v9457_v46 = vmov 0  ;;  %v547_v16 = vshra.s32 %v7681_v25, 5 }
 0x1ef   : > { %6579 = vmatprep.subr.msk.mxu1 %vm9365_vm0, %v1191_v27  ;;  %v9458_v46 = vsel %vm7687_vm10, 4294967295, %v9457_v46  ;;  %v9459_v27 = vmov 0 }
 0x1f0   : > { %v9460_v27 = vsel %vm7691_vm11, 4294967295, %v9459_v27  ;;  %vm9506_vm11 = vcmp.ge.s32.totalorder %v7542_v12, 1 }
 0x1f1   : > { %v7666_v24 = vpop.permute.xlu0 %1986  ;;  %6575 = vmatmul.mubr.msk.f32.vlgmr.msra.gmra.mrb[8].mxu1 %vm9363_vm1, %v7595_v41  ;;  %v7670_v15 = vpop.permute.xlu1 %1145 }
 0x1f2   : > { %v1153_v26 = vsel %vm9346_vm12, %v7670_v15, %v1148_v3  ;;  %1573 = vmatprep.mubr.f32.mxu1 %v9343_v0  ;;  %v1120_v0 = vsel %vm7676_vm9, %v1097_v20, 0.0  ;;  %vm7714_vm12 = vcmp.ge.s32.totalorder %v9465_v11, 1  ;;  %vm7732_vm9 = vmand %vm9362_vm3, %vm7687_vm10  ;;  %v1123_v3 = vsel %vm7742_vm2, %v1094_v38, 0.0 }
 0x1f3   : > { %v1190_v10 = vsel %vm9370_vm8, %v1153_v26, 0.0  ;;  %v9467_v8 = vsel %vm7714_vm12, 4294967295, %v9466_v8  ;;  %v548_v26 = vshra.s32 %v7660_v19, 5  ;;  %vm7768_vm4 = vmand %vm9360_vm5, %vm7714_vm12  ;;  %vm9374_vm2 = vcmp.lt.s32.totalorder %v7452_v44, 31 }
 0x1f4   : > { %6580 = vmatpush1.msk.msra.mxu1 %vm9365_vm0, %v1190_v10  ;;  %v1093_v10 = vsel %vm9361_vm6, %v7489_v54, %v7526_v2  ;;  %v9373_v54 = vand.u32 31, %v7522_v63  ;;  %vm7806_vm5 = vcmp.le.s32.totalorder %v556_v31, 30  ;;  %v9487_v31 = vmov 0 }
 0x1f5   : > { %v1087_v5 = vpop.permute.xlu0 %1086  ;;  %6581 = vmatmul.mubr.msk.f32.vlgmr.msra.gmra.mrb[10].mxu1 %vm9363_vm1, %v7595_v41  ;;  %6582 = vmatprep.subr.msk.mxu1 %vm9365_vm0, %v1120_v0  ;;  %v7726_v20 = vpop.permute.xlu1 %2447  ;;  %v7777_v32 = vadd.s32 4294967292, %v548_v26  ;;  %v9477_v26 = vand.u32 31, %v7585_v35  ;;  %vm9502_vm12 = vcmp.lt.s32.totalorder %v7452_v44, 33 }
 0x1f6   : > { %v1098_v42 = vsel %vm9361_vm6, %v1087_v5, %v7471_v49  ;;  %1677 = vmatprep.mubr.f32.mxu1 %v9472_v21  ;;  %v1089_v40 = vsel %vm9361_vm6, %v7637_v7, %v1087_v5  ;;  %v1124_v5 = vsel %vm7732_vm9, %v1093_v10, 0.0  ;;  %v9382_v10 = vand.u32 31, %v7660_v19 }
 0x1f7   : > { %v1119_v30 = vsel %vm7706_vm15, %v1098_v42, 0.0  ;;  %vm7779_vm15 = vcmp.le.s32.totalorder %v552_v23, 30  ;;  %v9475_v42 = vmov 0  ;;  %vm7796_vm9 = vcmp.ge.s32.totalorder %v9477_v26, 1 }
 0x1f8   : > { %6583 = vmatpush1.msk.msra.mxu1 %vm9365_vm0, %v1119_v30  ;;  %v9476_v42 = vsel %vm7779_vm15, 4294967295, %v9475_v42  ;;  %v7790_v30 = vadd.s32 4294967292, %v547_v16  ;;  %v9478_v23 = vmov 0  ;;  %v1128_v38 = vsel %vm7768_vm4, %v1089_v40, 0.0  ;;  %vm7815_vm6 = vmand %vm9364_vm13, %vm7779_vm15 }
 0x1f9   : > { %v7785_v17 = vpop.permute.xlu0 %1988  ;;  %6584 = vmatmul.mubr.msk.f32.vlgmr.msra.gmra.mrb[6].mxu1 %vm9363_vm1, %v7757_v37  ;;  %6588 = vmatprep.subr.msk.mxu1 %vm9365_vm0, %v1124_v5  ;;  %v7792_v11 = vpop.permute.xlu1 %1080  ;;  %v9479_v23 = vsel %vm7796_vm9, 4294967295, %v9478_v23  ;;  %v9480_v16 = vmov 0  ;;  %vm7821_vm3 = vcmp.ge.s32.totalorder %v9373_v54, 1  ;;  %v9485_v40 = vmov 0  ;;  %vm7838_vm13 = vmand %vm9370_vm8, %vm7796_vm9 }
 0x1fa   : > { %6589 = vmatpush1.msk.msra.mxu1 %vm9365_vm0, %v1123_v3  ;;  %1819 = vmatprep.mubr.f32.mxu1 %v9472_v21  ;;  %v9481_v16 = vsel %vm7806_vm5, 4294967295, %v9480_v16  ;;  %v9486_v40 = vsel %vm7821_vm3, 4294967295, %v9485_v40  ;;  %vm7825_vm4 = vcmp.le.s32.totalorder %v555_v56, 30  ;;  %vm7829_vm1 = vcmp.le.s32.totalorder %v551_v57, 30  ;;  %vm7888_vm10 = vmand %vm9506_vm11, %vm7821_vm3 }
 0x1fb   : > { %9482 = vst [vmem:[#allocation28_spill] sm:$0xff] %v9481_v16  ;;  %6594 = vmatprep.subr.msk.mxu1 %vm9365_vm0, %v1128_v38  ;;  %v9488_v31 = vsel %vm7825_vm4, 4294967295, %v9487_v31  ;;  %v9489_v49 = vmov 0  ;;  %v1999_v56 = vsel %vm9374_vm2, %v7478_v51, %v7502_v58  ;;  %vm7849_vm15 = vcmp.ge.s32.totalorder %v9375_v34, 1 }
 0x1fc   : > { %v9490_v49 = vsel %vm7829_vm1, 4294967295, %v9489_v49  ;;  %v9494_v57 = vmov 0  ;;  %vm9496_vm8 = vcmask 31744   ;;  %vm9497_vm0 = vcmp.ge.s32.totalorder %v7597_v43, 1 }
 0x1fd   : > { %9491 = vst [vmem:[#allocation29_spill] sm:$0xff] %v9490_v49  ;;  %v9495_v57 = vsel %vm7849_vm15, 4294967295, %v9494_v57  ;;  %v1144_v26 = vpop.permute.xlu0 %1143  ;;  %6590 = vmatmul.mubr.msk.f32.vlgmr.msra.gmra.mrb[8].mxu1 %vm9496_vm8, %v7757_v37  ;;  %v1083_v38 = vpop.permute.xlu1 %1082  ;;  %vm7860_vm9 = vmand %vm9497_vm0, %vm7806_vm5  ;;  %vm7866_vm2 = vcmp.ge.s32.totalorder %v9382_v10, 1  ;;  %v9500_v34 = vmov 0  ;;  %v1095_v5 = vsel %vm9502_vm12, %v7587_v36, %v7546_v14  ;;  %v8006_v14 = vld [vmem:[%s9333_s5 + $0x8] sm:$0xf] }
 0x1fe   : > { %v9501_v34 = vsel %vm7866_vm2, 4294967295, %v9500_v34  ;;  %vm9503_vm8 = vcmp.lt.s32.totalorder %v7452_v44, 32  ;;  %vm9505_vm5 = vmmov %vm9502_vm12  ;;  %1961 = vmatprep.mubr.f32.mxu1 %v9472_v21  ;;  %vm9509_vm12 = vcmp.ge.s32.totalorder %v7582_v33, 1  ;;  %vm9514_vm11 = vcmp.ge.s32.totalorder %v7777_v32, 1 }
 0x1ff   : > { %v1154_v53 = vsel %vm9503_vm8, %v1144_v26, %v7670_v15  ;;  %vm9504_vm0 = vmmov %vm9503_vm8  ;;  %v1090_v10 = vsel %vm9505_vm5, %v1083_v38, %v7637_v7  ;;  %vm9512_vm5 = vcmp.lt.s32.totalorder %v7452_v44, 31 }
 0x200   : > { %v1155_v43 = vsel %vm9504_vm0, %v7512_v61, %v1144_v26  ;;  %vm7896_vm8 = vmand %vm9509_vm12, %vm7829_vm1  ;;  %v2000_v7 = vsel %vm9512_vm5, %v7785_v17, %v7478_v51  ;;  %vm9513_vm0 = vcmp.ge.s32.totalorder %v7790_v30, 1  ;;  %v1127_v26 = vsel %vm7838_vm13, %v1090_v10, 0.0 }
 0x201   : > { %v1188_v15 = vsel %vm9513_vm0, %v1155_v43, 0.0  ;;  %v1189_v16 = vsel %vm9514_vm11, %v1154_v53, 0.0  ;;  %vm9515_vm12 = vmmov %vm9512_vm5  ;;  %vm9516_vm1 = vcmp.ge.s32.totalorder %v7540_v9, 1  ;;  %vm9519_vm13 = vcmp.lt.s32.totalorder %v7452_v44, 33  ;;  %v1975_v49 = vpop.permute.xlu0 %1974 }
 0x202   : > { %v1995_v33 = vsel %vm9515_vm12, %v7510_v60, %v7534_v6  ;;  %vm7918_vm3 = vmand %vm9516_vm1, %vm7849_vm15  ;;  %v1096_v43 = vsel %vm9519_vm13, %v7480_v52, %v7587_v36  ;;  %v9520_v53 = vand.u32 31, %v7681_v25  ;;  %v9521_v10 = vmov 0  ;;  %v7942_v36 = vpop.permute.xlu1 %1982 }
 0x203   : > { %vm9523_vm0 = vcmask 1043456   ;;  %vm9525_vm1 = vmmov %vm9519_vm13  ;;  %vm9527_vm15 = vcmask 31744   ;;  %v2022_v52 = vsel %vm7815_vm6, %v1999_v56, 0.0  ;;  %vm9528_vm13 = vcmp.ge.s32.totalorder %v7777_v32, 1 }
 0x204   : > { %vm7928_vm5 = vcmp.ge.s32.totalorder %v9520_v53, 1  ;;  %6576 = vmatprep.subr.msk.mxu0 %vm9523_vm0, %v1189_v16  ;;  %vm9524_vm11 = vmmov %vm9523_vm0  ;;  %v1091_v3 = vsel %vm9525_vm1, %v7792_v11, %v1083_v38  ;;  %v9531_v38 = vand.u32 31, %v7559_v18  ;;  %vm9534_vm6 = vcmp.ge.s32.totalorder %v7599_v50, 1 }
 0x205   : > { %v9522_v10 = vsel %vm7928_vm5, 4294967295, %v9521_v10  ;;  %6595 = vmatpush1.msk.msra.mxu1 %vm9524_vm11, %v1127_v26  ;;  %vm9526_vm12 = vmmov %vm9523_vm0  ;;  %v2021_v56 = vsel %vm7896_vm8, %v2000_v7, 0.0  ;;  %v1122_v18 = vsel %vm7888_vm10, %v1095_v5, 0.0  ;;  %v9539_v26 = vand.u32 31, %v7522_v63 }
 0x206   : > { %6577 = vmatpush1.msk.msra.mxu0 %vm9526_vm12, %v1188_v15  ;;  %6596 = vmatmul.mubr.msk.f32.vlgmr.msra.gmra.mrb[10].mxu1 %vm9527_vm15, %v7757_v37  ;;  %vm7948_vm0 = vmand %vm9528_vm13, %vm7866_vm2  ;;  %vm7954_vm11 = vcmp.le.s32.totalorder %v9531_v38, 30  ;;  %v9532_v15 = vmov 0  ;;  %v9540_v53 = vmov 0  ;;  %v1121_v7 = vsel %vm7918_vm3, %v1096_v43, 0.0 }
 0x207   : > { %v9533_v15 = vsel %vm7954_vm11, 4294967295, %v9532_v15  ;;  %vm7962_vm15 = vmand %vm9534_vm6, %vm7825_vm4  ;;  %vm7975_vm13 = vcmp.le.s32.totalorder %v9539_v26, 30  ;;  %vm9542_vm6 = vcmp.lt.s32.totalorder %v7452_v44, 31  ;;  %vm9543_vm8 = vcmp.ge.s32.totalorder %v7790_v30, 1  ;;  %2128 = vmatprep.mubr.f32.mxu1 %v9472_v21 }
 0x208   : > { %vm9537_vm1 = vmmov %vm9526_vm12  ;;  %vm9538_vm12 = vcmask 31744   ;;  %v9541_v53 = vsel %vm7975_vm13, 4294967295, %v9540_v53  ;;  %v1996_v61 = vsel %vm9542_vm6, %v7564_v22, %v7510_v60  ;;  %v9546_v63 = vand.u32 31, %v7519_v62 }
 0x209   : > { %6598 = vmatprep.subr.msk.mxu1 %vm9537_vm1, %v2022_v52  ;;  %6578 = vmatmul.mubr.msk.f32.vlgmr.msra.gmra.mrb[6].mxu0 %vm9538_vm12, %v7595_v41  ;;  %vm7989_vm1 = vmand %vm9543_vm8, %vm7928_vm5  ;;  %v9547_v5 = vmov 0  ;;  %vm9549_vm12 = vcmask 1043456   ;;  %v2026_v60 = vsel %vm7860_vm9, %v1995_v33, 0.0  ;;  %vm9551_vm3 = vcmp.lt.s32.totalorder %v7452_v44, 31 }
 0x20a   : > { %vm7995_vm10 = vcmp.le.s32.totalorder %v9546_v63, 30  ;;  %6585 = vmatprep.subr.msk.mxu0 %vm9549_vm12, %v1122_v18  ;;  %vm9550_vm6 = vmmov %vm9549_vm12  ;;  %v1991_v62 = vsel %vm9551_vm3, %v7666_v24, %v7785_v17  ;;  %vm9552_vm8 = vcmp.lt.s32.totalorder %v7452_v44, 33  ;;  %v1126_v33 = vsel %vm7948_vm0, %v1091_v3, 0.0  ;;  %v8039_v3 = vpop.permute.xlu1 %3294  ;;  %1748 = vmatprep.mubr.f32.mxu0 %v9472_v21 }
 0x20b   : > { %v9548_v5 = vsel %vm7995_vm10, 4294967295, %v9547_v5  ;;  %6599 = vmatpush1.msk.msra.mxu1 %vm9550_vm6, %v2021_v56  ;;  %v1092_v51 = vsel %vm9552_vm8, %v7526_v2, %v7792_v11  ;;  %vm9553_vm12 = vmmov %vm9550_vm6  ;;  %vm9554_vm9 = vcmp.ge.s32.totalorder %v7607_v55, 1  ;;  %v9557_v17 = vand.u32 31, %v7660_v19  ;;  %v2436_v11 = vpop.permute.xlu0 %2435 }
 0x20c   : > { %6586 = vmatpush1.msk.msra.mxu0 %vm9553_vm12, %v1121_v7  ;;  %6604 = vmatprep.subr.msk.mxu1 %vm9550_vm6, %v2026_v60  ;;  %vm8024_vm4 = vmand %vm9554_vm9, %vm7954_vm11  ;;  %v9558_v43 = vmov 0  ;;  %vm9560_vm8 = vcmp.lt.s32.totalorder %v7452_v44, 31  ;;  %vm9562_vm0 = vcmp.ge.s32.totalorder %v7542_v12, 1  ;;  %v9565_v52 = vand.u32 31, %v7585_v35 }
 0x20d   : > { %vm8030_vm3 = vcmp.le.s32.totalorder %v9557_v17, 30  ;;  %v1997_v2 = vsel %vm9560_vm8, %v1975_v49, %v7564_v22  ;;  %vm9561_vm12 = vmmov %vm9550_vm6  ;;  %v9566_v16 = vmov 0  ;;  %v2025_v22 = vsel %vm7962_vm15, %v1996_v61, 0.0 }
 0x20e   : > { %v9559_v43 = vsel %vm8030_vm3, 4294967295, %v9558_v43  ;;  %6591 = vmatprep.subr.msk.mxu0 %vm9561_vm12, %v1126_v33  ;;  %vm8045_vm6 = vmand %vm9562_vm0, %vm7975_vm13  ;;  %vm8051_vm9 = vcmp.le.s32.totalorder %v9565_v52, 30  ;;  %vm9568_vm8 = vcmp.ge.s32.totalorder %v7540_v9, 1  ;;  %vm9571_vm0 = vcmask 31744  }
 0x20f   : > { %v9567_v16 = vsel %vm8051_vm9, 4294967295, %v9566_v16  ;;  %vm8061_vm12 = vmand %vm9568_vm8, %vm7995_vm10  ;;  %6600 = vmatmul.mubr.msk.f32.vlgmr.msra.gmra.mrb[6].mxu1 %vm9571_vm0, %v8006_v14  ;;  %vm9407_vm11 = vcmp.lt.s32.totalorder %v7452_v44, 1  ;;  %v1125_v35 = vsel %vm7989_vm1, %v1092_v51, 0.0  ;;  %vm9572_vm13 = vcmask 1043456  }
 0x210   : > { %6605 = vmatpush1.msk.msra.mxu1 %vm9572_vm13, %v2025_v22  ;;  %vm9573_vm15 = vmmov %vm9571_vm0  ;;  %v2030_v0 = vsel %vm8024_vm4, %v1991_v62, 0.0  ;;  %vm9574_vm8 = vcmp.ge.s32.totalorder %v7777_v32, 1  ;;  %vm9577_vm0 = vcmp.lt.s32.totalorder %v7452_v44, 31  ;;  %v2024_v26 = vsel %vm8045_vm6, %v1997_v2, 0.0  ;;  %2270 = vmatprep.mubr.f32.mxu1 %v9472_v21 }
 0x211   : > { %6587 = vmatmul.mubr.msk.f32.vlgmr.msra.gmra.mrb[4].mxu0 %vm9573_vm15, %v7757_v37  ;;  %vm8080_vm10 = vmand %vm9574_vm8, %vm8030_vm3  ;;  %v1998_v18 = vsel %vm9577_vm0, %v7502_v58, %v1975_v49  ;;  %vm9580_vm4 = vcmp.ge.s32.totalorder %v7633_v48, 1  ;;  %v9583_v7 = vand.u32 31, %v7681_v25  ;;  %v9584_v41 = vmov 0  ;;  %v8107_v58 = vpop.permute.xlu0 %3296  ;;  %v1985_v49 = vpop.permute.xlu1 %1984 }
 0x212   : > { %vm9578_vm1 = vmmov %vm9572_vm13  ;;  %v2460_v63 = vsel %vm9407_vm11, %v7458_v45, %v7504_v59  ;;  %1890 = vmatprep.mubr.f32.mxu0 %v9472_v21  ;;  %vm9587_vm6 = vcmask 31744   ;;  %v2461_v62 = vsel %vm9407_vm11, %v7642_v47, %v7458_v45  ;;  %v2023_v51 = vsel %vm8061_vm12, %v1998_v18, 0.0  ;;  %v9628_v45 = vld [vmem:[#allocation20_spill] sm:$0xff] }
 0x213   : > { %6592 = vmatpush1.msk.msra.mxu0 %vm9578_vm1, %v1125_v35  ;;  %vm9579_vm13 = vmmov %vm9578_vm1  ;;  %vm8101_vm8 = vcmp.le.s32.totalorder %v9583_v7, 30  ;;  %6606 = vmatmul.mubr.msk.f32.vlgmr.msra.gmra.mrb[8].mxu1 %vm9587_vm6, %v8006_v14  ;;  %vm9591_vm12 = vcmp.ge.s32.totalorder %v7790_v30, 1  ;;  %v2458_v17 = vsel %vm9407_vm11, %v2436_v11, %v7590_v39  ;;  %v2483_v19 = vsel %vm7649_vm7, %v2460_v63, 0.0  ;;  %v6613_v35 = vld [vmem:[%s9333_s5 + $0xc] sm:$0xf] }
 0x214   : > { %6610 = vmatprep.subr.msk.mxu1 %vm9579_vm13, %v2030_v0  ;;  %vm8095_vm15 = vmand %vm9580_vm4, %vm8051_vm9  ;;  %v9585_v41 = vsel %vm8101_vm8, 4294967295, %v9584_v41  ;;  %2412 = vmatprep.mubr.f32.mxu1 %v9472_v21 }
 0x215   : > { %vm9586_vm0 = vmmov %vm9578_vm1  ;;  %vm9588_vm1 = vcmp.lt.s32.totalorder %v7452_v44, 31  ;;  %v2444_v2 = vpop.permute.xlu0 %2443  ;;  %v8160_v52 = vpop.permute.xlu1 %3292 }
 0x216   : > { %6601 = vmatprep.subr.msk.mxu0 %vm9586_vm0, %v2024_v26  ;;  %v1992_v25 = vsel %vm9588_vm1, %v1985_v49, %v7666_v24  ;;  %vm9589_vm13 = vmmov %vm9588_vm1  ;;  %v2456_v24 = vsel %vm9407_vm11, %v7524_v1, %v7544_v13 }
 0x217   : > { %v1993_v60 = vsel %vm9589_vm13, %v7942_v36, %v1985_v49  ;;  %v2029_v54 = vsel %vm8095_vm15, %v1992_v25, 0.0  ;;  %vm9590_vm4 = vmmov %vm9587_vm6  ;;  %vm9595_vm15 = vcmask 1043456  }
 0x218   : > { %v2028_v33 = vsel %vm8080_vm10, %v1993_v60, 0.0  ;;  %6593 = vmatmul.mubr.msk.f32.vlgmr.msra.gmra.mrb[6].mxu0 %vm9590_vm4, %v7757_v37  ;;  %vm8143_vm0 = vmand %vm9591_vm12, %vm8101_vm8 }
 0x219   : > { %vm9594_vm10 = vmmov %vm9588_vm1  ;;  %6602 = vmatpush1.msk.msra.mxu0 %vm9595_vm15, %v2023_v51  ;;  %2199 = vmatprep.mubr.f32.mxu0 %v9472_v21  ;;  %v8194_v56 = vpop.permute.xlu0 %3304  ;;  %v8196_v18 = vpop.permute.xlu1 %3302 }
 0x21a   : > { %v1994_v37 = vsel %vm9594_vm10, %v7534_v6, %v7942_v36  ;;  %vm9596_vm6 = vmmov %vm9595_vm15  ;;  %v2482_v6 = vsel %vm7695_vm14, %v2461_v62, 0.0  ;;  %v2457_v36 = vsel %vm9407_vm11, %v7590_v39, %v7524_v1  ;;  %vm9602_vm15 = vnez %v9458_v46 }
 0x21b   : > { %6611 = vmatpush1.msk.msra.mxu1 %vm9596_vm6, %v2029_v54  ;;  %vm9597_vm1 = vmmov %vm9596_vm6  ;;  %v2027_v22 = vsel %vm8143_vm0, %v1994_v37, 0.0  ;;  %v2487_v38 = vsel %vm9602_vm15, %v2456_v24, 0.0  ;;  %v2452_v1 = vsel %vm9407_vm11, %v7726_v20, %v7642_v47  ;;  %v2459_v39 = vsel %vm9407_vm11, %v7504_v59, %v2436_v11  ;;  %v9627_v54 = vld [vmem:[#allocation19_spill] sm:$0xff]  ;;  %v6629_v24 = vld [vmem:[%s9333_s5 + $0x10] sm:$0xf] }
 0x21c   : > { %6607 = vmatprep.subr.msk.mxu0 %vm9597_vm1, %v2028_v33  ;;  %vm9598_vm13 = vmmov %vm9590_vm4  ;;  %vm9604_vm6 = vnez %v9486_v40  ;;  %v9625_v33 = vld [vmem:[#allocation16_spill] sm:$0xff]  ;;  %v9630_v37 = vld [vmem:[#allocation18_spill] sm:$0xff] }
 0x21d   : > { %6612 = vmatmul.mubr.msk.f32.vlgmr.msra.gmra.mrb[10].mxu1 %vm9598_vm13, %v8006_v14  ;;  %vm9599_vm4 = vmmov %vm9597_vm1  ;;  %v2485_v0 = vsel %vm9604_vm6, %v2458_v17, 0.0  ;;  %v8211_v26 = vpop.permute.xlu0 %3310  ;;  %v8213_v61 = vpop.permute.xlu1 %3300 }
 0x21e   : > { %6614 = vmatprep.subr.msk.mxu1 %vm9599_vm4, %v2483_v19  ;;  %vm9600_vm12 = vmmov %vm9598_vm13  ;;  %2589 = vmatprep.mubr.f32.mxu1 %v9472_v21  ;;  %vm9607_vm4 = vnez %v9460_v27 }
 0x21f   : > { %6603 = vmatmul.mubr.msk.f32.vlgmr.msra.gmra.mrb[4].mxu0 %vm9600_vm12, %v8006_v14  ;;  %vm9601_vm10 = vmmov %vm9597_vm1  ;;  %v2486_v47 = vsel %vm9607_vm4, %v2457_v36, 0.0 }
 0x220   : > { %6615 = vmatpush1.msk.msra.mxu1 %vm9601_vm10, %v2482_v6  ;;  %vm9603_vm0 = vmmov %vm9597_vm1  ;;  %2341 = vmatprep.mubr.f32.mxu0 %v9472_v21  ;;  %vm9608_vm10 = vnez %v9495_v57  ;;  %v9635_v6 = vld [vmem:[#allocation17_spill] sm:$0xff] }
 0x221   : > { %6608 = vmatpush1.msk.msra.mxu0 %vm9603_vm0, %v2027_v22  ;;  %vm9605_vm1 = vmmov %vm9603_vm0  ;;  %6616 = vmatmul.mubr.msk.f32.vlgmr.msra.gmra.mrb[6].mxu1 %vm9600_vm12, %v6613_v35  ;;  %v2484_v59 = vsel %vm9608_vm10, %v2459_v39, 0.0  ;;  %v2446_v7 = vpop.permute.xlu0 %2445  ;;  %v8224_v49 = vpop.permute.xlu1 %3308 }
 0x222   : > { %6620 = vmatprep.subr.msk.mxu1 %vm9605_vm1, %v2487_v38  ;;  %vm9606_vm13 = vmmov %vm9603_vm0  ;;  %2731 = vmatprep.mubr.f32.mxu1 %v9472_v21 }
 0x223   : > { %6617 = vmatprep.subr.msk.mxu0 %vm9606_vm13, %v2485_v0  ;;  %6621 = vmatpush1.msk.msra.mxu1 %vm9603_vm0, %v2486_v47  ;;  %vm9609_vm1 = vmmov %vm9600_vm12  ;;  %vm9610_vm13 = vnez %v9467_v8 }
 0x224   : > { %6609 = vmatmul.mubr.msk.f32.vlgmr.msra.gmra.mrb[6].mxu0 %vm9609_vm1, %v8006_v14  ;;  %v2491_v11 = vsel %vm9610_vm13, %v2452_v1, 0.0  ;;  %vm9611_vm11 = vmmov %vm9603_vm0  ;;  %v9641_v1 = vld [vmem:[#allocation22_spill] sm:$0xff] }
 0x225   : > { %6618 = vmatpush1.msk.msra.mxu0 %vm9611_vm11, %v2484_v59  ;;  %vm9612_vm3 = vmmov %vm9603_vm0  ;;  %2660 = vmatprep.mubr.f32.mxu0 %v9472_v21  ;;  %vm9615_vm11 = vcmp.lt.s32.totalorder %v7452_v44, 1 }
 0x226   : > { %6626 = vmatprep.subr.msk.mxu1 %vm9612_vm3, %v2491_v11  ;;  %vm9613_vm12 = vmmov %vm9609_vm1  ;;  %v2455_v14 = vsel %vm9615_vm11, %v7544_v13, %v2444_v2  ;;  %v8239_v13 = vpop.permute.xlu0 %3755  ;;  %v9647_v11 = vld [vmem:[#allocation21_spill] sm:$0xff] }
 0x227   : > { %6622 = vmatmul.mubr.msk.f32.vlgmr.msra.gmra.mrb[8].mxu1 %vm9613_vm12, %v6613_v35  ;;  %vm9614_vm0 = vmmov %vm9609_vm1  ;;  %vm9618_vm12 = vnez %v9479_v23  ;;  %v2488_v51 = vsel %vm7928_vm5, %v2455_v14, 0.0 }
 0x228   : > { %6619 = vmatmul.mubr.msk.f32.vlgmr.msra.gmra.mrb[4].mxu0 %vm9614_vm0, %v6613_v35  ;;  %2873 = vmatprep.mubr.f32.mxu1 %v9472_v21  ;;  %vm9616_vm3 = vmmov %vm9615_vm11  ;;  %vm9619_vm0 = vcmask 1043456  }
 0x229   : > { %2802 = vmatprep.mubr.f32.mxu0 %v9472_v21  ;;  %v2453_v63 = vsel %vm9616_vm3, %v2446_v7, %v7726_v20  ;;  %vm9617_vm1 = vmmov %vm9616_vm3  ;;  %vm9622_vm3 = vcmask 31744   ;;  %v8243_v20 = vpop.permute.xlu1 %3757 }
 0x22a   : > { %v2454_v25 = vsel %vm9617_vm1, %v2444_v2, %v2446_v7  ;;  %v2490_v62 = vsel %vm9618_vm12, %v2453_v63, 0.0  ;;  %vm9620_vm11 = vmmov %vm9619_vm0  ;;  %v8263_v17 = vpop.permute.xlu0 %3753  ;;  %v9651_v63 = vld [vmem:[#allocation29_spill] sm:$0xff] }
 0x22b   : > { %v2489_v60 = vsel %vm7866_vm2, %v2454_v25, 0.0  ;;  %6627 = vmatpush1.msk.msra.mxu1 %vm9620_vm11, %v2490_v62  ;;  %vm9621_vm10 = vmmov %vm9619_vm0 }
 0x22c   : > { %6623 = vmatprep.subr.msk.mxu0 %vm9619_vm0, %v2489_v60  ;;  %6628 = vmatmul.mubr.msk.f32.vlgmr.msra.gmra.mrb[10].mxu1 %vm9622_vm3, %v6613_v35  ;;  %vm9623_vm1 = vmmov %vm9619_vm0  ;;  %v9653_v60 = vld [vmem:[#allocation28_spill] sm:$0xff] }
 0x22d   : > { %6624 = vmatpush1.msk.msra.mxu0 %vm9621_vm10, %v2488_v51  ;;  %6630 = vmatprep.subr.msk.mxu1 %vm9623_vm1, %v7325_v28  ;;  %vm9624_vm2 = vmmov %vm9622_vm3  ;;  %vm9414_vm3 = vcmp.lt.s32.totalorder %v7452_v44, 127  ;;  %v9632_v28 = vld [vmem:[#allocation23_spill] sm:$0xff]  ;;  %v3299_v2 = vpop.permute.xlu1 %3298 }
 0x22e   : > { %6625 = vmatmul.mubr.msk.f32.vlgmr.msra.gmra.mrb[6].mxu0 %vm9624_vm2, %v6613_v35  ;;  %vm9626_vm8 = vmmov %vm9619_vm0  ;;  %6633 = vmatprep.subr.msk.mxu0 %vm9619_vm0, %v9627_v54  ;;  %v3318_v19 = vsel %vm9414_vm3, %v3299_v2, %v8213_v61  ;;  %v3320_v22 = vsel %vm9414_vm3, %v8039_v3, %v8107_v58  ;;  %v3319_v38 = vsel %vm9414_vm3, %v8107_v58, %v3299_v2  ;;  %v9639_v35 = vld [vmem:[#allocation24_spill] sm:$0xff]  ;;  %v8288_v39 = vpop.permute.xlu0 %3763 }
 0x22f   : > { %6631 = vmatpush1.msk.msra.mxu1 %vm9626_vm8, %v9625_v33  ;;  %vm9629_vm10 = vmmov %vm9619_vm0  ;;  %2989 = vmatprep.mubr.f32.mxu1 %v9472_v21  ;;  %vm9634_vm8 = vcmask 31744   ;;  %v3321_v47 = vsel %vm9414_vm3, %v8160_v52, %v8039_v3  ;;  %v3316_v14 = vsel %vm9414_vm3, %v8196_v18, %v8194_v56  ;;  %v3317_v51 = vsel %vm9414_vm3, %v8213_v61, %v8196_v18  ;;  %v8331_v33 = vld [vmem:[%s9333_s5 + $0x14] sm:$0xf] }
 0x230   : > { %6634 = vmatpush1.msk.msra.mxu0 %vm9629_vm10, %v9628_v45  ;;  %vm9631_vm11 = vmmov %vm9619_vm0  ;;  %6632 = vmatmul.mubr.msk.f32.vlgmr.msra.gmra.mrb[6].mxu1 %vm9634_vm8, %v6629_v24  ;;  %v3322_v54 = vsel %vm9414_vm3, %v8211_v26, %v8160_v52  ;;  %v9656_v18 = vld [vmem:[#allocation25_spill] sm:$0xff] }
 0x231   : > { %6636 = vmatprep.subr.msk.mxu1 %vm9631_vm11, %v9630_v37  ;;  %vm9633_vm2 = vmmov %vm9619_vm0  ;;  %3060 = vmatprep.mubr.f32.mxu0 %v9472_v21  ;;  %v8290_v0 = vpop.permute.xlu1 %3765  ;;  %v3313_v37 = vsel %vm9414_vm3, %v8224_v49, %v8211_v26  ;;  %v9666_v26 = vld [vmem:[#allocation27_spill] sm:$0xff] }
 0x232   : > { %6639 = vmatprep.subr.msk.mxu0 %vm9633_vm2, %v9632_v28  ;;  %vm9636_vm1 = vmmov %vm9619_vm0  ;;  %vm9637_vm0 = vnez %v9541_v53  ;;  %3131 = vmatprep.mubr.f32.mxu1 %v9472_v21  ;;  %v8312_v3 = vpop.permute.xlu0 %3761 }
 0x233   : > { %6637 = vmatpush1.msk.msra.mxu1 %vm9636_vm1, %v9635_v6  ;;  %v3346_v36 = vsel %vm9637_vm0, %v3318_v19, 0.0  ;;  %vm9638_vm10 = vmmov %vm9634_vm8  ;;  %v9664_v19 = vld [vmem:[#allocation26_spill] sm:$0xff] }
 0x234   : > { %6635 = vmatmul.mubr.msk.f32.vlgmr.msra.gmra.mrb[4].mxu0 %vm9638_vm10, %v6629_v24  ;;  %vm9640_vm11 = vmmov %vm9636_vm1 }
 0x235   : > { %6640 = vmatpush1.msk.msra.mxu0 %vm9640_vm11, %v9639_v35  ;;  %vm9642_vm2 = vmmov %vm9636_vm1  ;;  %3202 = vmatprep.mubr.f32.mxu0 %v9472_v21  ;;  %vm9646_vm11 = vnez %v9548_v5  ;;  %v8314_v7 = vpop.permute.xlu1 %3769 }
 0x236   : > { %6642 = vmatprep.subr.msk.mxu1 %vm9642_vm2, %v9641_v1  ;;  %vm9643_vm8 = vmmov %vm9636_vm1  ;;  %v3345_v59 = vsel %vm9646_vm11, %v3319_v38, 0.0  ;;  %vm9654_vm11 = vnez %v9653_v60  ;;  %v3772_v61 = vpop.permute.xlu0 %3771 }
 0x237   : > { %6649 = vmatprep.subr.msk.mxu0 %vm9643_vm8, %v3346_v36  ;;  %vm9644_vm1 = vmmov %vm9638_vm10  ;;  %vm9645_vm10 = vnez %v9476_v42  ;;  %v3348_v62 = vsel %vm9654_vm11, %v3316_v14, 0.0  ;;  %vm9415_vm11 = vcmp.le.s32.totalorder %v9656_v18, 30 }
 0x238   : > { %6638 = vmatmul.mubr.msk.f32.vlgmr.msra.gmra.mrb[8].mxu1 %vm9644_vm1, %v6629_v24  ;;  %v3344_v58 = vsel %vm9645_vm10, %v3320_v22, 0.0  ;;  %vm9648_vm8 = vmmov %vm9644_vm1  ;;  %v3351_v22 = vsel %vm8051_vm9, %v3313_v37, 0.0 }
 0x239   : > { %6643 = vmatpush1.msk.msra.mxu1 %vm9642_vm2, %v9647_v11  ;;  %6641 = vmatmul.mubr.msk.f32.vlgmr.msra.gmra.mrb[6].mxu0 %vm9648_vm8, %v6629_v24  ;;  %vm9649_vm1 = vmmov %vm9642_vm2  ;;  %vm9652_vm2 = vnez %v9651_v63 }
 0x23a   : > { %6646 = vmatprep.subr.msk.mxu1 %vm9649_vm1, %v3344_v58  ;;  %vm9650_vm0 = vmmov %vm9649_vm1  ;;  %3273 = vmatprep.mubr.f32.mxu1 %v9472_v21  ;;  %v3343_v25 = vsel %vm9652_vm2, %v3321_v47, 0.0  ;;  %vm9657_vm2 = vnez %v9488_v31  ;;  %v3760_v6 = vpop.permute.xlu0 %3759 }
 0x23b   : > { %6650 = vmatpush1.msk.msra.mxu0 %vm9650_vm0, %v3345_v59  ;;  %3521 = vmatprep.mubr.f32.mxu0 %v9472_v21  ;;  %vm9655_vm1 = vmmov %vm9650_vm0  ;;  %v3347_v45 = vsel %vm9657_vm2, %v3317_v51, 0.0  ;;  %v8435_v51 = vld [vmem:[%s9333_s5 + $0x18] sm:$0xf] }
 0x23c   : > { %6644 = vmatmul.mubr.msk.f32.vlgmr.msra.gmra.mrb[10].mxu1 %vm9648_vm8, %v6629_v24  ;;  %v8342_v24 = vpop.permute.xlu1 %4216  ;;  %vm9658_vm10 = vmmov %vm9648_vm8 }
 0x23d   : > { %6647 = vmatpush1.msk.msra.mxu1 %vm9650_vm0, %v3343_v25  ;;  %3450 = vmatprep.mubr.f32.mxu1 %v9472_v21 }
 0x23e   : > { %6652 = vmatprep.subr.msk.mxu1 %vm9655_vm1, %v3348_v62  ;;  %6651 = vmatmul.mubr.msk.f32.vlgmr.msra.gmra.mrb[4].mxu0 %vm9648_vm8, %v8331_v33  ;;  %vm9659_vm1 = vnez %v9533_v15  ;;  %vm9660_vm8 = vmmov %vm9650_vm0 }
 0x23f   : > { %3663 = vmatprep.mubr.f32.mxu0 %v9472_v21  ;;  %v3352_v52 = vsel %vm9659_vm1, %v3322_v54, 0.0  ;;  %vm8361_vm0 = vmand %vm9415_vm11, %vm7649_vm7  ;;  %vm9416_vm1 = vcmp.le.s32.totalorder %v9664_v19, 30  ;;  %vm9667_vm11 = vcmask 31744  }
 0x240   : > { %6648 = vmatmul.mubr.msk.f32.vlgmr.msra.gmra.mrb[6].mxu1 %vm9658_vm10, %v8331_v33  ;;  %vm9663_vm10 = vcmp.lt.s32.totalorder %v7452_v44, 97  ;;  %vm9665_vm3 = vmmov %vm9660_vm8  ;;  %v8372_v36 = vpop.permute.xlu1 %4214 }
 0x241   : > { %6653 = vmatpush1.msk.msra.mxu1 %vm9660_vm8, %v3347_v45  ;;  %3592 = vmatprep.mubr.f32.mxu1 %v9472_v21  ;;  %v3781_v2 = vsel %vm9663_vm10, %v8239_v13, %v8243_v20  ;;  %vm8384_vm10 = vmand %vm9416_vm1, %vm7695_vm14  ;;  %vm9418_vm14 = vcmp.le.s32.totalorder %v7599_v50, 30 }
 0x242   : > { %6658 = vmatprep.subr.msk.mxu1 %vm9665_vm3, %v3352_v52  ;;  %v3805_v38 = vsel %vm8361_vm0, %v3781_v2, 0.0  ;;  %vm9670_vm3 = vcmp.lt.s32.totalorder %v7452_v44, 97 }
 0x243   : > { %v3782_v1 = vsel %vm9670_vm3, %v8263_v17, %v8239_v13  ;;  %vm9674_vm1 = vmmov %vm9670_vm3  ;;  %v8409_v13 = vpop.permute.xlu0 %4218 }
 0x244   : > { %6654 = vmatmul.mubr.msk.f32.vlgmr.msra.gmra.mrb[8].mxu1 %vm9667_vm11, %v8331_v33  ;;  %vm9671_vm11 = vcmp.le.s32.totalorder %v9666_v26, 30  ;;  %v3777_v47 = vsel %vm9674_vm1, %v8288_v39, %v8290_v0  ;;  %vm9675_vm3 = vmmov %vm9660_vm8  ;;  %v4225_v59 = vpop.permute.xlu1 %4224  ;;  %v3804_v11 = vsel %vm8384_vm10, %v3782_v1, 0.0 }
 0x245   : > { %6659 = vmatpush1.msk.msra.mxu1 %vm9660_vm8, %v3351_v22  ;;  %3734 = vmatprep.mubr.f32.mxu1 %v9472_v21  ;;  %vm8398_vm0 = vmand %vm9671_vm11, %vm9602_vm15  ;;  %vm9676_vm11 = vcmask 31744   ;;  %vm9689_vm15 = vcmp.lt.s32.totalorder %v7452_v44, 127 }
 0x246   : > { %6662 = vmatprep.subr.msk.mxu1 %vm9675_vm3, %v3805_v38  ;;  %v3809_v14 = vsel %vm8398_vm0, %v3777_v47, 0.0  ;;  %vm8421_vm1 = vmand %vm9418_vm14, %vm9607_vm4  ;;  %vm9679_vm3 = vcmp.lt.s32.totalorder %v7452_v44, 97 }
 0x247   : > { %v3778_v62 = vsel %vm9679_vm3, %v8312_v3, %v8288_v39  ;;  %v8452_v45 = vpop.permute.xlu0 %4226 }
 0x248   : > { %6660 = vmatmul.mubr.msk.f32.vlgmr.msra.gmra.mrb[10].mxu1 %vm9676_vm11, %v8331_v33  ;;  %vm9680_vm11 = vcmp.le.s32.totalorder %v7607_v55, 30  ;;  %v3307_v52 = vpop.permute.xlu1 %3306  ;;  %v3808_v37 = vsel %vm8421_vm1, %v3778_v62, 0.0  ;;  %vm9690_vm1 = vmmov %vm9689_vm15 }
 0x249   : > { %6663 = vmatpush1.msk.msra.mxu1 %vm9660_vm8, %v3804_v11  ;;  %3911 = vmatprep.mubr.f32.mxu1 %v9472_v21  ;;  %vm8442_vm14 = vmand %vm9680_vm11, %vm9610_vm13  ;;  %vm9685_vm11 = vcmp.le.s32.totalorder %v7542_v12, 30  ;;  %v3314_v2 = vsel %vm9689_vm15, %v3307_v52, %v8224_v49  ;;  %v3315_v22 = vsel %vm9690_vm1, %v8194_v56, %v3307_v52  ;;  %vm9694_vm15 = vcmask 1043456  }
 0x24a   : > { %vm9683_vm8 = vmmov %vm9679_vm3  ;;  %vm9684_vm3 = vcmask 1043456   ;;  %vm9696_vm1 = vnez %v9559_v43  ;;  %vm9698_vm13 = vcmp.le.s32.totalorder %v7540_v9, 30 }
 0x24b   : > { %v3783_v39 = vsel %vm9683_vm8, %v3772_v61, %v8263_v17  ;;  %6668 = vmatprep.subr.msk.mxu1 %vm9684_vm3, %v3809_v14  ;;  %vm8460_vm0 = vmand %vm9685_vm11, %vm9604_vm6  ;;  %v3779_v17 = vsel %vm9683_vm8, %v3760_v6, %v8312_v3  ;;  %vm9688_vm3 = vcmask 31744   ;;  %vm9691_vm11 = vcmp.le.s32.totalorder %v7633_v48, 30  ;;  %v4221_v11 = vpop.permute.xlu0 %4220 }
 0x24c   : > { %6664 = vmatmul.mubr.msk.f32.vlgmr.msra.gmra.mrb[6].mxu1 %vm9688_vm3, %v8435_v51  ;;  %vm8479_vm10 = vmand %vm9691_vm11, %vm9618_vm12  ;;  %v3774_v3 = vsel %vm9683_vm8, %v8314_v7, %v3772_v61  ;;  %v3813_v35 = vsel %vm8442_vm14, %v3783_v39, 0.0  ;;  %vm9695_vm3 = vnez %v9585_v41  ;;  %v3350_v49 = vsel %vm9696_vm1, %v3314_v2, 0.0  ;;  %v4223_v14 = vpop.permute.xlu1 %4222 }
 0x24d   : > { %6669 = vmatpush1.msk.msra.mxu1 %vm9694_vm15, %v3808_v37  ;;  %v3349_v56 = vsel %vm9695_vm3, %v3315_v22, 0.0  ;;  %4053 = vmatprep.mubr.f32.mxu1 %v9472_v21  ;;  %vm9697_vm11 = vnez %v9495_v57  ;;  %vm9701_vm14 = vmmov %vm9683_vm8  ;;  %vm9702_vm8 = vcmp.lt.s32.totalorder %v7452_v44, 96  ;;  %v3807_v47 = vsel %vm8460_vm0, %v3779_v17, 0.0  ;;  %v8560_v17 = vld [vmem:[%s9333_s5 + $0x1c] sm:$0xf] }
 0x24e   : > { %vm8498_vm12 = vmand %vm9698_vm13, %vm9697_vm11  ;;  %v3780_v61 = vsel %vm9701_vm14, %v8243_v20, %v3760_v6  ;;  %v4242_v58 = vsel %vm9702_vm8, %v8342_v24, %v8409_v13  ;;  %6674 = vmatprep.subr.msk.mxu1 %vm9694_vm15, %v3813_v35  ;;  %v3812_v25 = vsel %vm8479_vm10, %v3774_v3, 0.0  ;;  %vm9705_vm14 = vcmask 31744  }
 0x24f   : > { %vm9703_vm4 = vmmov %vm9694_vm15  ;;  %v3806_v20 = vsel %vm8498_vm12, %v3780_v61, 0.0  ;;  %vm9708_vm0 = vcmp.le.s32.totalorder %v9656_v18, 30 }
 0x250   : > { %6655 = vmatprep.subr.msk.mxu0 %vm9703_vm4, %v3350_v49  ;;  %vm9704_vm13 = vmmov %vm9703_vm4  ;;  %6670 = vmatmul.mubr.msk.f32.vlgmr.msra.gmra.mrb[8].mxu1 %vm9705_vm14, %v8435_v51  ;;  %v4266_v62 = vsel %vm9708_vm0, %v4242_v58, 0.0  ;;  %v4233_v39 = vpop.permute.xlu1 %4232 }
 0x251   : > { %6656 = vmatpush1.msk.msra.mxu0 %vm9704_vm13, %v3349_v56  ;;  %vm9706_vm6 = vmmov %vm9703_vm4  ;;  %vm9424_vm13 = vcmp.le.s32.totalorder %v7790_v30, 30  ;;  %4195 = vmatprep.mubr.f32.mxu1 %v9472_v21 }
 0x252   : > { %6665 = vmatprep.subr.msk.mxu0 %vm9706_vm6, %v3807_v47  ;;  %vm9707_vm4 = vmmov %vm9702_vm8 }
 0x253   : > { %v4243_v6 = vsel %vm9707_vm4, %v8372_v36, %v8342_v24  ;;  %vm9709_vm8 = vmmov %vm9706_vm6  ;;  %v4231_v24 = vpop.permute.xlu0 %4230 }
 0x254   : > { %6675 = vmatpush1.msk.msra.mxu1 %vm9709_vm8, %v3812_v25  ;;  %vm9710_vm10 = vmmov %vm9705_vm14  ;;  %vm9425_vm14 = vcmp.le.s32.totalorder %v7777_v32, 30  ;;  %vm9715_vm8 = vcmp.le.s32.totalorder %v9666_v26, 30  ;;  %v4680_v38 = vpop.permute.xlu1 %4679 }
 0x255   : > { %6657 = vmatmul.mubr.msk.f32.vlgmr.msra.gmra.mrb[6].mxu0 %vm9710_vm10, %v8331_v33  ;;  %vm9711_vm15 = vmmov %vm9707_vm4  ;;  %6678 = vmatprep.subr.msk.mxu1 %vm9706_vm6, %v4266_v62  ;;  %vm9713_vm4 = vcmp.le.s32.totalorder %v9664_v19, 30 }
 0x256   : > { %v4238_v54 = vsel %vm9711_vm15, %v4225_v59, %v8452_v45  ;;  %vm9712_vm12 = vmmov %vm9706_vm6  ;;  %3982 = vmatprep.mubr.f32.mxu0 %v9472_v21  ;;  %v4265_v33 = vsel %vm9713_vm4, %v4243_v6, 0.0 }
 0x257   : > { %6666 = vmatpush1.msk.msra.mxu0 %vm9712_vm12, %v3806_v20  ;;  %vm9714_vm0 = vmmov %vm9710_vm10  ;;  %v4270_v52 = vsel %vm9715_vm8, %v4238_v54, 0.0  ;;  %v3768_v22 = vpop.permute.xlu0 %3767 }
 0x258   : > { %6676 = vmatmul.mubr.msk.f32.vlgmr.msra.gmra.mrb[10].mxu1 %vm9714_vm0, %v8435_v51  ;;  %vm9716_vm10 = vmmov %vm9711_vm15  ;;  %vm9722_vm0 = vnez %v9501_v34 }
 0x259   : > { %v4239_v37 = vsel %vm9716_vm10, %v4223_v14, %v4225_v59  ;;  %vm9717_vm15 = vmmov %vm9706_vm6  ;;  %4372 = vmatprep.mubr.f32.mxu1 %v9472_v21 }
 0x25a   : > { %6679 = vmatpush1.msk.msra.mxu1 %vm9717_vm15, %v4265_v33  ;;  %vm8553_vm6 = vmand %vm9424_vm13, %vm7928_vm5  ;;  %vm9727_vm13 = vcmp.lt.s32.totalorder %v7452_v44, 97 }
 0x25b   : > { %vm9720_vm12 = vmmov %vm9716_vm10  ;;  %vm9725_vm10 = vcmask 31744   ;;  %v3775_v35 = vsel %vm9727_vm13, %v3768_v22, %v8314_v7  ;;  %v4678_v47 = vpop.permute.xlu0 %4677 }
 0x25c   : > { %v4244_v59 = vsel %vm9720_vm12, %v4233_v39, %v8372_v36  ;;  %vm9721_vm4 = vmmov %vm9717_vm15  ;;  %6667 = vmatmul.mubr.msk.f32.vlgmr.msra.gmra.mrb[4].mxu0 %vm9725_vm10, %v8435_v51  ;;  %v4240_v36 = vsel %vm9720_vm12, %v4221_v11, %v4223_v14  ;;  %6680 = vmatmul.mubr.msk.f32.vlgmr.msra.gmra.mrb[6].mxu1 %vm9725_vm10, %v8560_v17  ;;  %v4229_v14 = vpop.permute.xlu1 %4228  ;;  %vm9740_vm10 = vcmp.le.s32.totalorder %v7542_v12, 30 }
 0x25d   : > { %6684 = vmatprep.subr.msk.mxu1 %vm9721_vm4, %v4270_v52  ;;  %vm8570_vm8 = vmand %vm9425_vm14, %vm9722_vm0  ;;  %4124 = vmatprep.mubr.f32.mxu0 %v9472_v21  ;;  %vm9726_vm4 = vcmp.le.s32.totalorder %v7599_v50, 30  ;;  %vm9730_vm0 = vcmp.le.s32.totalorder %v7607_v55, 30  ;;  %v4268_v25 = vsel %vm9740_vm10, %v4240_v36, 0.0  ;;  %vm9747_vm10 = vcmask 1043456  }
 0x25e   : > { %v4269_v3 = vsel %vm9726_vm4, %v4239_v37, 0.0  ;;  %vm9728_vm14 = vmmov %vm9727_vm13  ;;  %v4274_v1 = vsel %vm9730_vm0, %v4244_v59, 0.0  ;;  %v3811_v58 = vsel %vm8570_vm8, %v3775_v35, 0.0  ;;  %vm9731_vm13 = vcmask 1043456   ;;  %4514 = vmatprep.mubr.f32.mxu1 %v9472_v21  ;;  %v9814_v37 = vld [vmem:[#allocation13_spill] sm:$0xff] }
 0x25f   : > { %v3776_v56 = vsel %vm9728_vm14, %v8290_v0, %v3768_v22  ;;  %vm9729_vm15 = vmmov %vm9720_vm12  ;;  %6685 = vmatpush1.msk.msra.mxu1 %vm9731_vm13, %v4269_v3  ;;  %vm9735_vm0 = vnez %v9476_v42  ;;  %vm9736_vm4 = vcmp.le.s32.totalorder %v9656_v18, 30 }
 0x260   : > { %v4235_v49 = vsel %vm9729_vm15, %v4231_v24, %v4233_v39  ;;  %v3810_v61 = vsel %vm8553_vm6, %v3776_v56, 0.0  ;;  %vm9732_vm14 = vmmov %vm9720_vm12  ;;  %v4682_v39 = vpop.permute.xlu1 %4681 }
 0x261   : > { %v4241_v0 = vsel %vm9732_vm14, %v8409_v13, %v4221_v11  ;;  %vm9733_vm12 = vmmov %vm9731_vm13  ;;  %vm9741_vm13 = vcmp.le.s32.totalorder %v7633_v48, 30  ;;  %vm9742_vm14 = vcmp.lt.s32.totalorder %v7452_v44, 95 }
 0x262   : > { %6690 = vmatprep.subr.msk.mxu1 %vm9733_vm12, %v4274_v1  ;;  %vm9734_vm15 = vmmov %vm9733_vm12  ;;  %v4273_v13 = vsel %vm9741_vm13, %v4235_v49, 0.0  ;;  %v4703_v11 = vsel %vm9742_vm14, %v4678_v47, %v4680_v38  ;;  %vm9748_vm13 = vcmp.le.s32.totalorder %v7777_v32, 30 }
 0x263   : > { %6671 = vmatprep.subr.msk.mxu0 %vm9734_vm15, %v3811_v58  ;;  %vm8609_vm6 = vmand %vm9736_vm4, %vm9735_vm0  ;;  %vm9744_vm15 = vcmp.lt.s32.totalorder %v7452_v44, 96  ;;  %vm9767_vm0 = vcmp.lt.s32.totalorder %v7452_v44, 95 }
 0x264   : > { %vm9739_vm8 = vmmov %vm9733_vm12  ;;  %vm9743_vm12 = vcmask 31744   ;;  %v4236_v20 = vsel %vm9744_vm15, %v4229_v14, %v4231_v24  ;;  %v4727_v62 = vsel %vm8609_vm6, %v4703_v11, 0.0  ;;  %v4702_v28 = vsel %vm9767_vm0, %v4680_v38, %v4682_v39  ;;  %v4686_v2 = vpop.permute.xlu1 %4685 }
 0x265   : > { %6672 = vmatpush1.msk.msra.mxu0 %vm9739_vm8, %v3810_v61  ;;  %6686 = vmatmul.mubr.msk.f32.vlgmr.msra.gmra.mrb[8].mxu1 %vm9743_vm12, %v8560_v17  ;;  %vm9745_vm4 = vmmov %vm9743_vm12  ;;  %vm9746_vm8 = vcmp.le.s32.totalorder %v7540_v9, 30  ;;  %v4272_v54 = vsel %vm9748_vm13, %v4236_v20, 0.0  ;;  %vm9756_vm13 = vcmp.lt.s32.totalorder %v7452_v44, 95 }
 0x266   : > { %6673 = vmatmul.mubr.msk.f32.vlgmr.msra.gmra.mrb[6].mxu0 %vm9745_vm4, %v8435_v51  ;;  %v4267_v6 = vsel %vm9746_vm8, %v4241_v0, 0.0  ;;  %6691 = vmatpush1.msk.msra.mxu1 %vm9747_vm10, %v4273_v13  ;;  %vm9749_vm14 = vmmov %vm9747_vm10  ;;  %vm9752_vm4 = vnez %v9651_v63  ;;  %vm9753_vm8 = vcmp.le.s32.totalorder %v9664_v19, 30  ;;  %v4676_v51 = vpop.permute.xlu0 %4675  ;;  %v6693_v19 = vld [vmem:[%s9333_s5 + $0x20] sm:$0xf] }
 0x267   : > { %6681 = vmatprep.subr.msk.mxu0 %vm9749_vm14, %v4268_v25  ;;  %vm9750_vm12 = vmmov %vm9744_vm15  ;;  %4656 = vmatprep.mubr.f32.mxu1 %v9472_v21  ;;  %v4704_v33 = vsel %vm9756_vm13, %v4676_v51, %v4678_v47  ;;  %vm9757_vm14 = vcmask 31744   ;;  %vm9762_vm13 = vcmp.le.s32.totalorder %v7542_v12, 30 }
 0x268   : > { %v4237_v24 = vsel %vm9750_vm12, %v8452_v45, %v4229_v14  ;;  %vm9751_vm15 = vmmov %vm9747_vm10  ;;  %4443 = vmatprep.mubr.f32.mxu0 %v9472_v21  ;;  %vm9758_vm12 = vcmp.le.s32.totalorder %v7790_v30, 30  ;;  %v4690_v56 = vpop.permute.xlu1 %4689 }
 0x269   : > { %6682 = vmatpush1.msk.msra.mxu0 %vm9751_vm15, %v4267_v6  ;;  %vm643_vm6 = vmand %vm9753_vm8, %vm9752_vm4  ;;  %6692 = vmatmul.mubr.msk.f32.vlgmr.msra.gmra.mrb[10].mxu1 %vm9757_vm14, %v8560_v17  ;;  %v4271_v45 = vsel %vm9758_vm12, %v4237_v24, 0.0  ;;  %vm9764_vm12 = vcmp.le.s32.totalorder %v7540_v9, 30 }
 0x26a   : > { %vm9754_vm5 = vmmov %vm9747_vm10  ;;  %v4726_v52 = vsel %vm643_vm6, %v4704_v33, 0.0  ;;  %4833 = vmatprep.mubr.f32.mxu1 %v9472_v21  ;;  %vm9763_vm6 = vnez %v9548_v5  ;;  %v4684_v59 = vpop.permute.xlu0 %4683  ;;  %v6916_v33 = vld [vmem:[%s7265_s9] sm:$0xf]  ;;  %s6745_s9 = sshll.u32 %s9937_s27, 6 }
 0x26b   : > { %6687 = vmatprep.subr.msk.mxu0 %vm9754_vm5, %v4272_v54  ;;  %vm9755_vm10 = vmmov %vm9754_vm5 }
 0x26c   : > { %6694 = vmatprep.subr.msk.mxu1 %vm9755_vm10, %v4727_v62  ;;  %vm9759_vm15 = vmmov %vm9757_vm14  ;;  %vm9761_vm10 = vnez %v9541_v53 }
 0x26d   : > { %6683 = vmatmul.mubr.msk.f32.vlgmr.msra.gmra.mrb[4].mxu0 %vm9759_vm15, %v8560_v17  ;;  %vm9760_vm8 = vmmov %vm9754_vm5 }
 0x26e   : > { %6688 = vmatpush1.msk.msra.mxu0 %vm9754_vm5, %v4271_v45  ;;  %6695 = vmatpush1.msk.msra.mxu1 %vm9760_vm8, %v4726_v52  ;;  %vm646_vm14 = vmand %vm9762_vm13, %vm9761_vm10  ;;  %vm9769_vm8 = vcmask 31744   ;;  %vm9773_vm10 = vcmp.le.s32.totalorder %v9666_v26, 30  ;;  %v4688_v35 = vpop.permute.xlu0 %4687  ;;  %v6917_v45 = vld [vmem:[%s7258_s30 + $0x8] sm:$0xff] }
 0x26f   : > { %vm8668_vm15 = vmand %vm9764_vm12, %vm9763_vm6  ;;  %4585 = vmatprep.mubr.f32.mxu0 %v9472_v21  ;;  %6696 = vmatmul.mubr.msk.f32.vlgmr.msra.gmra.mrb[6].mxu1 %vm9769_vm8, %v6693_v19  ;;  %vm9771_vm12 = vcmask 1043456   ;;  %v9810_v52 = vld [vmem:[#allocation12_spill] sm:$0xff] }
 0x270   : > { %vm9768_vm5 = vmmov %vm9767_vm0  ;;  %4975 = vmatprep.mubr.f32.mxu1 %v9472_v21  ;;  %v4728_v3 = vsel %vm8668_vm15, %v4702_v28, 0.0  ;;  %vm9772_vm0 = vnez %v9653_v60  ;;  %v6919_v28 = vld [vmem:[%s7258_s30 + $0x18] sm:$0xff] }
 0x271   : > { %v4701_v22 = vsel %vm9768_vm5, %v4682_v39, %v4684_v59  ;;  %vm9770_vm13 = vmmov %vm9769_vm8  ;;  %vm9777_vm8 = vcmp.lt.s32.totalorder %v7452_v44, 95  ;;  %v5166_v39 = vld [vmem:[#allocation8] sm:$0x3] }
 0x272   : > { %v4729_v36 = vsel %vm646_vm14, %v4701_v22, 0.0  ;;  %6689 = vmatmul.mubr.msk.f32.vlgmr.msra.gmra.mrb[6].mxu0 %vm9770_vm13, %v8560_v17  ;;  %vm648_vm6 = vmand %vm9773_vm10, %vm9772_vm0  ;;  %vm9774_vm14 = vcmp.le.s32.totalorder %v7599_v50, 30  ;;  %v4700_v38 = vsel %vm9777_vm8, %v4684_v59, %v4686_v2  ;;  %vm9780_vm10 = vcmp.le.s32.totalorder %v7777_v32, 30  ;;  %v4692_v25 = vpop.permute.xlu0 %4691  ;;  %v9818_v59 = vld [vmem:[#allocation15_spill] sm:$0xff]  ;;  %v9822_v22 = vld [vmem:[#allocation14_spill] sm:$0xff] }
 0x273   : > { %6697 = vmatprep.subr.msk.mxu0 %vm9771_vm12, %v4729_v36  ;;  %4904 = vmatprep.mubr.f32.mxu0 %v9472_v21  ;;  %vm8693_vm5 = vmand %vm9774_vm14, %vm9657_vm2  ;;  %vm9783_vm14 = vcmask 31744  }
 0x274   : > { %vm9778_vm15 = vmmov %vm9771_vm12  ;;  %v4730_v0 = vsel %vm8693_vm5, %v4700_v38, 0.0  ;;  %vm9795_vm5 = vcmp.lt.s32.totalorder %v7452_v44, 95 }
 0x275   : > { %6698 = vmatpush1.msk.msra.mxu0 %vm9778_vm15, %v4728_v3  ;;  %vm9779_vm13 = vmmov %vm9777_vm8  ;;  %vm9784_vm8 = vcmp.le.s32.totalorder %v7633_v48, 30  ;;  %v4698_v14 = vsel %vm9795_vm5, %v4688_v35, %v4690_v56 }
 0x276   : > { %v4699_v49 = vsel %vm9779_vm13, %v4686_v2, %v4688_v35  ;;  %vm8706_vm12 = vmand %vm9780_vm10, %vm9696_vm1  ;;  %6699 = vmatmul.mubr.msk.f32.vlgmr.msra.gmra.mrb[4].mxu0 %vm9783_vm14, %v6693_v19  ;;  %vm9787_vm13 = vcmask 1043456   ;;  %vm9788_vm10 = vnez %v9533_v15  ;;  %vm9789_vm1 = vcmp.le.s32.totalorder %v7607_v55, 30  ;;  %v4694_v55 = vpop.permute.xlu1 %4693  ;;  %v6920_v2 = vld [vmem:[%s7277_s10] sm:$0xf] }
 0x277   : > { %v4731_v61 = vsel %vm648_vm6, %v4699_v49, 0.0  ;;  %vm8715_vm15 = vmand %vm9784_vm8, %vm8051_vm9  ;;  %5046 = vmatprep.mubr.f32.mxu0 %v9472_v21  ;;  %vm9792_vm14 = vcmp.le.s32.totalorder %v7790_v30, 30  ;;  %v5165_v49 = vld [vmem:[#allocation6] sm:$0x3] }
 0x278   : > { %6700 = vmatprep.subr.msk.mxu1 %vm9787_vm13, %v4731_v61  ;;  %vm8726_vm6 = vmand %vm9789_vm1, %vm9788_vm10 }
 0x279   : > { %vm8735_vm8 = vmand %vm9792_vm14, %vm9695_vm3  ;;  %6701 = vmatpush1.msk.msra.mxu1 %vm9787_vm13, %v4730_v0  ;;  %vm9799_vm14 = vcmask 31744  }
 0x27a   : > { %vm9796_vm1 = vmmov %vm9795_vm5  ;;  %6702 = vmatmul.mubr.msk.f32.vlgmr.msra.gmra.mrb[8].mxu1 %vm9799_vm14, %v6693_v19  ;;  %v4732_v24 = vsel %vm8735_vm8, %v4698_v14, 0.0 }
 0x27b   : > { %v4697_v13 = vsel %vm9796_vm1, %v4690_v56, %v4692_v25  ;;  %vm9797_vm10 = vmmov %vm9796_vm1  ;;  %5117 = vmatprep.mubr.f32.mxu1 %v9472_v21 }
 0x27c   : > { %v4696_v11 = vsel %vm9797_vm10, %v4692_v25, %v4694_v55  ;;  %vm9798_vm9 = vmmov %vm9796_vm1  ;;  %v4733_v6 = vsel %vm8706_vm12, %v4697_v13, 0.0 }
 0x27d   : > { %v4705_v20 = vsel %vm9798_vm9, %v4694_v55, %v4676_v51  ;;  %v4734_v62 = vsel %vm8715_vm15, %v4696_v11, 0.0  ;;  %vm9800_vm10 = vmmov %vm9787_vm13  ;;  %v6915_v51 = vld [vmem:[%s7258_s30] sm:$0xff] }
 0x27e   : > { %v4735_v54 = vsel %vm8726_vm6, %v4705_v20, 0.0  ;;  %6703 = vmatprep.subr.msk.mxu0 %vm9800_vm10, %v4733_v6  ;;  %vm9801_vm9 = vmmov %vm9800_vm10 }
 0x27f   : > { %6706 = vmatprep.subr.msk.mxu1 %vm9801_vm9, %v4735_v54  ;;  %vm9802_vm5 = vmmov %vm9801_vm9 }
 0x280   : > { %6704 = vmatpush1.msk.msra.mxu0 %vm9802_vm5, %v4732_v24  ;;  %vm9803_vm12 = vmmov %vm9802_vm5 }
 0x281   : > { %6707 = vmatpush1.msk.msra.mxu1 %vm9803_vm12, %v4734_v62  ;;  %vm9804_vm13 = vmmov %vm9799_vm14 }
 0x282   : > { %6705 = vmatmul.mubr.msk.f32.vlgmr.msra.gmra.mrb[6].mxu0 %vm9804_vm13, %v6693_v19  ;;  %vm9805_vm15 = vmmov %vm9804_vm13 }
 0x283   : > { %6708 = vmatmul.mubr.msk.f32.vlgmr.msra.gmra.mrb[10].mxu1 %vm9805_vm15, %v6693_v19  ;;  %vm9806_vm6 = vmmov %vm9802_vm5  ;;  %5234 = vmatprep.mubr.f32.mxu0 %v9472_v21  ;;  %v6918_v19 = vld [vmem:[%s7258_s30 + $0x10] sm:$0xff]  ;;  %s6550_s30 = sld [smem:[#allocation2 + $0x1]] }
 0x284   : > { %6709 = vmatprep.subr.msk.mxu0 %vm9806_vm6, %v6915_v51  ;;  %vm9807_vm8 = vmmov %vm9802_vm5 }
 0x285   : > { %6710 = vmatpush1.msk.msra.mxu0 %vm9807_vm8, %v6916_v33  ;;  %vm9808_vm1 = vmmov %vm9802_vm5 }
 0x286   : > { %6712 = vmatprep.subr.msk.mxu0 %vm9808_vm1, %v6917_v45  ;;  %vm9809_vm14 = vmmov %vm9804_vm13 }
 0x287   : > { %6711 = vmatmul.mubr.msk.f32.vlgmr.msra.gmra.mrb[8].mxu0 %vm9809_vm14, %v5166_v39  ;;  %vm9811_vm10 = vmmov %vm9808_vm1 }
 0x288   : > { %6713 = vmatpush1.msk.msra.mxu0 %vm9811_vm10, %v9810_v52  ;;  %5305 = vmatprep.mubr.f32.mxu0 %v9472_v21  ;;  %vm9812_vm9 = vmmov %vm9808_vm1 }
 0x289   : > { %6715 = vmatprep.subr.msk.mxu0 %vm9812_vm9, %v6918_v19  ;;  %vm9813_vm5 = vmmov %vm9804_vm13  ;;  %v5144_v36 = vstv %s6550_s30 }
 0x28a   : > { %vm9815_vm12 = vmmov %vm9808_vm1 }
 0x28b   : > { %6714 = vmatmul.mubr.msk.f32.vlgmr.msra.gmra.mrb[10].mxu0 %vm9813_vm5, %v5166_v39  ;;  %vm9816_vm13 = vmmov %vm9808_vm1 }
 0x28c   : > { %6716 = vmatpush1.msk.msra.mxu0 %vm9815_vm12, %v9814_v37  ;;  %5376 = vmatprep.mubr.f32.mxu0 %v9472_v21  ;;  %vm9817_vm15 = vmmov %vm9813_vm5 }
 0x28d   : > { %6718 = vmatprep.subr.msk.mxu0 %vm9816_vm13, %v6919_v28  ;;  %vm9819_vm6 = vmmov %vm9808_vm1 }
 0x28e   : > { %vm9820_vm8 = vmmov %vm9808_vm1 }
 0x28f   : > { %6717 = vmatmul.mubr.msk.f32.vlgmr.msra.gmra.mrb[12].mxu0 %vm9817_vm15, %v5166_v39  ;;  %vm9821_vm1 = vmmov %vm9813_vm5 }
 0x290   : > { %6719 = vmatpush1.msk.msra.mxu0 %vm9819_vm6, %v9818_v59  ;;  %5447 = vmatprep.mubr.f32.mxu0 %v9472_v21  ;;  %vm9823_vm14 = vmmov %vm9819_vm6 }
 0x291   : > { %6721 = vmatprep.subr.msk.mxu0 %vm9820_vm8, %v6920_v2  ;;  %vm9824_vm10 = vmmov %vm9821_vm1 }
 0x292   : > { %vm9825_vm12 = vmmov %vm9819_vm6 }
 0x293   : > { %6720 = vmatmul.mubr.msk.f32.vlgmr.msra.gmra.mrb[14].mxu0 %vm9821_vm1, %v5166_v39  ;;  %vm9826_vm13 = vmmov %vm9819_vm6 }
 0x294   : > { %6722 = vmatpush1.msk.msra.mxu0 %vm9823_vm14, %v9822_v22  ;;  %5518 = vmatprep.mubr.f32.mxu0 %v9472_v21  ;;  %vm9827_vm8 = vmmov %vm9821_vm1 }
 0x297   : > { %6723 = vmatmul.mubr.msk.f32.vlgmr.msra.gmra.mrb[16].mxu0 %vm9824_vm10, %v5166_v39  ;;  %vm9828_vm10 = vmmov %vm9825_vm12 }
 0x298   : > { %5622 = vmatprep.mubr.f32.mxu0 %v9472_v21 }
 0x342   : > { %v4835_v3 = vpop.f32.mrb[6].mxu1 }
 0x343   : > { %v5145_v17 = vmul.f32 %v5144_v36, %v4835_v3  ;;  %v4837_v38 = vpop.f32.mrb[7].mxu1  ;;  %vm5134_vm9 = vcmp.ge.f32.partialorder %v4835_v3, 0.0 }
 0x344   : > { %vm5135_vm5 = vcmp.ge.f32.partialorder %v4837_v38, 0.0  ;;  %v5146_v35 = vmul.f32 %v5144_v36, %v4837_v38 }
 0x345   : > { %v5155_v1 = vsel %vm5134_vm9, %v4835_v3, %v5145_v17  ;;  %vm9829_vm9 = vmmov %vm9828_vm10 }
 0x346   : > { %v5156_v56 = vsel %vm5135_vm5, %v4837_v38, %v5146_v35  ;;  %vm9830_vm5 = vmmov %vm9827_vm8 }
 0x347   : > { %6724 = vmatprep.subr.msk.mxu0 %vm9825_vm12, %v5156_v56  ;;  %vm9831_vm12 = vmmov %vm9829_vm9 }
 0x348   : > { %6725 = vmatpush1.msk.msra.mxu0 %vm9826_vm13, %v5155_v1 }
 0x349   : > { %v4906_v61 = vpop.f32.mrb[4].mxu0  ;;  %6726 = vmatmul.mubr.msk.f32.vlgmr.msra.gmra.mrb[8].mxu0 %vm9827_vm8, %v5165_v49 }
 0x34a   : > { %v5147_v58 = vmul.f32 %v5144_v36, %v4906_v61  ;;  %v4908_v0 = vpop.f32.mrb[5].mxu0  ;;  %vm5136_vm15 = vcmp.ge.f32.partialorder %v4906_v61, 0.0  ;;  %5693 = vmatprep.mubr.f32.mxu0 %v9472_v21 }
 0x34b   : > { %vm5137_vm6 = vcmp.ge.f32.partialorder %v4908_v0, 0.0  ;;  %v5148_v7 = vmul.f32 %v5144_v36, %v4908_v0 }
 0x34c   : > { %v5157_v13 = vsel %vm5136_vm15, %v4906_v61, %v5147_v58 }
 0x34d   : > { %v4977_v47 = vpop.f32.mrb[8].mxu1  ;;  %v5158_v55 = vsel %vm5137_vm6, %v4908_v0, %v5148_v7  ;;  %vm9832_vm6 = vmmov %vm9829_vm9 }
 0x34e   : > { %v5149_v14 = vmul.f32 %v5144_v36, %v4977_v47  ;;  %v4979_v25 = vpop.f32.mrb[9].mxu1  ;;  %vm5138_vm1 = vcmp.ge.f32.partialorder %v4977_v47, 0.0  ;;  %6727 = vmatprep.subr.msk.mxu0 %vm9828_vm10, %v5158_v55  ;;  %vm9833_vm10 = vmmov %vm9830_vm5 }
 0x34f   : > { %vm5139_vm14 = vcmp.ge.f32.partialorder %v4979_v25, 0.0  ;;  %v5150_v11 = vmul.f32 %v5144_v36, %v4979_v25  ;;  %6728 = vmatpush1.msk.msra.mxu0 %vm9829_vm9, %v5157_v13  ;;  %vm9835_vm9 = vmmov %vm9832_vm6 }
 0x350   : > { %6729 = vmatmul.mubr.msk.f32.vlgmr.msra.gmra.mrb[10].mxu0 %vm9830_vm5, %v5165_v49  ;;  %v5159_v54 = vsel %vm5138_vm1, %v4977_v47, %v5149_v14  ;;  %vm9836_vm5 = vmmov %vm9832_vm6 }
 0x351   : > { %v5160_v62 = vsel %vm5139_vm14, %v4979_v25, %v5150_v11  ;;  %5764 = vmatprep.mubr.f32.mxu0 %v9472_v21  ;;  %vm9834_vm14 = vmmov %vm9832_vm6 }
 0x352   : > { %6730 = vmatprep.subr.msk.mxu0 %vm9831_vm12, %v5160_v62  ;;  %vm9837_vm12 = vmmov %vm9833_vm10 }
 0x353   : > { %6731 = vmatpush1.msk.msra.mxu0 %vm9832_vm6, %v5159_v54  ;;  %vm9838_vm6 = vmmov %vm9836_vm5 }
 0x354   : > { %6732 = vmatmul.mubr.msk.f32.vlgmr.msra.gmra.mrb[12].mxu0 %vm9833_vm10, %v5165_v49 }
 0x355   : > { %v5048_v20 = vpop.f32.mrb[6].mxu0  ;;  %5835 = vmatprep.mubr.f32.mxu0 %v9472_v21 }
 0x356   : > { %v5119_v6 = vpop.f32.mrb[10].mxu1  ;;  %v5151_v24 = vmul.f32 %v5144_v36, %v5048_v20  ;;  %v5050_v51 = vpop.f32.mrb[7].mxu0  ;;  %vm5140_vm13 = vcmp.ge.f32.partialorder %v5048_v20, 0.0 }
 0x357   : > { %v5121_v39 = vpop.f32.mrb[11].mxu1  ;;  %vm5141_vm15 = vcmp.ge.f32.partialorder %v5050_v51, 0.0  ;;  %v5152_v33 = vmul.f32 %v5144_v36, %v5050_v51  ;;  %v5153_v52 = vmul.f32 %v5144_v36, %v5119_v6  ;;  %vm5142_vm1 = vcmp.ge.f32.partialorder %v5119_v6, 0.0 }
 0x358   : > { %v5154_v45 = vmul.f32 %v5144_v36, %v5121_v39  ;;  %vm5143_vm8 = vcmp.ge.f32.partialorder %v5121_v39, 0.0  ;;  %v5161_v37 = vsel %vm5140_vm13, %v5048_v20, %v5151_v24  ;;  %vm9839_vm13 = vcmp.lt.s32.totalorder %v7452_v44, 1 }
 0x359   : > { %v5162_v19 = vsel %vm5141_vm15, %v5050_v51, %v5152_v33  ;;  %v5163_v59 = vsel %vm5142_vm1, %v5119_v6, %v5153_v52  ;;  %vm9840_vm15 = vcmp.lt.s32.totalorder %v7452_v44, 127  ;;  %vm9844_vm1 = vnez %v9486_v40 }
 0x35a   : > { %6733 = vmatprep.subr.msk.mxu0 %vm9834_vm14, %v5162_v19  ;;  %v5164_v28 = vsel %vm5143_vm8, %v5121_v39, %v5154_v45  ;;  %vm9843_vm8 = vmmov %vm9840_vm15 }
 0x35b   : > { %6734 = vmatpush1.msk.msra.mxu0 %vm9835_vm9, %v5161_v37  ;;  %vm9846_vm14 = vmmov %vm9843_vm8  ;;  %vm9847_vm9 = vnez %v9548_v5 }
 0x35c   : > { %6736 = vmatprep.subr.msk.mxu0 %vm9836_vm5, %v5164_v28  ;;  %6735 = vmatmul.mubr.msk.f32.vlgmr.msra.gmra.mrb[14].mxu0 %vm9837_vm12, %v5165_v49  ;;  %vm9849_vm12 = vnez %v9460_v27 }
 0x35d   : > { %6737 = vmatpush1.msk.msra.mxu0 %vm9838_vm6, %v5163_v59  ;;  %5906 = vmatprep.mubr.f32.mxu0 %v9472_v21  ;;  %vm9850_vm6 = vmmov %vm9843_vm8 }
 0x360   : > { %6738 = vmatmul.mubr.msk.f32.vlgmr.msra.gmra.mrb[16].mxu0 %vm9833_vm10, %v5165_v49  ;;  %vm9851_vm10 = vnez %v9541_v53 }
 0x41c   : > { %v8814_v2 = vpop.f32.mrb[8].mxu0 }
 0x41d   : > { %5923 = vrot.lane.b32.xlu0 %v8814_v2, %s7059_s18  ;;  %v5626_v22 = vpop.f32.mrb[9].mxu0  ;;  %v8888_v20 = vmul.f32 0.75, %v8814_v2 }
 0x41e   : > { %5925 = vrot.lane.b32.xlu1 %v5626_v22, %s7059_s18  ;;  %v5914_v7 = vmul.f32 0.75, %v5626_v22 }
 0x421   : > { %5983 = vrot.lane.b32.xlu0 %v8814_v2, %s7063_s17 }
 0x422   : > { %5985 = vrot.lane.b32.xlu1 %v5626_v22, %s7063_s17 }
 0x423   : > { %v8821_v36 = vpop.f32.mrb[10].mxu0 }
 0x424   : > { %v8824_v3 = vpop.f32.mrb[11].mxu0  ;;  %v5915_v51 = vmul.f32 0.75, %v8821_v36 }
 0x425   : > { %5927 = vrot.lane.b32.xlu0 %v8821_v36, %s7059_s18 }
 0x426   : > { %5929 = vrot.lane.b32.xlu1 %v8824_v3, %s7059_s18 }
 0x427   : > { %v8828_v21 = vpop.f32.mrb[12].mxu0 }
 0x428   : > { %v8832_v17 = vpop.f32.mrb[13].mxu0 }
 0x429   : > { %5987 = vrot.lane.b32.xlu0 %v8821_v36, %s7063_s17 }
 0x42a   : > { %5989 = vrot.lane.b32.xlu1 %v8824_v3, %s7063_s17 }
 0x42d   : > { %5931 = vrot.lane.b32.xlu0 %v8828_v21, %s7059_s18 }
 0x42e   : > { %5933 = vrot.lane.b32.xlu1 %v8832_v17, %s7059_s18 }
 0x42f   : > { %v8836_v38 = vpop.f32.mrb[14].mxu0 }
 0x430   : > { %v8840_v35 = vpop.f32.mrb[15].mxu0 }
 0x431   : > { %5991 = vrot.lane.b32.xlu0 %v8828_v21, %s7063_s17 }
 0x432   : > { %5993 = vrot.lane.b32.xlu1 %v8832_v17, %s7063_s17 }
 0x433   : > { %v8844_v56 = vpop.f32.mrb[16].mxu0 }
 0x434   : > { %v8848_v49 = vpop.f32.mrb[17].mxu0 }
 0x435   : > { %5935 = vrot.lane.b32.xlu0 %v8836_v38, %s7059_s18 }
 0x436   : > { %5937 = vrot.lane.b32.xlu1 %v8840_v35, %s7059_s18 }
 0x439   : > { %5995 = vrot.lane.b32.xlu0 %v8836_v38, %s7063_s17 }
 0x43a   : > { %5997 = vrot.lane.b32.xlu1 %v8840_v35, %s7063_s17 }
 0x43d   : > { %5939 = vrot.lane.b32.xlu0 %v8844_v56, %s7059_s18 }
 0x43e   : > { %5941 = vrot.lane.b32.xlu1 %v8848_v49, %s7059_s18  ;;  %s9107_s18 = scalar_lea.vmem %s9336_s8, %s6745_s9 }
 0x441   : > { %5999 = vrot.lane.b32.xlu0 %v8844_v56, %s7063_s17 }
 0x442   : > { %6001 = vrot.lane.b32.xlu1 %v8848_v49, %s7063_s17 }
 0x48f   : > { %v8870_v1 = vpop.permute.xlu0 %5923 }
 0x490   : > { %v5926_v61 = vpop.permute.xlu1 %5925 }
 0x491   : > { %v5951_v58 = vsel %vm9839_vm13, %v8870_v1, %v5926_v61 }
 0x492   : > { %v5954_v0 = vsel %vm7649_vm7, %v5951_v58, %v5626_v22  ;;  %vm9841_vm7 = vmmov %vm9839_vm13 }
 0x493   : > { %v5964_v47 = vmul.f32 0.25, %v5954_v0  ;;  %v8877_v14 = vpop.permute.xlu0 %5983 }
 0x494   : > { %v5986_v25 = vpop.permute.xlu1 %5985 }
 0x495   : > { %v8879_v55 = vadd.f32 %v5964_v47, %v5914_v7  ;;  %v6011_v13 = vsel %vm9840_vm15, %v8877_v14, %v5986_v25  ;;  %vm9853_vm15 = vmmov %vm9850_vm6 }
 0x496   : > { %v6013_v11 = vsel %vm9752_vm4, %v6011_v13, %v8814_v2  ;;  %vm9842_vm4 = vmmov %vm9841_vm7 }
 0x497   : > { %v6023_v29 = vmul.f32 0.25, %v6013_v11  ;;  %v5928_v6 = vpop.permute.xlu0 %5927  ;;  %6159 = vrot.lane.b32.xlu0 %v8879_v55, %s7065_s12  ;;  %6061 = vrot.lane.b32.xlu1 %v8879_v55, %s7060_s20  ;;  %vm9848_vm5 = vmmov %vm9842_vm4 }
 0x498   : > { %v5950_v62 = vsel %vm9841_vm7, %v5926_v61, %v5928_v6  ;;  %v5930_v54 = vpop.permute.xlu1 %5929  ;;  %vm9852_vm13 = vmmov %vm9842_vm4  ;;  %vm9854_vm7 = vnez %v9458_v46  ;;  %v5918_v46 = vmul.f32 0.75, %v8832_v17 }
 0x499   : > { %v6033_v24 = vadd.f32 %v6023_v29, %v8888_v20  ;;  %v5955_v63 = vsel %vm9697_vm11, %v5950_v62, %v8821_v36  ;;  %v5949_v33 = vsel %vm9842_vm4, %v5928_v6, %v5930_v54  ;;  %vm9845_vm11 = vnez %v9476_v42 }
 0x49a   : > { %v5965_v39 = vmul.f32 0.25, %v5955_v63  ;;  %v5956_v57 = vsel %vm9844_vm1, %v5949_v33, %v8824_v3  ;;  %v5917_v62 = vmul.f32 0.75, %v8828_v21  ;;  %vm9857_vm1 = vmmov %vm9842_vm4 }
 0x49b   : > { %v5988_v45 = vpop.permute.xlu0 %5987  ;;  %6109 = vrot.lane.b32.xlu1 %v6033_v24, %s7060_s20  ;;  %v5966_v40 = vmul.f32 0.25, %v5956_v57 }
 0x49c   : > { %v8904_v52 = vadd.f32 %v5965_v39, %v5915_v51  ;;  %v6010_v19 = vsel %vm9843_vm8, %v5986_v25, %v5988_v45  ;;  %v5990_v37 = vpop.permute.xlu1 %5989  ;;  %v5916_v25 = vmul.f32 0.75, %v8824_v3  ;;  %vm9855_vm8 = vnez %v9522_v10 }
 0x49d   : > { %v6014_v28 = vsel %vm9845_vm11, %v6010_v19, %v5626_v22  ;;  %v6009_v59 = vsel %vm9846_vm14, %v5988_v45, %v5990_v37  ;;  %vm9859_vm11 = vnez %v9501_v34  ;;  %vm9860_vm14 = vmmov %vm9857_vm1 }
 0x49e   : > { %v6024_v61 = vmul.f32 0.25, %v6014_v28  ;;  %v6015_v58 = vsel %vm9847_vm9, %v6009_v59, %v8821_v36  ;;  %6063 = vrot.lane.b32.xlu0 %v8904_v52, %s7060_s20  ;;  %vm9861_vm9 = vnez %v9479_v23 }
 0x49f   : > { %v5932_v0 = vpop.permute.xlu0 %5931  ;;  %6161 = vrot.lane.b32.xlu1 %v8904_v52, %s7065_s12  ;;  %v6025_v22 = vmul.f32 0.25, %v6015_v58 }
 0x4a0   : > { %v8922_v47 = vadd.f32 %v6024_v61, %v5914_v7  ;;  %v5948_v42 = vsel %vm9848_vm5, %v5930_v54, %v5932_v0  ;;  %v5934_v36 = vpop.permute.xlu1 %5933  ;;  %v8934_v7 = vadd.f32 %v5966_v40, %v5916_v25  ;;  %v5919_v40 = vmul.f32 0.75, %v8836_v38 }
 0x4a1   : > { %v5957_v5 = vsel %vm9849_vm12, %v5948_v42, %v8828_v21  ;;  %v8938_v29 = vadd.f32 %v6025_v22, %v5915_v51  ;;  %v5947_v51 = vsel %vm9852_vm13, %v5932_v0, %v5934_v36  ;;  %vm9863_vm5 = vnez %v9559_v43  ;;  %vm9864_vm12 = vmmov %vm9857_vm1 }
 0x4a2   : > { %6111 = vrot.lane.b32.xlu0 %v8922_v47, %s7060_s20  ;;  %v5967_v6 = vmul.f32 0.25, %v5957_v5  ;;  %vm9867_vm13 = vmmov %vm9857_vm1 }
 0x4a3   : > { %v5992_v13 = vpop.permute.xlu0 %5991  ;;  %6209 = vrot.lane.b32.xlu1 %v8922_v47, %s7065_s12 }
 0x4a4   : > { %v6008_v11 = vsel %vm9850_vm6, %v5990_v37, %v5992_v13  ;;  %v5994_v54 = vpop.permute.xlu1 %5993  ;;  %v8948_v24 = vadd.f32 %v5967_v6, %v5917_v62 }
 0x4a5   : > { %v6016_v27 = vsel %vm9851_vm10, %v6008_v11, %v8824_v3  ;;  %v6007_v53 = vsel %vm9853_vm15, %v5992_v13, %v5994_v54  ;;  %v5958_v3 = vsel %vm9854_vm7, %v5947_v51, %v8832_v17  ;;  %vm9866_vm10 = vnez %v9462_v4 }
 0x4a6   : > { %6163 = vrot.lane.b32.xlu0 %v8934_v7, %s7065_s12  ;;  %v6026_v63 = vmul.f32 0.25, %v6016_v27  ;;  %v6017_v45 = vsel %vm9657_vm2, %v6007_v53, %v8828_v21  ;;  %v5968_v37 = vmul.f32 0.25, %v5958_v3  ;;  %vm9856_vm2 = vmmov %vm9850_vm6  ;;  %vm9868_vm15 = vnez %v9567_v16 }
 0x4a7   : > { %6113 = vrot.lane.b32.xlu1 %v8938_v29, %s7060_s20  ;;  %v5936_v39 = vpop.permute.xlu0 %5935  ;;  %v6027_v28 = vmul.f32 0.25, %v6017_v45 }
 0x4a8   : > { %v8961_v33 = vadd.f32 %v6026_v63, %v5916_v25  ;;  %v5946_v19 = vsel %vm9842_vm4, %v5934_v36, %v5936_v39  ;;  %v5938_v31 = vpop.permute.xlu1 %5937  ;;  %v8982_v61 = vadd.f32 %v5968_v37, %v5918_v46  ;;  %v5920_v63 = vmul.f32 0.75, %v8840_v35 }
 0x4a9   : > { %v5959_v59 = vsel %vm9855_vm8, %v5946_v19, %v8836_v38  ;;  %v8984_v58 = vadd.f32 %v6027_v28, %v5917_v62  ;;  %v5945_v36 = vsel %vm9857_vm1, %v5936_v39, %v5938_v31  ;;  %v5921_v19 = vmul.f32 0.75, %v8844_v56 }
 0x4aa   : > { %6211 = vrot.lane.b32.xlu0 %v8938_v29, %s7065_s12  ;;  %v5969_v0 = vmul.f32 0.25, %v5959_v59  ;;  %vm9870_vm4 = vnez %v9467_v8  ;;  %vm9871_vm8 = vnez %v9533_v15  ;;  %v5922_v8 = vmul.f32 0.75, %v8848_v49 }
 0x4ab   : > { %6165 = vrot.lane.b32.xlu1 %v8948_v24, %s7065_s12  ;;  %v5996_v57 = vpop.permute.xlu0 %5995  ;;  %vm9873_vm1 = vcmp.ge.s32.totalorder %v7540_v9, 1 }
 0x4ac   : > { %v6006_v21 = vsel %vm9856_vm2, %v5994_v54, %v5996_v57  ;;  %v5998_v42 = vpop.permute.xlu1 %5997  ;;  %v8994_v22 = vadd.f32 %v5969_v0, %v5919_v40 }
 0x4ad   : > { %v6018_v10 = vsel %vm9772_vm0, %v6006_v21, %v8832_v17  ;;  %vm9858_vm0 = vmmov %vm9856_vm2  ;;  %v5960_v17 = vsel %vm9859_vm11, %v5945_v36, %v8840_v35  ;;  %vm9872_vm2 = vcmp.lt.s32.totalorder %v7452_v44, 32  ;;  %vm9875_vm11 = vcmp.le.s32.totalorder %v9656_v18, 30 }
 0x4ae   : > { %6065 = vrot.lane.b32.xlu0 %v8934_v7, %s7060_s20  ;;  %v6028_v25 = vmul.f32 0.25, %v6018_v10  ;;  %v6005_v60 = vsel %vm9858_vm0, %v5996_v57, %v5998_v42  ;;  %v5970_v54 = vmul.f32 0.25, %v5960_v17  ;;  %vm9865_vm6 = vmmov %vm9858_vm0  ;;  %v6044_v17 = vmul.f32 0.75, %v8904_v52 }
 0x4af   : > { %6213 = vrot.lane.b32.xlu1 %v8961_v33, %s7065_s12  ;;  %v5940_v5 = vpop.permute.xlu0 %5939  ;;  %v6019_v11 = vsel %vm9695_vm3, %v6005_v60, %v8836_v38  ;;  %vm9862_vm3 = vmmov %vm9858_vm0 }
 0x4b0   : > { %v9007_v13 = vadd.f32 %v6028_v25, %v5918_v46  ;;  %v5942_v6 = vpop.permute.xlu1 %5941  ;;  %v5944_v27 = vsel %vm9860_vm14, %v5938_v31, %v5940_v5  ;;  %v6029_v34 = vmul.f32 0.25, %v6019_v11  ;;  %v9028_v51 = vadd.f32 %v5970_v54, %v5920_v63  ;;  %vm9869_vm7 = vmmov %vm9858_vm0 }
 0x4b1   : > { %v5961_v41 = vsel %vm9861_vm9, %v5944_v27, %v8844_v56  ;;  %v5952_v45 = vsel %vm9864_vm12, %v5942_v6, %v8870_v1  ;;  %vm9874_vm0 = vcmp.lt.s32.totalorder %v7452_v44, 96  ;;  %v9110_v27 = vmul.f32 0.75, %v8879_v55  ;;  %vm9876_vm14 = vmmov %vm9872_vm2 }
 0x4b2   : > { %6115 = vrot.lane.b32.xlu0 %v8961_v33, %s7060_s20  ;;  %v9030_v53 = vadd.f32 %v6029_v34, %v5919_v40  ;;  %v5971_v3 = vmul.f32 0.25, %v5961_v41  ;;  %v5953_v43 = vsel %vm9866_vm10, %v5952_v45, %v8814_v2  ;;  %vm9877_vm9 = vcmp.ge.s32.totalorder %v9656_v18, 1  ;;  %vm9880_vm12 = vmmov %vm9872_vm2 }
 0x4b3   : > { %6067 = vrot.lane.b32.xlu1 %v8948_v24, %s7060_s20  ;;  %v6000_v62 = vpop.permute.xlu0 %5999  ;;  %v5963_v59 = vmul.f32 0.25, %v5953_v43  ;;  %vm9882_vm10 = vmmov %vm9874_vm0 }
 0x4b4   : > { %v6004_v38 = vsel %vm9862_vm3, %v5998_v42, %v6000_v62  ;;  %v6002_v39 = vpop.permute.xlu1 %6001  ;;  %v9045_v28 = vadd.f32 %v5971_v3, %v5921_v19  ;;  %v6051_v3 = vmul.f32 0.75, %v8922_v47  ;;  %vm9878_vm3 = vmmov %vm9874_vm0 }
 0x4b5   : > { %v6020_v23 = vsel %vm9863_vm5, %v6004_v38, %v8840_v35  ;;  %v6003_v37 = vsel %vm9865_vm6, %v6000_v62, %v6002_v39  ;;  %v5943_v35 = vsel %vm9867_vm13, %v5940_v5, %v5942_v6  ;;  %v6012_v46 = vsel %vm9869_vm7, %v6002_v39, %v8877_v14  ;;  %vm9881_vm6 = vmmov %vm9873_vm1 }
 0x4b6   : > { %6167 = vrot.lane.b32.xlu0 %v8982_v61, %s7065_s12  ;;  %v6030_v57 = vmul.f32 0.25, %v6020_v23  ;;  %v6021_v1 = vsel %vm9868_vm15, %v6003_v37, %v8844_v56  ;;  %v5962_v2 = vsel %vm9870_vm4, %v5943_v35, %v8848_v49  ;;  %v6022_v16 = vsel %vm9871_vm8, %v6012_v46, %v8848_v49  ;;  %vm9883_vm13 = vmmov %vm9875_vm11 }
 0x4b7   : > { %6117 = vrot.lane.b32.xlu1 %v8984_v58, %s7060_s20  ;;  %v6031_v31 = vmul.f32 0.25, %v6021_v1  ;;  %v5972_v56 = vmul.f32 0.25, %v5962_v2  ;;  %v5973_v14 = vadd.f32 %v5963_v59, %v8888_v20  ;;  %v6032_v21 = vmul.f32 0.25, %v6022_v16  ;;  %vm9884_vm15 = vmmov %vm9874_vm0 }
 0x4b8   : > { %v9062_v4 = vadd.f32 %v6030_v57, %v5920_v63  ;;  %vm9879_vm5 = vcmp.le.s32.totalorder %v7540_v9, 30  ;;  %vm9885_vm7 = vcmp.le.s32.totalorder %v7542_v12, 30  ;;  %vm9886_vm4 = vmmov %vm9872_vm2  ;;  %vm9887_vm8 = vcmp.ge.s32.totalorder %v7542_v12, 1 }
 0x4b9   : > { %v9075_v0 = vadd.f32 %v6031_v31, %v5921_v19  ;;  %v5982_v15 = vadd.f32 %v5972_v56, %v5922_v8  ;;  %v6042_v10 = vadd.f32 %v6032_v21, %v5922_v8  ;;  %v6052_v31 = vmul.f32 0.75, %v8938_v29 }
 0x4ba   : > { %6215 = vrot.lane.b32.xlu0 %v8984_v58, %s7065_s12 }
 0x4bb   : > { %6169 = vrot.lane.b32.xlu1 %v8994_v22, %s7065_s12 }
 0x4be   : > { %6069 = vrot.lane.b32.xlu0 %v8982_v61, %s7060_s20 }
 0x4bf   : > { %6217 = vrot.lane.b32.xlu1 %v9007_v13, %s7065_s12 }
 0x4c2   : > { %6119 = vrot.lane.b32.xlu0 %v9007_v13, %s7060_s20 }
 0x4c3   : > { %6071 = vrot.lane.b32.xlu1 %v8994_v22, %s7060_s20 }
 0x4c6   : > { %6171 = vrot.lane.b32.xlu0 %v9028_v51, %s7065_s12 }
 0x4c7   : > { %6121 = vrot.lane.b32.xlu1 %v9030_v53, %s7060_s20 }
 0x4ca   : > { %6219 = vrot.lane.b32.xlu0 %v9030_v53, %s7065_s12 }
 0x4cb   : > { %6173 = vrot.lane.b32.xlu1 %v9045_v28, %s7065_s12 }
 0x4ce   : > { %6123 = vrot.lane.b32.xlu0 %v9062_v4, %s7060_s20 }
 0x4cf   : > { %6221 = vrot.lane.b32.xlu1 %v9062_v4, %s7065_s12 }
 0x4d2   : > { %6059 = vrot.lane.b32.xlu0 %v5973_v14, %s7060_s20 }
 0x4d3   : > { %6125 = vrot.lane.b32.xlu1 %v9075_v0, %s7060_s20 }
 0x4d6   : > { %6175 = vrot.lane.b32.xlu0 %v5982_v15, %s7065_s12 }
 0x4d7   : > { %6225 = vrot.lane.b32.xlu1 %v6042_v10, %s7065_s12 }
 0x4da   : > { %6223 = vrot.lane.b32.xlu0 %v9075_v0, %s7065_s12 }
 0x4db   : > { %6075 = vrot.lane.b32.xlu1 %v9045_v28, %s7060_s20 }
 0x4de   : > { %6073 = vrot.lane.b32.xlu0 %v9028_v51, %s7060_s20 }
 0x509   : > { %v9089_v49 = vpop.permute.xlu1 %6061  ;;  %v6160_v20 = vpop.permute.xlu0 %6159 }
 0x50d   : > { %v6110_v40 = vpop.permute.xlu1 %6109 }
 0x510   : > { %v6064_v42 = vpop.permute.xlu0 %6063 }
 0x511   : > { %v6083_v25 = vsel %vm9872_vm2, %v9089_v49, %v6064_v42  ;;  %v6162_v5 = vpop.permute.xlu1 %6161  ;;  %vm9888_vm2 = vmmov %vm9874_vm0 }
 0x512   : > { %v6086_v36 = vsel %vm9873_vm1, %v6083_v25, %v8904_v52  ;;  %v6184_v60 = vsel %vm9874_vm0, %v6160_v20, %v6162_v5  ;;  %vm9889_vm1 = vmmov %vm9879_vm5 }
 0x513   : > { %v6094_v11 = vmul.f32 0.25, %v6086_v36  ;;  %v6185_v6 = vsel %vm9875_vm11, %v6184_v60, %v8879_v55  ;;  %v6045_v36 = vmul.f32 0.75, %v8934_v7  ;;  %vm9890_vm0 = vmmov %vm9886_vm4 }
 0x514   : > { %v6193_v62 = vmul.f32 0.25, %v6185_v6  ;;  %v6112_v54 = vpop.permute.xlu0 %6111  ;;  %vm9891_vm11 = vmmov %vm9887_vm8 }
 0x515   : > { %v6102_v34 = vadd.f32 %v6094_v11, %v6044_v17  ;;  %v6134_v63 = vsel %vm9876_vm14, %v6110_v40, %v6112_v54  ;;  %v6210_v41 = vpop.permute.xlu1 %6209  ;;  %vm9892_vm14 = vmmov %vm9890_vm0 }
 0x516   : > { %v6201_v38 = vadd.f32 %v6193_v62, %v9110_v27  ;;  %v6135_v39 = vsel %vm9877_vm9, %v6134_v63, %v8922_v47  ;;  %vm9893_vm9 = vcmp.ge.s32.totalorder %v7599_v50, 1 }
 0x517   : > { %6260 = vst [vmem:[%s9107_s18 + $0x8] sm:$0x3] %v6102_v34  ;;  %v6143_v23 = vmul.f32 0.25, %v6135_v39 }
 0x518   : > { %v6307_v45 = vrot.slane %v6201_v38, 4  ;;  %v6164_v19 = vpop.permute.xlu0 %6163 }
 0x519   : > { %v6151_v37 = vadd.f32 %v6143_v23, %v6051_v3  ;;  %v6183_v57 = vsel %vm9878_vm3, %v6162_v5, %v6164_v19  ;;  %v6114_v43 = vpop.permute.xlu1 %6113  ;;  %vm9894_vm3 = vmmov %vm9888_vm2 }
 0x51a   : > { %6323 = vst [vmem:[%s9107_s18] sm:$0x30] %v6307_v45  ;;  %v6186_v35 = vsel %vm9879_vm5, %v6183_v57, %v8904_v52  ;;  %v6133_v1 = vsel %vm9880_vm12, %v6112_v54, %v6114_v43  ;;  %vm9895_vm5 = vcmp.le.s32.totalorder %v7599_v50, 30  ;;  %vm9896_vm12 = vmmov %vm9890_vm0 }
 0x51b   : > { %v6275_v46 = vrot.slane %v6151_v37, 6  ;;  %v6194_v59 = vmul.f32 0.25, %v6186_v35  ;;  %v6136_v2 = vsel %vm9881_vm6, %v6133_v1, %v8938_v29  ;;  %v6046_v1 = vmul.f32 0.75, %v8948_v24  ;;  %vm9897_vm6 = vmmov %vm9893_vm9 }
 0x51c   : > { %v6144_v16 = vmul.f32 0.25, %v6136_v2  ;;  %v6212_v56 = vpop.permute.xlu0 %6211 }
 0x51d   : > { %6291 = vst [vmem:[%s9107_s18] sm:$0xc] %v6275_v46  ;;  %v6202_v14 = vadd.f32 %v6194_v59, %v6044_v17  ;;  %v6234_v21 = vsel %vm9882_vm10, %v6210_v41, %v6212_v56  ;;  %v6166_v52 = vpop.permute.xlu1 %6165  ;;  %vm9898_vm10 = vmmov %vm9888_vm2 }
 0x51e   : > { %v6152_v8 = vadd.f32 %v6144_v16, %v6052_v31  ;;  %v6235_v15 = vsel %vm9883_vm13, %v6234_v21, %v8922_v47  ;;  %v6182_v10 = vsel %vm9884_vm15, %v6164_v19, %v6166_v52  ;;  %vm9899_vm13 = vmmov %vm9885_vm7 }
 0x51f   : > { %v6308_v20 = vrot.slane %v6202_v14, 4  ;;  %v6243_v40 = vmul.f32 0.25, %v6235_v15  ;;  %v6187_v25 = vsel %vm9885_vm7, %v6182_v10, %v8934_v7  ;;  %vm9900_vm15 = vmmov %vm9888_vm2  ;;  %vm9901_vm7 = vcmp.le.s32.totalorder %v9666_v26, 30 }
 0x520   : > { %v6276_v5 = vrot.slane %v6152_v8, 6  ;;  %v6195_v60 = vmul.f32 0.25, %v6187_v25  ;;  %v6066_v17 = vpop.permute.xlu0 %6065 }
 0x521   : > { %6324 = vst [vmem:[%s9107_s18 + $0x8] sm:$0x30] %v6308_v20  ;;  %v6251_v11 = vadd.f32 %v6243_v40, %v6051_v3  ;;  %v6082_v47 = vsel %vm9886_vm4, %v6064_v42, %v6066_v17  ;;  %v6214_v6 = vpop.permute.xlu1 %6213  ;;  %v6054_v20 = vmul.f32 0.75, %v8984_v58  ;;  %vm9902_vm4 = vmmov %vm9890_vm0 }
 0x522   : > { %6292 = vst [vmem:[%s9107_s18 + $0x8] sm:$0xc] %v6276_v5  ;;  %v6203_v62 = vadd.f32 %v6195_v60, %v6045_v36  ;;  %v6087_v54 = vsel %vm9887_vm8, %v6082_v47, %v8934_v7  ;;  %v6233_v34 = vsel %vm9888_vm2, %v6212_v56, %v6214_v6  ;;  %vm9903_vm8 = vcmp.ge.s32.totalorder %v9666_v26, 1 }
 0x523   : > { %v6339_v63 = vrot.slane %v6251_v11, 2  ;;  %v6095_v41 = vmul.f32 0.25, %v6087_v54  ;;  %v6236_v38 = vsel %vm9889_vm1, %v6233_v34, %v8938_v29  ;;  %v6053_v29 = vmul.f32 0.75, %v8961_v33  ;;  %vm9904_vm1 = vmmov %vm9895_vm5 }
 0x524   : > { %v6309_v39 = vrot.slane %v6203_v62, 4  ;;  %v6244_v42 = vmul.f32 0.25, %v6236_v38  ;;  %v6116_v3 = vpop.permute.xlu0 %6115  ;;  %v6047_v34 = vmul.f32 0.75, %v8982_v61 }
 0x525   : > { %6355 = vst [vmem:[%s9107_s18] sm:$0xc0] %v6339_v63  ;;  %v6103_v23 = vadd.f32 %v6095_v41, %v6045_v36  ;;  %v6132_v45 = vsel %vm9890_vm0, %v6114_v43, %v6116_v3  ;;  %v6068_v19 = vpop.permute.xlu1 %6067 }
 0x526   : > { %6325 = vst [vmem:[%s9107_s18 + $0x10] sm:$0x30] %v6309_v39  ;;  %v6252_v7 = vadd.f32 %v6244_v42, %v6052_v31  ;;  %v6137_v37 = vsel %vm9891_vm11, %v6132_v45, %v8961_v33  ;;  %v6081_v9 = vsel %vm9892_vm14, %v6066_v17, %v6068_v19  ;;  %vm9905_vm11 = vmmov %vm9903_vm8 }
 0x527   : > { %6261 = vst [vmem:[%s9107_s18 + $0x10] sm:$0x3] %v6103_v23  ;;  %v6145_v57 = vmul.f32 0.25, %v6137_v37  ;;  %v6088_v43 = vsel %vm9893_vm9, %v6081_v9, %v8948_v24  ;;  %vm9906_vm14 = vmmov %vm9890_vm0  ;;  %vm9907_vm9 = vcmp.ge.s32.totalorder %v7790_v30, 1 }
 0x528   : > { %v6340_v35 = vrot.slane %v6252_v7, 2  ;;  %v6096_v46 = vmul.f32 0.25, %v6088_v43  ;;  %v6168_v59 = vpop.permute.xlu0 %6167 }
 0x529   : > { %v6153_v2 = vadd.f32 %v6145_v57, %v6053_v29  ;;  %v6181_v31 = vsel %vm9894_vm3, %v6166_v52, %v6168_v59  ;;  %v6118_v16 = vpop.permute.xlu1 %6117  ;;  %vm9908_vm3 = vmmov %vm9888_vm2 }
 0x52a   : > { %6356 = vst [vmem:[%s9107_s18 + $0x8] sm:$0xc0] %v6340_v35  ;;  %v6104_v56 = vadd.f32 %v6096_v46, %v6046_v1  ;;  %v6188_v14 = vsel %vm9895_vm5, %v6181_v31, %v8948_v24  ;;  %v6131_v21 = vsel %vm9896_vm12, %v6116_v3, %v6118_v16  ;;  %vm9909_vm5 = vcmp.le.s32.totalorder %v7790_v30, 30  ;;  %vm9910_vm12 = vmmov %vm9890_vm0 }
 0x52b   : > { %v6277_v8 = vrot.slane %v6153_v2, 6  ;;  %v6196_v15 = vmul.f32 0.25, %v6188_v14  ;;  %v6138_v10 = vsel %vm9897_vm6, %v6131_v21, %v8984_v58  ;;  %vm9911_vm6 = vmmov %vm9907_vm9 }
 0x52c   : > { %6262 = vst [vmem:[%s9107_s18 + $0x18] sm:$0x3] %v6104_v56  ;;  %v6146_v52 = vmul.f32 0.25, %v6138_v10  ;;  %v6216_v40 = vpop.permute.xlu0 %6215 }
 0x52d   : > { %6293 = vst [vmem:[%s9107_s18 + $0x10] sm:$0xc] %v6277_v8  ;;  %v6204_v25 = vadd.f32 %v6196_v15, %v6046_v1  ;;  %v6232_v24 = vsel %vm9898_vm10, %v6214_v6, %v6216_v40  ;;  %v6170_v5 = vpop.permute.xlu1 %6169  ;;  %vm9912_vm10 = vmmov %vm9888_vm2 }
 0x52e   : > { %v6154_v36 = vadd.f32 %v6146_v52, %v6054_v20  ;;  %v6237_v60 = vsel %vm9899_vm13, %v6232_v24, %v8961_v33  ;;  %v6180_v17 = vsel %vm9900_vm15, %v6168_v59, %v6170_v5  ;;  %v6048_v59 = vmul.f32 0.75, %v8994_v22  ;;  %vm9913_vm13 = vmmov %vm9901_vm7 }
 0x52f   : > { %v6310_v11 = vrot.slane %v6204_v25, 4  ;;  %v6245_v47 = vmul.f32 0.25, %v6237_v60  ;;  %v6189_v62 = vsel %vm9901_vm7, %v6180_v17, %v8982_v61  ;;  %vm9914_vm15 = vmmov %vm9888_vm2  ;;  %vm9915_vm7 = vcmp.le.s32.totalorder %v7777_v32, 30 }
 0x530   : > { %v6278_v54 = vrot.slane %v6154_v36, 6  ;;  %v6197_v6 = vmul.f32 0.25, %v6189_v62  ;;  %v6070_v63 = vpop.permute.xlu0 %6069 }
 0x531   : > { %6326 = vst [vmem:[%s9107_s18 + $0x18] sm:$0x30] %v6310_v11  ;;  %v6253_v41 = vadd.f32 %v6245_v47, %v6053_v29  ;;  %v6080_v12 = vsel %vm9902_vm4, %v6068_v19, %v6070_v63  ;;  %v6218_v33 = vpop.permute.xlu1 %6217  ;;  %vm9916_vm4 = vmmov %vm9890_vm0 }
 0x532   : > { %6294 = vst [vmem:[%s9107_s18 + $0x18] sm:$0xc] %v6278_v54  ;;  %v6205_v38 = vadd.f32 %v6197_v6, %v6047_v34  ;;  %v6089_v39 = vsel %vm9903_vm8, %v6080_v12, %v8982_v61  ;;  %v6231_v42 = vsel %vm9888_vm2, %v6216_v40, %v6218_v33  ;;  %v6056_v40 = vmul.f32 0.75, %v9030_v53 }
 0x533   : > { %v6341_v3 = vrot.slane %v6253_v41, 2  ;;  %v6097_v23 = vmul.f32 0.25, %v6089_v39  ;;  %v6238_v45 = vsel %vm9904_vm1, %v6231_v42, %v8984_v58  ;;  %v6055_v58 = vmul.f32 0.75, %v9007_v13  ;;  %vm9918_vm1 = vmmov %vm9909_vm5 }
 0x534   : > { %v6311_v7 = vrot.slane %v6205_v38, 4  ;;  %v6246_v19 = vmul.f32 0.25, %v6238_v45  ;;  %v6120_v37 = vpop.permute.xlu0 %6119  ;;  %v9251_v6 = vmul.f32 0.75, %v9028_v51  ;;  %vm9917_vm8 = vcmp.ge.s32.totalorder %v7777_v32, 1 }
 0x535   : > { %6357 = vst [vmem:[%s9107_s18 + $0x10] sm:$0xc0] %v6341_v3  ;;  %v6105_v9 = vadd.f32 %v6097_v23, %v6047_v34  ;;  %v6130_v29 = vsel %vm9890_vm0, %v6118_v16, %v6120_v37  ;;  %v9211_v57 = vpop.permute.xlu1 %6071  ;;  %v6057_v3 = vmul.f32 0.75, %v9062_v4 }
 0x536   : > { %6327 = vst [vmem:[%s9107_s18 + $0x20] sm:$0x30] %v6311_v7  ;;  %v6254_v61 = vadd.f32 %v6246_v19, %v6054_v20  ;;  %v6139_v43 = vsel %vm9905_vm11, %v6130_v29, %v9007_v13  ;;  %v6079_v50 = vsel %vm9906_vm14, %v6070_v63, %v9211_v57  ;;  %vm9919_vm11 = vcmp.ge.s32.totalorder %v9656_v18, 1  ;;  %vm9920_vm14 = vmmov %vm9890_vm0 }
 0x537   : > { %6263 = vst [vmem:[%s9107_s18 + $0x20] sm:$0x3] %v6105_v9  ;;  %v6147_v35 = vmul.f32 0.25, %v6139_v43  ;;  %v6090_v1 = vsel %vm9907_vm9, %v6079_v50, %v8994_v22  ;;  %vm9921_vm9 = vcmp.ge.s32.totalorder %v7633_v48, 1 }
 0x538   : > { %v6342_v46 = vrot.slane %v6254_v61, 2  ;;  %v6098_v2 = vmul.f32 0.25, %v6090_v1  ;;  %v6172_v31 = vpop.permute.xlu0 %6171 }
 0x539   : > { %v6155_v16 = vadd.f32 %v6147_v35, %v6055_v58  ;;  %v6179_v56 = vsel %vm9908_vm3, %v6170_v5, %v6172_v31  ;;  %v6122_v14 = vpop.permute.xlu1 %6121  ;;  %vm9922_vm3 = vmmov %vm9888_vm2 }
 0x53a   : > { %6358 = vst [vmem:[%s9107_s18 + $0x18] sm:$0xc0] %v6342_v46  ;;  %v6106_v21 = vadd.f32 %v6098_v2, %v6048_v59  ;;  %v6190_v8 = vsel %vm9909_vm5, %v6179_v56, %v8994_v22  ;;  %v6129_v15 = vsel %vm9910_vm12, %v6120_v37, %v6122_v14  ;;  %vm9923_vm5 = vcmp.le.s32.totalorder %v7633_v48, 30  ;;  %vm9924_vm12 = vmmov %vm9888_vm2 }
 0x53b   : > { %v6279_v10 = vrot.slane %v6155_v16, 6  ;;  %v6198_v20 = vmul.f32 0.25, %v6190_v8  ;;  %v6140_v52 = vsel %vm9911_vm6, %v6129_v15, %v9030_v53  ;;  %v6050_v56 = vmul.f32 0.75, %v9045_v28  ;;  %vm9925_vm6 = vmmov %vm9888_vm2 }
 0x53c   : > { %6264 = vst [vmem:[%s9107_s18 + $0x28] sm:$0x3] %v6106_v21  ;;  %v6148_v25 = vmul.f32 0.25, %v6140_v52  ;;  %v6220_v24 = vpop.permute.xlu0 %6219 }
 0x53d   : > { %6295 = vst [vmem:[%s9107_s18 + $0x20] sm:$0xc] %v6279_v10  ;;  %v6206_v5 = vadd.f32 %v6198_v20, %v6048_v59  ;;  %v6230_v22 = vsel %vm9912_vm10, %v6218_v33, %v6220_v24  ;;  %v6174_v36 = vpop.permute.xlu1 %6173  ;;  %vm9926_vm10 = vmmov %vm9915_vm7 }
 0x53e   : > { %v6156_v60 = vadd.f32 %v6148_v25, %v6056_v40  ;;  %v6239_v17 = vsel %vm9913_vm13, %v6230_v22, %v9007_v13  ;;  %v6178_v11 = vsel %vm9914_vm15, %v6172_v31, %v6174_v36  ;;  %vm9927_vm13 = vmmov %vm9923_vm5 }
 0x53f   : > { %v6312_v47 = vrot.slane %v6206_v5, 4  ;;  %v6247_v62 = vmul.f32 0.25, %v6239_v17  ;;  %v6191_v54 = vsel %vm9915_vm7, %v6178_v11, %v9028_v51  ;;  %vm9928_vm15 = vmmov %vm9890_vm0 }
 0x540   : > { %v6280_v34 = vrot.slane %v6156_v60, 6  ;;  %v6199_v63 = vmul.f32 0.25, %v6191_v54  ;;  %v6124_v41 = vpop.permute.xlu0 %6123  ;;  %vm9929_vm7 = vmmov %vm9890_vm0 }
 0x541   : > { %6328 = vst [vmem:[%s9107_s18 + $0x28] sm:$0x30] %v6312_v47  ;;  %v6255_v12 = vadd.f32 %v6247_v62, %v6055_v58  ;;  %v6128_v26 = vsel %vm9916_vm4, %v6122_v14, %v6124_v41  ;;  %v6222_v13 = vpop.permute.xlu1 %6221  ;;  %vm9930_vm4 = vmmov %vm9917_vm8 }
 0x542   : > { %6296 = vst [vmem:[%s9107_s18 + $0x28] sm:$0xc] %v6280_v34  ;;  %v6207_v33 = vadd.f32 %v6199_v63, %v9251_v6  ;;  %v6141_v38 = vsel %vm9917_vm8, %v6128_v26, %v9062_v4  ;;  %v6229_v39 = vsel %vm9888_vm2, %v6220_v24, %v6222_v13  ;;  %vm9931_vm8 = vmmov %vm9921_vm9 }
 0x543   : > { %v6343_v42 = vrot.slane %v6255_v12, 2  ;;  %v6149_v23 = vmul.f32 0.25, %v6141_v38  ;;  %v6240_v45 = vsel %vm9918_vm1, %v6229_v39, %v9030_v53 }
 0x544   : > { %v6313_v7 = vrot.slane %v6207_v33, 4  ;;  %v6248_v19 = vmul.f32 0.25, %v6240_v45  ;;  %v6060_v37 = vpop.permute.xlu0 %6059 }
 0x545   : > { %6359 = vst [vmem:[%s9107_s18 + $0x20] sm:$0xc0] %v6343_v42  ;;  %v6157_v9 = vadd.f32 %v6149_v23, %v6057_v3  ;;  %v6084_v29 = vsel %vm9890_vm0, %v6060_v37, %v9089_v49  ;;  %v6126_v61 = vpop.permute.xlu1 %6125  ;;  %v6058_v49 = vmul.f32 0.75, %v9075_v0 }
 0x546   : > { %6329 = vst [vmem:[%s9107_s18 + $0x30] sm:$0x30] %v6313_v7  ;;  %v6256_v43 = vadd.f32 %v6248_v19, %v6056_v40  ;;  %v6085_v50 = vsel %vm9919_vm11, %v6084_v29, %v8879_v55  ;;  %v6127_v30 = vsel %vm9920_vm14, %v6124_v41, %v6126_v61 }
 0x547   : > { %v6281_v53 = vrot.slane %v6157_v9, 6  ;;  %v6093_v58 = vmul.f32 0.25, %v6085_v50  ;;  %v6142_v35 = vsel %vm9921_vm9, %v6127_v30, %v9075_v0 }
 0x548   : > { %v6344_v1 = vrot.slane %v6256_v43, 2  ;;  %v6150_v46 = vmul.f32 0.25, %v6142_v35  ;;  %v6176_v59 = vpop.permute.xlu0 %6175 }
 0x549   : > { %6297 = vst [vmem:[%s9107_s18 + $0x30] sm:$0xc] %v6281_v53  ;;  %v6101_v18 = vadd.f32 %v6093_v58, %v9110_v27  ;;  %v6177_v55 = vsel %vm9922_vm3, %v6174_v36, %v6176_v59  ;;  %v6226_v16 = vpop.permute.xlu1 %6225 }
 0x54a   : > { %6360 = vst [vmem:[%s9107_s18 + $0x28] sm:$0xc0] %v6344_v1  ;;  %v6158_v2 = vadd.f32 %v6150_v46, %v6058_v49  ;;  %v6192_v31 = vsel %vm9923_vm5, %v6177_v55, %v9045_v28 }
 0x54b   : > { %6259 = vst [vmem:[%s9107_s18] sm:$0x3] %v6101_v18  ;;  %v6200_v14 = vmul.f32 0.25, %v6192_v31 }
 0x54c   : > { %v6282_v21 = vrot.slane %v6158_v2, 6  ;;  %v6224_v8 = vpop.permute.xlu0 %6223 }
 0x54d   : > { %v6208_v15 = vadd.f32 %v6200_v14, %v6050_v56  ;;  %v6227_v27 = vsel %vm9924_vm12, %v6224_v8, %v6226_v16  ;;  %v6228_v10 = vsel %vm9925_vm6, %v6222_v13, %v6224_v8  ;;  %v6076_v5 = vpop.permute.xlu1 %6075 }
 0x54e   : > { %6298 = vst [vmem:[%s9107_s18 + $0x38] sm:$0xc] %v6282_v21  ;;  %v6241_v20 = vsel %vm9926_vm10, %v6228_v10, %v9062_v4  ;;  %v6242_v52 = vsel %vm9927_vm13, %v6227_v27, %v9075_v0 }
 0x54f   : > { %v6314_v40 = vrot.slane %v6208_v15, 4  ;;  %v6249_v25 = vmul.f32 0.25, %v6241_v20  ;;  %v6250_v24 = vmul.f32 0.25, %v6242_v52 }
 0x550   : > { %v6074_v22 = vpop.permute.xlu0 %6073 }
 0x551   : > { %6330 = vst [vmem:[%s9107_s18 + $0x38] sm:$0x30] %v6314_v40  ;;  %v6257_v36 = vadd.f32 %v6249_v25, %v6057_v3  ;;  %v6258_v60 = vadd.f32 %v6250_v24, %v6058_v49  ;;  %v6077_v17 = vsel %vm9928_vm15, %v6074_v22, %v6076_v5  ;;  %v6078_v4 = vsel %vm9929_vm7, %v9211_v57, %v6074_v22 }
 0x552   : > { %v6091_v0 = vsel %vm9930_vm4, %v6078_v4, %v9028_v51  ;;  %v6092_v11 = vsel %vm9931_vm8, %v6077_v17, %v9045_v28 }
 0x553   : > { %v6345_v47 = vrot.slane %v6257_v36, 2  ;;  %v6346_v62 = vrot.slane %v6258_v60, 2  ;;  %v6099_v54 = vmul.f32 0.25, %v6091_v0  ;;  %v6100_v34 = vmul.f32 0.25, %v6092_v11 }
 0x555   : > { %6361 = vst [vmem:[%s9107_s18 + $0x30] sm:$0xc0] %v6345_v47  ;;  %6362 = vst [vmem:[%s9107_s18 + $0x38] sm:$0xc0] %v6346_v62  ;;  %v6107_v63 = vadd.f32 %v6099_v54, %v9251_v6  ;;  %v6108_v41 = vadd.f32 %v6100_v34, %v6050_v56 }
 0x557   : > { %6265 = vst [vmem:[%s9107_s18 + $0x30] sm:$0x3] %v6107_v63  ;;  %6266 = vst [vmem:[%s9107_s18 + $0x38] sm:$0x3] %v6108_v41 }
 0x558 PF: > { %s21_s29 = sadd.s32 1, %s7052_s29   ;;  %s9932_s27 = smov %s7048_s28 }
 0x559   : > { %p18_p8 = scmp.ge.s32.totalorder %s21_s29, 4   ;;  %s9933_s28 = smov %s9935_s13 }
 0x55b   :  { %20 = sbr.rel (!%p18_p8) target bundleno = 4 (0x4), region = 114 }
 0x562   :  { %6393 = vsyncpa [#allocation3], 1 }
 0x563   :  { %6395 = vsyncpa [#allocation3 + $0x1], 1 }
 0x564   :  { %6396 = vsyncpa [#allocation7], 1 }
 0x565   :  { %6397 = vsyncpa [#allocation4], 1 }
 0x566   :  { %6399 = vsyncpa [#allocation4 + $0x1], 1 }

</bundles_post_ra>
